<compile_context>
chip_gen: v7x
topology: tpu7x:2x2x1
jax: 0.10.0
libtpu: 0.0.40
codegen_flags: <defaults>
</compile_context>

<pallas_src>
import jax
import jax.numpy as jnp
from jax import lax
from jax.experimental import pallas as pl
from jax.experimental.pallas import tpu as pltpu

# --- module "parameters" (deterministic, from __init__) -----------------------
N_KERNELS = 5
MUL_FACTOR = 2.0
BANDWIDTH = None  # default bandwidth=None -> data-dependent bandwidth
MULTIPLIERS = tuple(
    float(MUL_FACTOR ** (i - N_KERNELS // 2)) for i in range(N_KERNELS)
)  # (0.25, 0.5, 1.0, 2.0, 4.0)
_MAX_MULT = max(MULTIPLIERS)
# True when max_mult / m form exactly {1, 2, 4, 8, ...} -> repeated-squaring path.
_POW2_LADDER = sorted(_MAX_MULT / m for m in MULTIPLIERS) == [
    float(2 ** j) for j in range(N_KERNELS)
]


def rbf_tile_kernel(two_s_ref, xi_ref, xj_ref, si_ref, sj_ref, out_ref):
    """One (TM, TN) tile of the multi-kernel RBF sum.

    two_s_ref: SMEM (1,) f32 scalar = 2 / (bandwidth * max_multiplier) (= -2*s).
    xi_ref:    (TM, D) row block (native input dtype).
    xj_ref:    (TN, D) col block (native input dtype).
    si_ref:    (TM, 1) f32 = s * ||x_i||^2   with s = -1/(bw*max_mult).
    sj_ref:    (1, TN) f32 = s * ||x_j||^2.
    out_ref:   (TM, TN) f32 output tile.
    """
    two_s = two_s_ref[0]

    # Fold the (-2*scale) factor into the small (TM, D) operand: O(TM*D) work
    # instead of O(TM*TN) per-element multiplies on the output tile.
    xi = xi_ref[...].astype(jnp.float32) * two_s   # (TM, D)
    xj = xj_ref[...].astype(jnp.float32)           # (TN, D)

    # Gram via MXU, contracting D of both operands (no XLU transpose).
    gram = lax.dot_general(
        xi, xj,
        dimension_numbers=(((1,), (1,)), ((), ())),
        preferred_element_type=jnp.float32,
    )  # (TM, TN) = (-2*s) * <x_i, x_j>

    # arg = s * L2 = s*||x_i||^2 + s*||x_j||^2 + (-2*s)*<x_i, x_j>   (<= 0)
    arg = jnp.minimum(si_ref[...] + sj_ref[...] + gram, 0.0)

    if _POW2_LADDER:
        # One EUP exp per element; remaining kernels via repeated squaring (VPU):
        # e + e^2 + e^4 + e^8 + e^16   (exponents max_mult/m are powers of 2).
        e = jnp.exp(arg)
        acc = e
        for _ in range(N_KERNELS - 1):
            e = e * e
            acc = acc + e
    else:
        # Generic fallback (still divide-free).
        acc = jnp.zeros_like(arg)
        for m in MULTIPLIERS:
            acc = acc + jnp.exp(arg * float(_MAX_MULT / m))

    out_ref[...] = acc.astype(out_ref.dtype)


def _round_up(x, m):
    return ((x + m - 1) // m) * m


def _tiles(n):
    """Pick lane-dense tiles and the padded N (n_pad is a multiple of both)."""
    n_lane = _round_up(max(n, 1), 128)
    tn = min(1024, n_lane)                 # wide lane-dense output stores
    n_pad = _round_up(max(n, 1), tn)       # multiple of tn (and of 128)
    if n_pad % 256 == 0 and n_pad // 256 >= 2:
        tm = 256                           # >= 2 blocks on the sharded axis (megacore)
    elif n_pad % 128 == 0 and n_pad > 128:
        tm = 128
    else:
        tm = n_pad
    return tm, tn, n_pad


@jax.jit
def rbf(x):
    """x: (N, D) float array (f32 or bf16). Returns (N, N) f32 RBF-kernel-sum matrix."""
    n, d = x.shape
    # f32 view only feeds fused reductions below; the pallas_call gets native-dtype x.
    x32 = x.astype(jnp.float32)

    # Per-row squared norms, reused by every output tile.
    sqn = jnp.sum(x32 * x32, axis=1)  # (N,) f32

    if BANDWIDTH is None:
        # sum_{i,j}||x_i - x_j||^2 = 2*N*sum_i||x_i - mean||^2  (translation-invariant;
        # centering avoids the catastrophic cancellation of 2N*sum||x||^2 - 2||sum x||^2).
        xc = x32 - jnp.mean(x32, axis=0, keepdims=True)
        sum_l2 = 2.0 * n * jnp.sum(xc * xc)
        bandwidth = sum_l2 / float(max(n * n - n, 1))
    else:
        bandwidth = jnp.float32(BANDWIDTH)

    s = (-1.0 / (bandwidth * _MAX_MULT)).astype(jnp.float32)   # negative scale
    two_s = (-2.0 * s).reshape(1)                               # (1,) f32 SMEM scalar

    tm, tn, n_pad = _tiles(n)
    grid = (n_pad // tm, n_pad // tn)

    if n_pad != n:
        x_in = jnp.pad(x, ((0, n_pad - n), (0, 0)))
        sq_in = jnp.pad(sqn, (0, n_pad - n))
    else:
        x_in, sq_in = x, sqn
    s_row = (s * sq_in).astype(jnp.float32).reshape(n_pad, 1)   # (N_pad, 1)
    s_col = s_row.reshape(1, n_pad)                             # (1, N_pad)

    in_itemsize = jnp.dtype(x.dtype).itemsize
    out = pl.pallas_call(
        rbf_tile_kernel,
        out_shape=jax.ShapeDtypeStruct((n_pad, n_pad), jnp.float32),
        grid_spec=pltpu.PrefetchScalarGridSpec(
            num_scalar_prefetch=1,
            grid=grid,
            in_specs=[
                pl.BlockSpec((tm, d), lambda i, j, sp: (i, 0)),   # rows block (native dtype)
                pl.BlockSpec((tn, d), lambda i, j, sp: (j, 0)),   # cols block (native dtype)
                pl.BlockSpec((tm, 1), lambda i, j, sp: (i, 0)),   # s * ||x_i||^2
                pl.BlockSpec((1, tn), lambda i, j, sp: (0, j)),   # s * ||x_j||^2
            ],
            out_specs=pl.BlockSpec((tm, tn), lambda i, j, sp: (i, j)),
        ),
        compiler_params=pltpu.CompilerParams(
            dimension_semantics=("parallel", "parallel"),
            vmem_limit_bytes=32 * 1024 * 1024,
        ),
        cost_estimate=pl.CostEstimate(
            flops=2 * n_pad * n_pad * d + 8 * n_pad * n_pad,
            transcendentals=n_pad * n_pad,
            bytes_accessed=(
                n_pad * n_pad * 4                              # output (written once)
                + (grid[0] + 1) * n_pad * d * in_itemsize      # xj re-fetched grid[0] times + xi once
                + 2 * n_pad * 4                                # squared-norm vectors
            ),
        ),
    )(two_s, x_in, x_in, s_row, s_col)

    if n_pad != n:
        out = out[:n, :n]
    return out


def rbf_reference(x):
    """Pure-JAX reference matching the PyTorch module (cdist**2 based)."""
    x = x.astype(jnp.float32)
    diff = x[:, None, :] - x[None, :, :]
    l2 = jnp.sum(diff * diff, axis=-1)
    n = x.shape[0]
    bw = jnp.sum(l2) / float(n * n - n) if BANDWIDTH is None else jnp.float32(BANDWIDTH)
    mults = jnp.asarray(MULTIPLIERS, jnp.float32)
    return jnp.sum(jnp.exp(-l2[None] / (bw * mults)[:, None, None]), axis=0)


if __name__ == "__main__":
    key = jax.random.PRNGKey(0)
    N, D = 512, 32  # exercises a (2, 1) grid with lane-dense 256x512 output tiles
    x = jax.random.normal(key, (N, D), dtype=jnp.float32)

    out = jax.block_until_ready(rbf(x))

    ref = rbf_reference(x)
    assert out.shape == (N, N) and out.dtype == jnp.float32
    assert jnp.allclose(out, ref, atol=1e-3, rtol=1e-3), float(jnp.max(jnp.abs(out - ref)))

    print("KERNEL_OK")
</pallas_src>

<mosaic_0001>
module attributes {stable_mosaic.version = 11 : i64} {
  func.func @rbf_tile_kernel(%arg0: i32, %arg1: i32, %arg2: memref<1xf32, #tpu.memory_space<smem>>, %arg3: memref<256x32xf32, #tpu.memory_space<vmem>>, %arg4: memref<512x32xf32, #tpu.memory_space<vmem>>, %arg5: memref<256x1xf32, #tpu.memory_space<vmem>>, %arg6: memref<1x512xf32, #tpu.memory_space<vmem>>, %arg7: memref<256x512xf32, #tpu.memory_space<vmem>>) attributes {dimension_semantics = [#tpu.dimension_semantics<parallel>, #tpu.dimension_semantics<parallel>], iteration_bounds = array<i64: 2, 1>, scalar_prefetch = 1 : i64, scratch_operands = 0 : i64, tpu.core_type = #tpu.core_type<tc>, window_params = [{transform_indices = @transform_0, window_bounds = array<i64: 256, 32>}, {transform_indices = @transform_1, window_bounds = array<i64: 512, 32>}, {transform_indices = @transform_2, window_bounds = array<i64: 256, 1>}, {transform_indices = @transform_3, window_bounds = array<i64: 1, 512>}, {transform_indices = @transform_4, window_bounds = array<i64: 256, 512>}]} {
    %c0 = arith.constant 0 : index
    %0 = memref.load %arg2[%c0] : memref<1xf32, #tpu.memory_space<smem>>
    %c0_0 = arith.constant 0 : index
    %c0_1 = arith.constant 0 : index
    %1 = vector.load %arg3[%c0_0, %c0_1] : memref<256x32xf32, #tpu.memory_space<vmem>>, vector<256x32xf32>
    %2 = vector.broadcast %0 : f32 to vector<256x32xf32>
    %3 = arith.mulf %1, %2 : vector<256x32xf32>
    %c0_2 = arith.constant 0 : index
    %c0_3 = arith.constant 0 : index
    %4 = vector.load %arg4[%c0_2, %c0_3] : memref<512x32xf32, #tpu.memory_space<vmem>>, vector<512x32xf32>
    %cst = arith.constant dense<0.000000e+00> : vector<256x512xf32>
    %5 = tpu.matmul %3, %4, %cst {dimension_numbers = #tpu.dot_dimension_numbers<[1], [1], [0], [0], [0, 0, 1, 0], [], []>} : vector<256x32xf32>, vector<512x32xf32>, vector<256x512xf32> -> vector<256x512xf32>
    %c0_4 = arith.constant 0 : index
    %c0_5 = arith.constant 0 : index
    %6 = vector.load %arg5[%c0_4, %c0_5] : memref<256x1xf32, #tpu.memory_space<vmem>>, vector<256x1xf32>
    %c0_6 = arith.constant 0 : index
    %c0_7 = arith.constant 0 : index
    %7 = vector.load %arg6[%c0_6, %c0_7] : memref<1x512xf32, #tpu.memory_space<vmem>>, vector<1x512xf32>
    %8 = vector.broadcast %6 : vector<256x1xf32> to vector<256x512xf32>
    %9 = vector.broadcast %7 : vector<1x512xf32> to vector<256x512xf32>
    %10 = arith.addf %8, %9 : vector<256x512xf32>
    %11 = arith.addf %10, %5 : vector<256x512xf32>
    %cst_8 = arith.constant 0.000000e+00 : f32
    %12 = vector.broadcast %cst_8 : f32 to vector<256x512xf32>
    %13 = arith.minimumf %11, %12 : vector<256x512xf32>
    %14 = math.exp %13 : vector<256x512xf32>
    %15 = arith.mulf %14, %14 : vector<256x512xf32>
    %16 = arith.addf %14, %15 : vector<256x512xf32>
    %17 = arith.mulf %15, %15 : vector<256x512xf32>
    %18 = arith.addf %16, %17 : vector<256x512xf32>
    %19 = arith.mulf %17, %17 : vector<256x512xf32>
    %20 = arith.addf %18, %19 : vector<256x512xf32>
    %21 = arith.mulf %19, %19 : vector<256x512xf32>
    %22 = arith.addf %20, %21 : vector<256x512xf32>
    %c0_9 = arith.constant 0 : index
    %c0_10 = arith.constant 0 : index
    %23 = vector.load %arg7[%c0_9, %c0_10] : memref<256x512xf32, #tpu.memory_space<vmem>>, vector<256x512xf32>
    tpu.vector_store %arg7[%c0_9, %c0_10], %22 {strides = array<i32>} : memref<256x512xf32, #tpu.memory_space<vmem>>, vector<256x512xf32>,
    return
  }
  func.func @transform_0(%arg0: i32, %arg1: i32, %arg2: memref<1xf32, #tpu.memory_space<smem>>) -> (i32, i32) {
    %c0_i32 = arith.constant 0 : i32
    %c0_i32_0 = arith.constant 0 : i32
    return %arg0, %c0_i32 : i32, i32
  }
  func.func @transform_1(%arg0: i32, %arg1: i32, %arg2: memref<1xf32, #tpu.memory_space<smem>>) -> (i32, i32) {
    %c0_i32 = arith.constant 0 : i32
    %c0_i32_0 = arith.constant 0 : i32
    return %arg1, %c0_i32 : i32, i32
  }
  func.func @transform_2(%arg0: i32, %arg1: i32, %arg2: memref<1xf32, #tpu.memory_space<smem>>) -> (i32, i32) {
    %c0_i32 = arith.constant 0 : i32
    %c0_i32_0 = arith.constant 0 : i32
    return %arg0, %c0_i32 : i32, i32
  }
  func.func @transform_3(%arg0: i32, %arg1: i32, %arg2: memref<1xf32, #tpu.memory_space<smem>>) -> (i32, i32) {
    %c0_i32 = arith.constant 0 : i32
    %c0_i32_0 = arith.constant 0 : i32
    return %c0_i32, %arg1 : i32, i32
  }
  func.func @transform_4(%arg0: i32, %arg1: i32, %arg2: memref<1xf32, #tpu.memory_space<smem>>) -> (i32, i32) {
    %c0_i32 = arith.constant 0 : i32
    return %arg0, %arg1 : i32, i32
  }
}

</mosaic_0001>

<bundles_post_ra>
// kernel: rbf.1
= control target key start
LH: loop header
LB: loop body
LE: loop exit
PB: predicated region body
PF: predicated region fallthrough
CT: control target
= control target key end

     0   :  { %s5913_s0 = inlined_call_operand.<no memory space> [shape: f32[1], index: 0, kind: input, shape index: {}]   ;;  %s5914_s1 = inlined_call_operand.vmem [shape: f32[512,32], index: 1, kind: input, shape index: {}, may-alias: {1,2}]   ;;  %s5915_s2 = inlined_call_operand.vmem [shape: f32[512,32], index: 2, kind: input, shape index: {}, may-alias: {1,2}]   ;;  %s5916_s3 = inlined_call_operand.vmem [shape: f32[512,1], index: 3, kind: input, shape index: {}]   ;;  %s5917_s4 = inlined_call_operand.vmem [shape: f32[1,512], index: 4, kind: input, shape index: {}]   ;;  %s5918_s5 = inlined_call_operand.hbm [shape: f32[512,512], index: 5, kind: output, shape index: {}]  }
   0x1   :  { %10 = sst [smem:[#allocation3]] %s5913_s0 }
   0x2   :  { %11 = vsyncpa [#allocation5], 0 }
   0x3   :  { %13 = vsyncpa [#allocation5 + $0x1], 0  ;;  %s4216_s20 = smov 0   ;;  %s4218_s21 = smov 0  }
   0x4   :  { %s4220_s22 = smov 0   ;;  %s4222_s23 = smov 0  }
   0x5   :  { %s4224_s24 = smov 0   ;;  %s4226_s25 = smov 0  }
   0x6 LB: > { %s3347_s0 = sadd.s32 4294967295, %s4177_s25   ;;  %s3348_s26 = sadd.s32 4294967294, %s4177_s25   ;;  %s4177_s25 = sphi %s4226_s25, %s19_s25   ;;  %s4173_s24 = sphi %s4224_s24, %s6022_s24   ;;  %s4169_s23 = sphi %s4222_s23, %s6021_s23   ;;  %s4165_s22 = sphi %s4220_s22, %s6020_s22   ;;  %s4161_s21 = sphi %s4218_s21, %s6019_s21   ;;  %s4157_s20 = sphi %s4216_s20, %s6018_s20  }
   0x7   : > { %s31_s27 = sadd.s32 1, %s4173_s24  ;;  %s144_s28 = sadd.s32 1, %s4165_s22 }
   0x8   : > { %p33_p0 = scmp.ge.s32.totalorder %s31_s27, 2  ;;  %p154_p1 = scmp.ne.s32.totalorder %s4165_s22, %s4161_s21 }
   0x9   : > { %p155_p2 = scmp.eq.s32.totalorder %s3347_s0, 1  ;;  %p160_p3 = scmp.ne.s32.totalorder %s4161_s21, %s4157_s20 }
   0xa   : > { %s6024_s27 = smov (%p33_p0, %s31_s27), 0  ;;  %p161_p5 = scmp.eq.s32.totalorder %s3348_s26, 1 }
   0xb   : > { %p4256_p4 = por %p155_p2, %p154_p1  ;;  %s139_s30 = ssub.s32 %s4173_s24, %s6024_s27 }
   0xc   : > { %p3353_p6 = scmp.ge.s32.totalorder %s4177_s25, 1  ;;  %p142_p7 = scmp.eq.s32.totalorder %s139_s30, 0 }
   0xd   : > { %p4263_p8 = por %p161_p5, %p160_p3  ;;  %p214_p9 = scmp.lt.s32.totalorder %s4177_s25, 3 }
   0xe   : > { %s4269_s7 = scalar_select %p142_p7, %s4165_s22, %s144_s28  }
   0xf   : > { %p215_p10 = pnand %p3353_p6, %p214_p9 }
  0x11   : > { %218 = sbr.rel (%p215_p10) target bundleno = 746 (0x2ea), region = 36 }
  0x18   : > { %v361_v0 = vld [vmem:[%s5915_s2 + $0x80] sm:$0xff]  ;;  %v362_v1 = vld [vmem:[%s5915_s2 + $0x88] sm:$0xff]  ;;  %vm409_vm0 = vcmask 261120   ;;  %v363_v13 = vld [vmem:[%s5915_s2 + $0x90] sm:$0xff]  ;;  %s3355_s16 = sshll.u32 %s4169_s23, 5  ;;  %s279_s18 = sld [smem:[#allocation3]] }
  0x19   : > { %v393_v2 = vld [vmem:[%s5915_s2 + $0x180] sm:$0xff]  ;;  %v3687_v3 = vpack.c.bf16 %v362_v1, %v361_v0  ;;  %vm4282_vm1 = vmpackc.low %vm409_vm0, %vm409_vm0  ;;  %v394_v5 = vld [vmem:[%s5915_s2 + $0x188] sm:$0xff]  ;;  %p255_p11 = scmp.lt.s32.totalorder %s3355_s16, 63  ;;  %v4179_v55 = vmov 0   ;;  %s3494_s15 = sshll.u32 %s4169_s23, 14 }
  0x1a   : > { %v345_v6 = vld [vmem:[%s5915_s2] sm:$0xff]  ;;  %v3735_v7 = vpack.c.bf16 %v394_v5, %v393_v2  ;;  %v346_v8 = vld [vmem:[%s5915_s2 + $0x8] sm:$0xff]  ;;  %v364_v14 = vld [vmem:[%s5915_s2 + $0x98] sm:$0xff]  ;;  %3841 = vset.pattern.permute.xlu0 %v4179_v55  ;;  %3842 = vset.pattern.permute.xlu1 %v4179_v55  ;;  %s5860_s28 = scalar_lea.hbm %s5918_s5, %s3494_s15  ;;  %s4180_s9 = smov [#allocation4]  }
  0x1b   : > { %v377_v9 = vld [vmem:[%s5915_s2 + $0x100] sm:$0xff]  ;;  %v378_v10 = vld [vmem:[%s5915_s2 + $0x108] sm:$0xff]  ;;  %3689 = vmatprep.subr.msk.bf16.mxu0 %vm4282_vm1, %v3687_v3  ;;  %v3690_v11 = vpack.c.bf16 %v346_v8, %v345_v6  ;;  %v395_v15 = vld [vmem:[%s5915_s2 + $0x190] sm:$0xff]  ;;  %v3693_v16 = vpack.c.bf16 %v364_v14, %v363_v13  ;;  %s6026_s16 = smov (!%p255_p11, %s3355_s16), 63  ;;  %s4103_s10 = sshll.u32 %s4180_s9, 4  ;;  %s4104_s10 = int_to_ptr.vmem [resolvable:$false] %s4103_s10 }
  0x1c   : > { %v3738_v12 = vpack.c.bf16 %v378_v10, %v377_v9  ;;  %3737 = vmatprep.subr.msk.bf16.mxu1 %vm4282_vm1, %v3735_v7  ;;  %v396_v17 = vld [vmem:[%s5915_s2 + $0x198] sm:$0xff]  ;;  %v347_v19 = vld [vmem:[%s5915_s2 + $0x10] sm:$0xff]  ;;  %v365_v23 = vld [vmem:[%s5915_s2 + $0xa0] sm:$0xff]  ;;  %s3356_s26 = sshll.u32 %s6026_s16, 3  ;;  %s251_s16 = sand.u32 1, %s4161_s21  }
  0x1d   : > { %3692 = vmatpush3.bf16.xpose.msk.msra.mxu0 %vm4282_vm1, %v3690_v11  ;;  %v3741_v18 = vpack.c.bf16 %v396_v17, %v395_v15  ;;  %v348_v20 = vld [vmem:[%s5915_s2 + $0x18] sm:$0xff]  ;;  %v379_v21 = vld [vmem:[%s5915_s2 + $0x110] sm:$0xff]  ;;  %v366_v24 = vld [vmem:[%s5915_s2 + $0xa8] sm:$0xff]  ;;  %s4390_s8 = scalar_lea.vmem %s5914_s1, %s3356_s26  ;;  %s4458_s14 = scalar_lea.vmem %s5916_s3, %s3356_s26 }
  0x1e   : > { %3740 = vmatpush3.bf16.xpose.msk.msra.mxu1 %vm4282_vm1, %v3738_v12  ;;  %3695 = vmatprep.subr.msk.bf16.mxu0 %vm4282_vm1, %v3693_v16  ;;  %v380_v22 = vld [vmem:[%s5915_s2 + $0x118] sm:$0xff]  ;;  %v397_v25 = vld [vmem:[%s5915_s2 + $0x1a0] sm:$0xff]  ;;  %v398_v26 = vld [vmem:[%s5915_s2 + $0x1a8] sm:$0xff]  ;;  %v3696_v27 = vpack.c.bf16 %v348_v20, %v347_v19  ;;  %v3699_v29 = vpack.c.bf16 %v366_v24, %v365_v23  ;;  %v4392_v43 = vstv %s279_s18  ;;  %s5139_s26 = sshll.u32 %s251_s16, 10  ;;  %s5867_s30 = scalar_lea.sflag [#allocation5], %s251_s16 }
  0x1f   : > { %3743 = vmatprep.subr.msk.bf16.mxu1 %vm4282_vm1, %v3741_v18  ;;  %v3744_v28 = vpack.c.bf16 %v380_v22, %v379_v21  ;;  %v3747_v30 = vpack.c.bf16 %v398_v26, %v397_v25  ;;  %v349_v31 = vld [vmem:[%s5915_s2 + $0x20] sm:$0xff]  ;;  %v350_v32 = vld [vmem:[%s5915_s2 + $0x28] sm:$0xff]  ;;  %v367_v35 = vld [vmem:[%s5915_s2 + $0xb0] sm:$0xff]  ;;  %s5158_s18 = scalar_lea.vmem [#allocation4], %s5139_s26  ;;  %s4105_s11 = scalar_lea.vmem %s4104_s10, 32768 }
  0x20   : > { %v381_v33 = vld [vmem:[%s5915_s2 + $0x120] sm:$0xff]  ;;  %v382_v34 = vld [vmem:[%s5915_s2 + $0x128] sm:$0xff]  ;;  %v368_v36 = vld [vmem:[%s5915_s2 + $0xb8] sm:$0xff]  ;;  %v3702_v39 = vpack.c.bf16 %v350_v32, %v349_v31  ;;  %s3235_s17 = sshll.u32 %s5158_s18, 4  ;;  %s5862_s17 = int_to_ptr.vmem [resolvable:$true] %s3235_s17 }
  0x21   : > { %v399_v37 = vld [vmem:[%s5915_s2 + $0x1b0] sm:$0xff]  ;;  %v400_v38 = vld [vmem:[%s5915_s2 + $0x1b8] sm:$0xff]  ;;  %v3750_v40 = vpack.c.bf16 %v382_v34, %v381_v33  ;;  %v3705_v41 = vpack.c.bf16 %v368_v36, %v367_v35  ;;  %v280_v48 = vld [vmem:[%s4390_s8] sm:$0xff]  ;;  %s4099_s23 = scalar_lea.vmem %s5862_s17, 16384  ;;  %p4106_p1 = scmp.lt.s32.totalorder %s5862_s17, %s4104_s10 }
  0x22   : > { %v3753_v42 = vpack.c.bf16 %v400_v38, %v399_v37  ;;  %v351_v44 = vld [vmem:[%s5915_s2 + $0x30] sm:$0xff]  ;;  %v352_v45 = vld [vmem:[%s5915_s2 + $0x38] sm:$0xff]  ;;  %v369_v49 = vld [vmem:[%s5915_s2 + $0xc0] sm:$0xff]  ;;  %v4422_v51 = vmul.f32 %v4392_v43, %v280_v48  ;;  %p4100_p12 = scmp.ne.s32.totalorder %s5862_s17, %s4099_s23  ;;  %p4107_p2 = scmp.lt.s32.totalorder %s4105_s11, %s4099_s23 }
  0x23   : > { %v383_v46 = vld [vmem:[%s5915_s2 + $0x130] sm:$0xff]  ;;  %v384_v47 = vld [vmem:[%s5915_s2 + $0x138] sm:$0xff]  ;;  %v370_v50 = vld [vmem:[%s5915_s2 + $0xc8] sm:$0xff]  ;;  %v3708_v56 = vpack.c.bf16 %v352_v45, %v351_v44 }
  0x24   : > { %v401_v52 = vld [vmem:[%s5915_s2 + $0x1c0] sm:$0xff]  ;;  %v402_v53 = vld [vmem:[%s5915_s2 + $0x1c8] sm:$0xff]  ;;  %v286_v54 = vld [vmem:[%s4390_s8 + $0x30] sm:$0xff]  ;;  %v3756_v57 = vpack.c.bf16 %v384_v47, %v383_v46  ;;  %3527 = vmatprep.mubr.msk.f32.mxu0 %vm409_vm0, %v4422_v51  ;;  %3623 = vmatprep.mubr.msk.f32.mxu1 %vm409_vm0, %v4422_v51  ;;  %v3711_v62 = vpack.c.bf16 %v370_v50, %v369_v49  ;;  %p4101_p13 = pnand %p4100_p12, %p4256_p4  ;;  %p4108_p3 = por %p4107_p2, %p4106_p1 }
  0x25   : > { %3698 = vmatpush3.bf16.xpose.msk.msra.mxu0 %vm4282_vm1, %v3696_v27  ;;  %v4436_v58 = vmul.f32 %v4392_v43, %v286_v54  ;;  %v287_v59 = vld [vmem:[%s4390_s8 + $0x38] sm:$0xff]  ;;  %v288_v60 = vld [vmem:[%s4390_s8 + $0x40] sm:$0xff]  ;;  %v289_v61 = vld [vmem:[%s4390_s8 + $0x48] sm:$0xff]  ;;  %v3759_v6 = vpack.c.bf16 %v402_v53, %v401_v52 }
  0x26   : > { %3746 = vmatpush3.bf16.xpose.msk.msra.mxu1 %vm4282_vm1, %v3744_v28  ;;  %3701 = vmatprep.subr.msk.bf16.mxu0 %vm4282_vm1, %v3699_v29  ;;  %v4442_v63 = vmul.f32 %v4392_v43, %v287_v59  ;;  %v4445_v0 = vmul.f32 %v4392_v43, %v288_v60  ;;  %v4448_v1 = vmul.f32 %v4392_v43, %v289_v61  ;;  %v290_v2 = vld [vmem:[%s4390_s8 + $0x50] sm:$0xff]  ;;  %v291_v3 = vld [vmem:[%s4390_s8 + $0x58] sm:$0xff]  ;;  %v292_v5 = vld [vmem:[%s4390_s8 + $0x60] sm:$0xff]  ;;  %p4102_p0 = pneg %p4101_p13 }
  0x27   : > { %3749 = vmatprep.subr.msk.bf16.mxu1 %vm4282_vm1, %v3747_v30  ;;  %v4461_v7 = vmul.f32 %v4392_v43, %v290_v2  ;;  %v4464_v8 = vmul.f32 %v4392_v43, %v291_v3  ;;  %v4467_v9 = vmul.f32 %v4392_v43, %v292_v5  ;;  %v293_v10 = vld [vmem:[%s4390_s8 + $0x68] sm:$0xff]  ;;  %v294_v11 = vld [vmem:[%s4390_s8 + $0x70] sm:$0xff]  ;;  %v295_v12 = vld [vmem:[%s4390_s8 + $0x78] sm:$0xff] }
  0x28   : > { %v4473_v13 = vmul.f32 %v4392_v43, %v293_v10  ;;  %v4476_v14 = vmul.f32 %v4392_v43, %v294_v11  ;;  %v4479_v15 = vmul.f32 %v4392_v43, %v295_v12  ;;  %v296_v16 = vld [vmem:[%s4390_s8 + $0x80] sm:$0xff]  ;;  %v297_v17 = vld [vmem:[%s4390_s8 + $0x88] sm:$0xff]  ;;  %v298_v18 = vld [vmem:[%s4390_s8 + $0x90] sm:$0xff]  ;;  %p4109_p5 = pnand %p4108_p3, %p4102_p0 }
  0x29   : > { %v353_v19 = vld [vmem:[%s5915_s2 + $0x40] sm:$0xff]  ;;  %v354_v20 = vld [vmem:[%s5915_s2 + $0x48] sm:$0xff]  ;;  %v4494_v22 = vmul.f32 %v4392_v43, %v296_v16  ;;  %v4497_v23 = vmul.f32 %v4392_v43, %v297_v17  ;;  %v4500_v24 = vmul.f32 %v4392_v43, %v298_v18  ;;  %v299_v25 = vld [vmem:[%s4390_s8 + $0x98] sm:$0xff] }
  0x2a   : > { %v385_v21 = vld [vmem:[%s5915_s2 + $0x140] sm:$0xff]  ;;  %v386_v28 = vld [vmem:[%s5915_s2 + $0x148] sm:$0xff]  ;;  %v4513_v29 = vmul.f32 %v4392_v43, %v299_v25  ;;  %v1214_v32 = vld [vmem:[%s4458_s14 + $0x10] sm:$0xff]  ;;  %v3714_v46 = vpack.c.bf16 %v354_v20, %v353_v19 }
  0x2b   : > { %v300_v26 = vld [vmem:[%s4390_s8 + $0xa0] sm:$0xff]  ;;  %v301_v31 = vld [vmem:[%s4390_s8 + $0xa8] sm:$0xff]  ;;  %v371_v33 = vld [vmem:[%s5915_s2 + $0xd0] sm:$0xff]  ;;  %1257 = vperm.xlu1 %3842, %v1214_v32   ;;  %v3762_v47 = vpack.c.bf16 %v386_v28, %v385_v21 }
  0x2c   : > { %v1212_v27 = vld [vmem:[%s4458_s14] sm:$0xff]  ;;  %v4516_v30 = vmul.f32 %v4392_v43, %v300_v26  ;;  %v4528_v34 = vmul.f32 %v4392_v43, %v301_v31  ;;  %v302_v35 = vld [vmem:[%s4390_s8 + $0xb0] sm:$0xff]  ;;  %v303_v36 = vld [vmem:[%s4390_s8 + $0xb8] sm:$0xff] }
  0x2d   : > { %3704 = vmatpush3.bf16.xpose.msk.msra.mxu0 %vm4282_vm1, %v3702_v39  ;;  %v372_v37 = vld [vmem:[%s5915_s2 + $0xd8] sm:$0xff]  ;;  %v403_v38 = vld [vmem:[%s5915_s2 + $0x1d0] sm:$0xff]  ;;  %1247 = vperm.xlu0 %3841, %v1212_v27   ;;  %v304_v45 = vld [vmem:[%s4390_s8 + $0xc0] sm:$0xff] }
  0x2e   : > { %3752 = vmatpush3.bf16.xpose.msk.msra.mxu1 %vm4282_vm1, %v3750_v40  ;;  %3707 = vmatprep.subr.msk.bf16.mxu0 %vm4282_vm1, %v3705_v41  ;;  %v404_v39 = vld [vmem:[%s5915_s2 + $0x1d8] sm:$0xff]  ;;  %v4542_v40 = vmul.f32 %v4392_v43, %v302_v35  ;;  %v4545_v41 = vmul.f32 %v4392_v43, %v303_v36  ;;  %v4551_v48 = vmul.f32 %v4392_v43, %v304_v45  ;;  %v1217_v52 = vld [vmem:[%s4458_s14 + $0x28] sm:$0xff]  ;;  %v1216_v53 = vld [vmem:[%s4458_s14 + $0x20] sm:$0xff] }
  0x2f   : > { %3755 = vmatprep.subr.msk.bf16.mxu1 %vm4282_vm1, %v3753_v42  ;;  %v1213_v42 = vld [vmem:[%s4458_s14 + $0x8] sm:$0xff]  ;;  %v1215_v44 = vld [vmem:[%s4458_s14 + $0x18] sm:$0xff]  ;;  %v3717_v49 = vpack.c.bf16 %v372_v37, %v371_v33  ;;  %v3765_v50 = vpack.c.bf16 %v404_v39, %v403_v38  ;;  %v355_v55 = vld [vmem:[%s5915_s2 + $0x50] sm:$0xff] }
  0x30   : > { %1262 = vperm.xlu1 %3842, %v1215_v44   ;;  %v305_v54 = vld [vmem:[%s4390_s8 + $0xc8] sm:$0xff]  ;;  %v387_v59 = vld [vmem:[%s5915_s2 + $0x150] sm:$0xff]  ;;  %v388_v60 = vld [vmem:[%s5915_s2 + $0x158] sm:$0xff] }
  0x31   : > { %1252 = vperm.xlu0 %3841, %v1213_v42   ;;  %v373_v61 = vld [vmem:[%s5915_s2 + $0xe0] sm:$0xff]  ;;  %v406_v3 = vld [vmem:[%s5915_s2 + $0x1e8] sm:$0xff]  ;;  %v1219_v5 = vld [vmem:[%s4458_s14 + $0x38] sm:$0xff]  ;;  %v3768_v12 = vpack.c.bf16 %v388_v60, %v387_v59 }
  0x32   : > { %v405_v2 = vld [vmem:[%s5915_s2 + $0x1e0] sm:$0xff]  ;;  %v306_v10 = vld [vmem:[%s4390_s8 + $0xd0] sm:$0xff]  ;;  %v1221_v19 = vld [vmem:[%s4458_s14 + $0x48] sm:$0xff] }
  0x33   : > { %v4595_v16 = vmul.f32 %v4392_v43, %v306_v10  ;;  %v3771_v18 = vpack.c.bf16 %v406_v3, %v405_v2  ;;  %v1220_v20 = vld [vmem:[%s4458_s14 + $0x40] sm:$0xff]  ;;  %v307_v21 = vld [vmem:[%s4390_s8 + $0xd8] sm:$0xff]  ;;  %v358_v26 = vld [vmem:[%s5915_s2 + $0x68] sm:$0xff] }
  0x34   : > { %1272 = vperm.xlu1 %3842, %v1217_v52   ;;  %v357_v25 = vld [vmem:[%s5915_s2 + $0x60] sm:$0xff]  ;;  %v4611_v27 = vmul.f32 %v4392_v43, %v307_v21  ;;  %v390_v31 = vld [vmem:[%s5915_s2 + $0x168] sm:$0xff]  ;;  %v375_v32 = vld [vmem:[%s5915_s2 + $0xf0] sm:$0xff] }
  0x35   : > { %3710 = vmatpush3.bf16.xpose.msk.msra.mxu0 %vm4282_vm1, %v3708_v56  ;;  %v356_v56 = vld [vmem:[%s5915_s2 + $0x58] sm:$0xff]  ;;  %1267 = vperm.xlu0 %3841, %v1216_v53   ;;  %v389_v28 = vld [vmem:[%s5915_s2 + $0x160] sm:$0xff]  ;;  %v407_v35 = vld [vmem:[%s5915_s2 + $0x1f0] sm:$0xff]  ;;  %v3726_v42 = vpack.c.bf16 %v358_v26, %v357_v25 }
  0x36   : > { %3758 = vmatpush3.bf16.xpose.msk.msra.mxu1 %vm4282_vm1, %v3756_v57  ;;  %3713 = vmatprep.subr.msk.bf16.mxu0 %vm4282_vm1, %v3711_v62  ;;  %v4567_v57 = vmul.f32 %v4392_v43, %v305_v54  ;;  %v374_v62 = vld [vmem:[%s5915_s2 + $0xe8] sm:$0xff]  ;;  %v3720_v11 = vpack.c.bf16 %v356_v56, %v355_v55  ;;  %v376_v33 = vld [vmem:[%s5915_s2 + $0xf8] sm:$0xff]  ;;  %v1222_v38 = vld [vmem:[%s4458_s14 + $0x50] sm:$0xff]  ;;  %v3774_v44 = vpack.c.bf16 %v390_v31, %v389_v28 }
  0x37   : > { %3761 = vmatprep.subr.msk.bf16.mxu1 %vm4282_vm1, %v3759_v6  ;;  %v1218_v6 = vld [vmem:[%s4458_s14 + $0x30] sm:$0xff]  ;;  %v3723_v17 = vpack.c.bf16 %v374_v62, %v373_v61  ;;  %v408_v36 = vld [vmem:[%s5915_s2 + $0x1f8] sm:$0xff]  ;;  %v308_v39 = vld [vmem:[%s4390_s8 + $0xe0] sm:$0xff] }
  0x38   : > { %1282 = vperm.xlu1 %3842, %v1219_v5   ;;  %v1223_v37 = vld [vmem:[%s4458_s14 + $0x58] sm:$0xff]  ;;  %v4639_v45 = vmul.f32 %v4392_v43, %v308_v39  ;;  %v309_v52 = vld [vmem:[%s4390_s8 + $0xe8] sm:$0xff]  ;;  %v359_v53 = vld [vmem:[%s5915_s2 + $0x70] sm:$0xff] }
  0x39   : > { %1277 = vperm.xlu0 %3841, %v1218_v6   ;;  %v4652_v54 = vmul.f32 %v4392_v43, %v309_v52  ;;  %v360_v55 = vld [vmem:[%s5915_s2 + $0x78] sm:$0xff]  ;;  %v391_v56 = vld [vmem:[%s5915_s2 + $0x170] sm:$0xff]  ;;  %v1229_v6 = vld [vmem:[%s4458_s14 + $0x88] sm:$0xff] }
  0x3a   : > { %v392_v59 = vld [vmem:[%s5915_s2 + $0x178] sm:$0xff]  ;;  %v1226_v61 = vld [vmem:[%s4458_s14 + $0x70] sm:$0xff]  ;;  %v3732_v2 = vpack.c.bf16 %v360_v55, %v359_v53  ;;  %v1228_v10 = vld [vmem:[%s4458_s14 + $0x80] sm:$0xff] }
  0x3b   : > { %v1227_v60 = vld [vmem:[%s4458_s14 + $0x78] sm:$0xff]  ;;  %v310_v62 = vld [vmem:[%s4390_s8 + $0xf0] sm:$0xff]  ;;  %v3780_v3 = vpack.c.bf16 %v392_v59, %v391_v56  ;;  %v1233_v4 = vld [vmem:[%s4458_s14 + $0xa8] sm:$0xff] }
  0x3c   : > { %1292 = vperm.xlu1 %3842, %v1221_v19   ;;  %v4671_v5 = vmul.f32 %v4392_v43, %v310_v62  ;;  %v1230_v19 = vld [vmem:[%s4458_s14 + $0x90] sm:$0xff]  ;;  %v1232_v25 = vld [vmem:[%s4458_s14 + $0xa0] sm:$0xff]  ;;  %v283_v28 = vld [vmem:[%s4390_s8 + $0x18] sm:$0xff] }
  0x3d   : > { %3716 = vmatpush3.bf16.xpose.msk.msra.mxu0 %vm4282_vm1, %v3714_v46  ;;  %1287 = vperm.xlu0 %3841, %v1220_v20   ;;  %v3729_v46 = vpack.c.bf16 %v376_v33, %v375_v32  ;;  %v282_v21 = vld [vmem:[%s4390_s8 + $0x10] sm:$0xff]  ;;  %v316_v32 = vmul.f32 %v4392_v43, %v283_v28  ;;  %v284_v33 = vld [vmem:[%s4390_s8 + $0x20] sm:$0xff]  ;;  %v1239_v39 = vld [vmem:[%s4458_s14 + $0xd8] sm:$0xff] }
  0x3e   : > { %3764 = vmatpush3.bf16.xpose.msk.msra.mxu1 %vm4282_vm1, %v3762_v47  ;;  %3719 = vmatprep.subr.msk.bf16.mxu0 %vm4282_vm1, %v3717_v49  ;;  %v3777_v47 = vpack.c.bf16 %v408_v36, %v407_v35  ;;  %v1225_v49 = vld [vmem:[%s4458_s14 + $0x68] sm:$0xff]  ;;  %v315_v26 = vmul.f32 %v4392_v43, %v282_v21  ;;  %v1234_v31 = vld [vmem:[%s4458_s14 + $0xb0] sm:$0xff]  ;;  %v1236_v36 = vld [vmem:[%s4458_s14 + $0xc0] sm:$0xff] }
  0x3f   : > { %3767 = vmatprep.subr.msk.bf16.mxu1 %vm4282_vm1, %v3765_v50  ;;  %v1224_v50 = vld [vmem:[%s4458_s14 + $0x60] sm:$0xff]  ;;  %v1237_v35 = vld [vmem:[%s4458_s14 + $0xc8] sm:$0xff] }
  0x40   : > { %1302 = vperm.xlu1 %3842, %v1223_v37   ;;  %v317_v37 = vmul.f32 %v4392_v43, %v284_v33 }
  0x41   : > { %1297 = vperm.xlu0 %3841, %v1222_v38   ;;  %v285_v38 = vld [vmem:[%s4390_s8 + $0x28] sm:$0xff] }
  0x44   : > { %1312 = vperm.xlu1 %3842, %v1225_v49   ;;  %v1243_v49 = vld [vmem:[%s4458_s14 + $0xf8] sm:$0xff] }
  0x45   : > { %3722 = vmatpush3.bf16.xpose.msk.msra.mxu0 %vm4282_vm1, %v3720_v11  ;;  %1307 = vperm.xlu0 %3841, %v1224_v50   ;;  %v311_v11 = vld [vmem:[%s4390_s8 + $0xf8] sm:$0xff] }
  0x46   : > { %3770 = vmatpush3.bf16.xpose.msk.msra.mxu1 %vm4282_vm1, %v3768_v12  ;;  %3725 = vmatprep.subr.msk.bf16.mxu0 %vm4282_vm1, %v3723_v17  ;;  %v4681_v12 = vmul.f32 %v4392_v43, %v311_v11  ;;  %v281_v17 = vld [vmem:[%s4390_s8 + $0x8] sm:$0xff] }
  0x47   : > { %3773 = vmatprep.subr.msk.bf16.mxu1 %vm4282_vm1, %v3771_v18  ;;  %v1231_v18 = vld [vmem:[%s4458_s14 + $0x98] sm:$0xff]  ;;  %v314_v20 = vmul.f32 %v4392_v43, %v281_v17 }
  0x48   : > { %1322 = vperm.xlu1 %3842, %v1227_v60  }
  0x49   : > { %1317 = vperm.xlu0 %3841, %v1226_v61  }
  0x4c   : > { %1332 = vperm.xlu1 %3842, %v1229_v6  }
  0x4d   : > { %3728 = vmatpush3.bf16.xpose.msk.msra.mxu0 %vm4282_vm1, %v3726_v42  ;;  %1327 = vperm.xlu0 %3841, %v1228_v10   ;;  %v1238_v42 = vld [vmem:[%s4458_s14 + $0xd0] sm:$0xff] }
  0x4e   : > { %3776 = vmatpush3.bf16.xpose.msk.msra.mxu1 %vm4282_vm1, %v3774_v44  ;;  %3731 = vmatprep.subr.msk.bf16.mxu0 %vm4282_vm1, %v3729_v46  ;;  %v318_v44 = vmul.f32 %v4392_v43, %v285_v38  ;;  %v1241_v46 = vld [vmem:[%s4458_s14 + $0xe8] sm:$0xff]  ;;  %v1242_v43 = vld [vmem:[%s4458_s14 + $0xf0] sm:$0xff] }
  0x4f   : > { %3779 = vmatprep.subr.msk.bf16.mxu1 %vm4282_vm1, %v3777_v47  ;;  %v1240_v47 = vld [vmem:[%s4458_s14 + $0xe0] sm:$0xff] }
  0x50   : > { %1342 = vperm.xlu1 %3842, %v1231_v18  }
  0x51   : > { %1337 = vperm.xlu0 %3841, %v1230_v19  }
  0x54   : > { %1352 = vperm.xlu1 %3842, %v1233_v4  }
  0x55   : > { %3734 = vmatpush3.bf16.xpose.msk.msra.mxu0 %vm4282_vm1, %v3732_v2  ;;  %1347 = vperm.xlu0 %3841, %v1232_v25  }
  0x56   : > { %3782 = vmatpush3.bf16.xpose.msk.msra.mxu1 %vm4282_vm1, %v3780_v3 }
  0x59   : > { %1357 = vperm.xlu0 %3841, %v1234_v31  }
  0x5c   : > { %3528 = vmatmul.mubr.msk.f32.vlgmr.msra.gmra.mrb[0].mxu0 %vm409_vm0, %v4422_v51 }
  0x5d   : > { %3624 = vmatmul.mubr.msk.f32.vlgmr.msra.gmra.mrb[0].mxu1 %vm409_vm0, %v4422_v51  ;;  %3529 = vmatprep.mubr.msk.f32.mxu0 %vm409_vm0, %v314_v20  ;;  %v1235_v51 = vld [vmem:[%s4458_s14 + $0xb8] sm:$0xff] }
  0x5e   : > { %3625 = vmatprep.mubr.msk.f32.mxu1 %vm409_vm0, %v314_v20  ;;  %1362 = vperm.xlu1 %3842, %v1235_v51  }
  0x5f   : > { %1367 = vperm.xlu0 %3841, %v1236_v36  }
  0x60   : > { %3530 = vmatmul.mubr.msk.f32.gmra.mrb[2].mxu0 %vm409_vm0, %v314_v20 }
  0x61   : > { %3626 = vmatmul.mubr.msk.f32.gmra.mrb[2].mxu1 %vm409_vm0, %v314_v20  ;;  %3531 = vmatprep.mubr.msk.f32.mxu0 %vm409_vm0, %v315_v26 }
  0x62   : > { %3627 = vmatprep.mubr.msk.f32.mxu1 %vm409_vm0, %v315_v26  ;;  %1372 = vperm.xlu1 %3842, %v1237_v35  }
  0x63   : > { %1377 = vperm.xlu0 %3841, %v1238_v42  }
  0x64   : > { %3532 = vmatmul.mubr.msk.f32.gmra.mrb[4].mxu0 %vm409_vm0, %v315_v26 }
  0x65   : > { %3628 = vmatmul.mubr.msk.f32.gmra.mrb[4].mxu1 %vm409_vm0, %v315_v26  ;;  %3533 = vmatprep.mubr.msk.f32.mxu0 %vm409_vm0, %v316_v32 }
  0x66   : > { %3629 = vmatprep.mubr.msk.f32.mxu1 %vm409_vm0, %v316_v32  ;;  %1382 = vperm.xlu1 %3842, %v1239_v39  }
  0x67   : > { %1387 = vperm.xlu0 %3841, %v1240_v47  }
  0x68   : > { %3534 = vmatmul.mubr.msk.f32.gmra.mrb[6].mxu0 %vm409_vm0, %v316_v32 }
  0x69   : > { %3630 = vmatmul.mubr.msk.f32.gmra.mrb[6].mxu1 %vm409_vm0, %v316_v32  ;;  %3535 = vmatprep.mubr.msk.f32.mxu0 %vm409_vm0, %v317_v37 }
  0x6a   : > { %3631 = vmatprep.mubr.msk.f32.mxu1 %vm409_vm0, %v317_v37  ;;  %1392 = vperm.xlu1 %3842, %v1241_v46  }
  0x6b   : > { %1397 = vperm.xlu0 %3841, %v1242_v43  }
  0x6c   : > { %3536 = vmatmul.mubr.msk.f32.gmra.mrb[8].mxu0 %vm409_vm0, %v317_v37 }
  0x6d   : > { %3632 = vmatmul.mubr.msk.f32.gmra.mrb[8].mxu1 %vm409_vm0, %v317_v37  ;;  %3537 = vmatprep.mubr.msk.f32.mxu0 %vm409_vm0, %v318_v44 }
  0x6e   : > { %3633 = vmatprep.mubr.msk.f32.mxu1 %vm409_vm0, %v318_v44  ;;  %1402 = vperm.xlu1 %3842, %v1243_v49  }
  0x70   : > { %3538 = vmatmul.mubr.msk.f32.gmra.mrb[10].mxu0 %vm409_vm0, %v318_v44 }
  0x71   : > { %3634 = vmatmul.mubr.msk.f32.gmra.mrb[10].mxu1 %vm409_vm0, %v318_v44  ;;  %3539 = vmatprep.mubr.msk.f32.mxu0 %vm409_vm0, %v4436_v58 }
  0x72   : > { %3635 = vmatprep.mubr.msk.f32.mxu1 %vm409_vm0, %v4436_v58 }
  0x74   : > { %3540 = vmatmul.mubr.msk.f32.gmra.mrb[12].mxu0 %vm409_vm0, %v4436_v58 }
  0x75   : > { %3636 = vmatmul.mubr.msk.f32.gmra.mrb[12].mxu1 %vm409_vm0, %v4436_v58  ;;  %3541 = vmatprep.mubr.msk.f32.mxu0 %vm409_vm0, %v4442_v63 }
  0x76   : > { %3637 = vmatprep.mubr.msk.f32.mxu1 %vm409_vm0, %v4442_v63 }
  0x78   : > { %3542 = vmatmul.mubr.msk.f32.gmra.mrb[14].mxu0 %vm409_vm0, %v4442_v63 }
  0x79   : > { %3638 = vmatmul.mubr.msk.f32.gmra.mrb[14].mxu1 %vm409_vm0, %v4442_v63  ;;  %3543 = vmatprep.mubr.msk.f32.mxu0 %vm409_vm0, %v4445_v0 }
  0x7a   : > { %3639 = vmatprep.mubr.msk.f32.mxu1 %vm409_vm0, %v4445_v0 }
  0x7c   : > { %3544 = vmatmul.mubr.msk.f32.gmra.mrb[16].mxu0 %vm409_vm0, %v4445_v0 }
  0x7d   : > { %3640 = vmatmul.mubr.msk.f32.gmra.mrb[16].mxu1 %vm409_vm0, %v4445_v0  ;;  %3545 = vmatprep.mubr.msk.f32.mxu0 %vm409_vm0, %v4448_v1  ;;  %v1406_v0 = vlaneseq }
  0x7e   : > { %3641 = vmatprep.mubr.msk.f32.mxu1 %vm409_vm0, %v4448_v1 }
  0x80   : > { %3546 = vmatmul.mubr.msk.f32.gmra.mrb[18].mxu0 %vm409_vm0, %v4448_v1 }
  0x81   : > { %3642 = vmatmul.mubr.msk.f32.gmra.mrb[18].mxu1 %vm409_vm0, %v4448_v1  ;;  %3547 = vmatprep.mubr.msk.f32.mxu0 %vm409_vm0, %v4461_v7 }
  0x82   : > { %3643 = vmatprep.mubr.msk.f32.mxu1 %vm409_vm0, %v4461_v7 }
  0x84   : > { %3548 = vmatmul.mubr.msk.f32.gmra.mrb[20].mxu0 %vm409_vm0, %v4461_v7 }
  0x85   : > { %3644 = vmatmul.mubr.msk.f32.gmra.mrb[20].mxu1 %vm409_vm0, %v4461_v7  ;;  %3549 = vmatprep.mubr.msk.f32.mxu0 %vm409_vm0, %v4464_v8 }
  0x86   : > { %3645 = vmatprep.mubr.msk.f32.mxu1 %vm409_vm0, %v4464_v8 }
  0x88   : > { %3550 = vmatmul.mubr.msk.f32.gmra.mrb[22].mxu0 %vm409_vm0, %v4464_v8 }
  0x89   : > { %3646 = vmatmul.mubr.msk.f32.gmra.mrb[22].mxu1 %vm409_vm0, %v4464_v8  ;;  %3551 = vmatprep.mubr.msk.f32.mxu0 %vm409_vm0, %v4467_v9  ;;  %v1407_v8 = vshrl.u32 %v1406_v0, 7 }
  0x8a   : > { %3647 = vmatprep.mubr.msk.f32.mxu1 %vm409_vm0, %v4467_v9 }
  0x8c   : > { %3552 = vmatmul.mubr.msk.f32.gmra.mrb[24].mxu0 %vm409_vm0, %v4467_v9 }
  0x8d   : > { %3648 = vmatmul.mubr.msk.f32.gmra.mrb[24].mxu1 %vm409_vm0, %v4467_v9  ;;  %3553 = vmatprep.mubr.msk.f32.mxu0 %vm409_vm0, %v4473_v13 }
  0x8e   : > { %3649 = vmatprep.mubr.msk.f32.mxu1 %vm409_vm0, %v4473_v13 }
  0x90   : > { %3554 = vmatmul.mubr.msk.f32.gmra.mrb[26].mxu0 %vm409_vm0, %v4473_v13 }
  0x91   : > { %3650 = vmatmul.mubr.msk.f32.gmra.mrb[26].mxu1 %vm409_vm0, %v4473_v13  ;;  %3555 = vmatprep.mubr.msk.f32.mxu0 %vm409_vm0, %v4476_v14  ;;  %v1408_v13 = vsub.s32 0, %v1407_v8 }
  0x92   : > { %3651 = vmatprep.mubr.msk.f32.mxu1 %vm409_vm0, %v4476_v14 }
  0x94   : > { %3556 = vmatmul.mubr.msk.f32.gmra.mrb[28].mxu0 %vm409_vm0, %v4476_v14 }
  0x95   : > { %3652 = vmatmul.mubr.msk.f32.gmra.mrb[28].mxu1 %vm409_vm0, %v4476_v14  ;;  %3557 = vmatprep.mubr.msk.f32.mxu0 %vm409_vm0, %v4479_v15  ;;  %v1416_v14 = vsub.s32 2, %v1407_v8 }
  0x96   : > { %3653 = vmatprep.mubr.msk.f32.mxu1 %vm409_vm0, %v4479_v15 }
  0x98   : > { %3558 = vmatmul.mubr.msk.f32.gmra.mrb[30].mxu0 %vm409_vm0, %v4479_v15 }
  0x99   : > { %3654 = vmatmul.mubr.msk.f32.gmra.mrb[30].mxu1 %vm409_vm0, %v4479_v15  ;;  %3559 = vmatprep.mubr.msk.f32.mxu0 %vm409_vm0, %v4494_v22  ;;  %v1412_v15 = vsub.s32 1, %v1407_v8 }
  0x9a   : > { %3655 = vmatprep.mubr.msk.f32.mxu1 %vm409_vm0, %v4494_v22 }
  0x9c   : > { %3560 = vmatmul.mubr.msk.f32.gmra.mrb[32].mxu0 %vm409_vm0, %v4494_v22 }
  0x9d   : > { %3656 = vmatmul.mubr.msk.f32.gmra.mrb[32].mxu1 %vm409_vm0, %v4494_v22  ;;  %3561 = vmatprep.mubr.msk.f32.mxu0 %vm409_vm0, %v4497_v23  ;;  %v1244_v22 = vld [vmem:[%s5917_s4] sm:$0xf] }
  0x9e   : > { %3657 = vmatprep.mubr.msk.f32.mxu1 %vm409_vm0, %v4497_v23 }
  0xa0   : > { %3562 = vmatmul.mubr.msk.f32.gmra.mrb[34].mxu0 %vm409_vm0, %v4497_v23 }
  0xa1   : > { %3658 = vmatmul.mubr.msk.f32.gmra.mrb[34].mxu1 %vm409_vm0, %v4497_v23  ;;  %3563 = vmatprep.mubr.msk.f32.mxu0 %vm409_vm0, %v4500_v24  ;;  %v1420_v23 = vsub.s32 3, %v1407_v8 }
  0xa2   : > { %3659 = vmatprep.mubr.msk.f32.mxu1 %vm409_vm0, %v4500_v24 }
  0xa4   : > { %3564 = vmatmul.mubr.msk.f32.gmra.mrb[36].mxu0 %vm409_vm0, %v4500_v24 }
  0xa5   : > { %3660 = vmatmul.mubr.msk.f32.gmra.mrb[36].mxu1 %vm409_vm0, %v4500_v24  ;;  %3565 = vmatprep.mubr.msk.f32.mxu0 %vm409_vm0, %v4513_v29 }
  0xa6   : > { %3661 = vmatprep.mubr.msk.f32.mxu1 %vm409_vm0, %v4513_v29 }
  0xa8   : > { %3566 = vmatmul.mubr.msk.f32.gmra.mrb[38].mxu0 %vm409_vm0, %v4513_v29 }
  0xa9   : > { %3662 = vmatmul.mubr.msk.f32.gmra.mrb[38].mxu1 %vm409_vm0, %v4513_v29  ;;  %3567 = vmatprep.mubr.msk.f32.mxu0 %vm409_vm0, %v4516_v30  ;;  %v4942_v29 = vrot.slane %v1244_v22, %v1408_v13 }
  0xaa   : > { %3663 = vmatprep.mubr.msk.f32.mxu1 %vm409_vm0, %v4516_v30  ;;  %v1258_v63 = vpop.permute.xlu1 %1257 }
  0xab   : > { %5932 = vst [vmem:[#allocation7_spill] sm:$0xff] %v4942_v29  ;;  %v4967_v55 = vadd.f32 %v4942_v29, %v1258_v63 }
  0xac   : > { %3568 = vmatmul.mubr.msk.f32.gmra.mrb[40].mxu0 %vm409_vm0, %v4516_v30  ;;  %v1248_v58 = vpop.permute.xlu0 %1247 }
  0xad   : > { %3664 = vmatmul.mubr.msk.f32.gmra.mrb[40].mxu1 %vm409_vm0, %v4516_v30  ;;  %3569 = vmatprep.mubr.msk.f32.mxu0 %vm409_vm0, %v4528_v34  ;;  %v4944_v30 = vrot.slane %v1244_v22, %v1416_v14 }
  0xae   : > { %3665 = vmatprep.mubr.msk.f32.mxu1 %vm409_vm0, %v4528_v34 }
  0xaf   : > { %v1263_v7 = vpop.permute.xlu1 %1262  ;;  %5933 = vst [vmem:[#allocation8_spill] sm:$0xff] %v4944_v30  ;;  %v4970_v56 = vadd.f32 %v4944_v30, %v1258_v63 }
  0xb0   : > { %3570 = vmatmul.mubr.msk.f32.gmra.mrb[42].mxu0 %vm409_vm0, %v4528_v34  ;;  %v1253_v1 = vpop.permute.xlu0 %1252  ;;  %v4979_v62 = vadd.f32 %v4942_v29, %v1263_v7  ;;  %v4982_v2 = vadd.f32 %v4944_v30, %v1263_v7 }
  0xb1   : > { %3666 = vmatmul.mubr.msk.f32.gmra.mrb[42].mxu1 %vm409_vm0, %v4528_v34  ;;  %3571 = vmatprep.mubr.msk.f32.mxu0 %vm409_vm0, %v4542_v40  ;;  %v4946_v34 = vrot.slane %v1244_v22, %v1412_v15  ;;  %v4955_v50 = vadd.f32 %v4942_v29, %v1253_v1  ;;  %v4958_v52 = vadd.f32 %v4944_v30, %v1253_v1 }
  0xb2   : > { %3667 = vmatprep.mubr.msk.f32.mxu1 %vm409_vm0, %v4542_v40 }
  0xb3   : > { %v1273_v24 = vpop.permute.xlu1 %1272  ;;  %5934 = vst [vmem:[#allocation9_spill] sm:$0xff] %v4946_v34  ;;  %v4961_v53 = vadd.f32 %v4946_v34, %v1253_v1  ;;  %v4973_v59 = vadd.f32 %v4946_v34, %v1258_v63  ;;  %v4985_v3 = vadd.f32 %v4946_v34, %v1263_v7 }
  0xb4   : > { %3572 = vmatmul.mubr.msk.f32.gmra.mrb[44].mxu0 %vm409_vm0, %v4542_v40  ;;  %v1268_v9 = vpop.permute.xlu0 %1267  ;;  %v5003_v18 = vadd.f32 %v4942_v29, %v1273_v24  ;;  %v5006_v19 = vadd.f32 %v4944_v30, %v1273_v24  ;;  %v5009_v20 = vadd.f32 %v4946_v34, %v1273_v24 }
  0xb5   : > { %3668 = vmatmul.mubr.msk.f32.gmra.mrb[44].mxu1 %vm409_vm0, %v4542_v40  ;;  %3573 = vmatprep.mubr.msk.f32.mxu0 %vm409_vm0, %v4545_v41  ;;  %v4991_v6 = vadd.f32 %v4942_v29, %v1268_v9  ;;  %v4994_v10 = vadd.f32 %v4944_v30, %v1268_v9  ;;  %v4997_v11 = vadd.f32 %v4946_v34, %v1268_v9 }
  0xb6   : > { %3669 = vmatprep.mubr.msk.f32.mxu1 %vm409_vm0, %v4545_v41 }
  0xb8   : > { %3574 = vmatmul.mubr.msk.f32.gmra.mrb[46].mxu0 %vm409_vm0, %v4545_v41  ;;  %v1278_v40 = vpop.permute.xlu0 %1277 }
  0xb9   : > { %3670 = vmatmul.mubr.msk.f32.gmra.mrb[46].mxu1 %vm409_vm0, %v4545_v41  ;;  %3575 = vmatprep.mubr.msk.f32.mxu0 %vm409_vm0, %v4551_v48  ;;  %v4948_v41 = vrot.slane %v1244_v22, %v1420_v23  ;;  %v5015_v4 = vadd.f32 %v4942_v29, %v1278_v40  ;;  %v5018_v25 = vadd.f32 %v4944_v30, %v1278_v40 }
  0xba   : > { %3671 = vmatprep.mubr.msk.f32.mxu1 %vm409_vm0, %v4551_v48  ;;  %v5021_v26 = vadd.f32 %v4946_v34, %v1278_v40 }
  0xbb   : > { %5935 = vst [vmem:[#allocation10_spill] sm:$0xff] %v4948_v41  ;;  %v4976_v61 = vadd.f32 %v4948_v41, %v1258_v63  ;;  %v5012_v21 = vadd.f32 %v4948_v41, %v1273_v24  ;;  %v5024_v28 = vadd.f32 %v4948_v41, %v1278_v40 }
  0xbc   : > { %3576 = vmatmul.mubr.msk.f32.gmra.mrb[48].mxu0 %vm409_vm0, %v4551_v48  ;;  %v1288_v60 = vpop.permute.xlu0 %1287 }
  0xbd   : > { %3672 = vmatmul.mubr.msk.f32.gmra.mrb[48].mxu1 %vm409_vm0, %v4551_v48  ;;  %3577 = vmatprep.mubr.msk.f32.mxu0 %vm409_vm0, %v4567_v57  ;;  %v1283_v48 = vpop.permute.xlu1 %1282  ;;  %v5039_v36 = vadd.f32 %v4942_v29, %v1288_v60  ;;  %v5042_v37 = vadd.f32 %v4944_v30, %v1288_v60  ;;  %v5045_v38 = vadd.f32 %v4946_v34, %v1288_v60 }
  0xbe   : > { %3673 = vmatprep.mubr.msk.f32.mxu1 %vm409_vm0, %v4567_v57  ;;  %v5027_v51 = vadd.f32 %v4942_v29, %v1283_v48  ;;  %v5030_v31 = vadd.f32 %v4944_v30, %v1283_v48  ;;  %v5033_v32 = vadd.f32 %v4946_v34, %v1283_v48  ;;  %v5036_v35 = vadd.f32 %v4948_v41, %v1283_v48 }
  0xbf   : > { %5936 = vst [vmem:[#allocation11_spill] sm:$0xff] %v5045_v38  ;;  %v5048_v44 = vadd.f32 %v4948_v41, %v1288_v60 }
  0xc0   : > { %3578 = vmatmul.mubr.msk.f32.gmra.mrb[50].mxu0 %vm409_vm0, %v4567_v57  ;;  %v1298_v33 = vpop.permute.xlu0 %1297 }
  0xc1   : > { %3674 = vmatmul.mubr.msk.f32.gmra.mrb[50].mxu1 %vm409_vm0, %v4567_v57  ;;  %3579 = vmatprep.mubr.msk.f32.mxu0 %vm409_vm0, %v4595_v16  ;;  %v1426_v57 = vadd.f32 %v4942_v29, %v1248_v58  ;;  %v1293_v17 = vpop.permute.xlu1 %1292  ;;  %5937 = vst [vmem:[#allocation12_spill] sm:$0xff] %v5048_v44  ;;  %v5066_v14 = vadd.f32 %v4944_v30, %v1298_v33 }
  0xc2   : > { %3675 = vmatprep.mubr.msk.f32.mxu1 %vm409_vm0, %v4595_v16  ;;  %v5051_v46 = vadd.f32 %v4942_v29, %v1293_v17  ;;  %v5054_v47 = vadd.f32 %v4944_v30, %v1293_v17  ;;  %v5057_v49 = vadd.f32 %v4946_v34, %v1293_v17  ;;  %v5069_v15 = vadd.f32 %v4946_v34, %v1298_v33 }
  0xc3   : > { %5943 = vst [vmem:[#allocation18_spill] sm:$0xff] %v5066_v14  ;;  %v5072_v24 = vadd.f32 %v4948_v41, %v1298_v33 }
  0xc4   : > { %3580 = vmatmul.mubr.msk.f32.gmra.mrb[52].mxu0 %vm409_vm0, %v4595_v16  ;;  %5938 = vst [vmem:[#allocation13_spill] sm:$0xff] %v5051_v46  ;;  %5939 = vst [vmem:[#allocation14_spill] sm:$0xff] %v5054_v47 }
  0xc5   : > { %3676 = vmatmul.mubr.msk.f32.gmra.mrb[52].mxu1 %vm409_vm0, %v4595_v16  ;;  %3581 = vmatprep.mubr.msk.f32.mxu0 %vm409_vm0, %v4611_v27  ;;  %v1428_v16 = vadd.f32 %v4944_v30, %v1248_v58  ;;  %5940 = vst [vmem:[#allocation15_spill] sm:$0xff] %v5057_v49  ;;  %v1303_v13 = vpop.permute.xlu1 %1302  ;;  %5944 = vst [vmem:[#allocation19_spill] sm:$0xff] %v5069_v15 }
  0xc6   : > { %3677 = vmatprep.mubr.msk.f32.mxu1 %vm409_vm0, %v4611_v27  ;;  %5945 = vst [vmem:[#allocation20_spill] sm:$0xff] %v5072_v24  ;;  %v5075_v40 = vadd.f32 %v4942_v29, %v1303_v13  ;;  %v5081_v60 = vadd.f32 %v4946_v34, %v1303_v13  ;;  %v5087_v24 = vpop.permute.xlu0 %1307 }
  0xc7   : > { %5949 = vst [vmem:[#allocation24_spill] sm:$0xff] %v5087_v24 }
  0xc8   : > { %3582 = vmatmul.mubr.msk.f32.gmra.mrb[54].mxu0 %vm409_vm0, %v4611_v27  ;;  %5946 = vst [vmem:[#allocation21_spill] sm:$0xff] %v5075_v40  ;;  %5948 = vst [vmem:[#allocation23_spill] sm:$0xff] %v5081_v60 }
  0xc9   : > { %3678 = vmatmul.mubr.msk.f32.gmra.mrb[54].mxu1 %vm409_vm0, %v4611_v27  ;;  %3583 = vmatprep.mubr.msk.f32.mxu0 %vm409_vm0, %v4639_v45  ;;  %v1427_v27 = vadd.f32 %v4946_v34, %v1248_v58 }
  0xca   : > { %3679 = vmatprep.mubr.msk.f32.mxu1 %vm409_vm0, %v4639_v45 }
  0xcc   : > { %3584 = vmatmul.mubr.msk.f32.gmra.mrb[56].mxu0 %vm409_vm0, %v4639_v45 }
  0xcd   : > { %3680 = vmatmul.mubr.msk.f32.gmra.mrb[56].mxu1 %vm409_vm0, %v4639_v45  ;;  %3585 = vmatprep.mubr.msk.f32.mxu0 %vm409_vm0, %v4652_v54  ;;  %v1429_v45 = vadd.f32 %v4948_v41, %v1248_v58 }
  0xce   : > { %3681 = vmatprep.mubr.msk.f32.mxu1 %vm409_vm0, %v4652_v54 }
  0xd0   : > { %3586 = vmatmul.mubr.msk.f32.gmra.mrb[58].mxu0 %vm409_vm0, %v4652_v54 }
  0xd1   : > { %3682 = vmatmul.mubr.msk.f32.gmra.mrb[58].mxu1 %vm409_vm0, %v4652_v54  ;;  %3587 = vmatprep.mubr.msk.f32.mxu0 %vm409_vm0, %v4671_v5  ;;  %v4964_v54 = vadd.f32 %v4948_v41, %v1253_v1  ;;  %v5060_v1 = vadd.f32 %v4948_v41, %v1293_v17 }
  0xd2   : > { %3683 = vmatprep.mubr.msk.f32.mxu1 %vm409_vm0, %v4671_v5 }
  0xd3   : > { %5941 = vst [vmem:[#allocation16_spill] sm:$0xff] %v5060_v1 }
  0xd4   : > { %3588 = vmatmul.mubr.msk.f32.gmra.mrb[60].mxu0 %vm409_vm0, %v4671_v5 }
  0xd5   : > { %3684 = vmatmul.mubr.msk.f32.gmra.mrb[60].mxu1 %vm409_vm0, %v4671_v5  ;;  %3589 = vmatprep.mubr.msk.f32.mxu0 %vm409_vm0, %v4681_v12  ;;  %v4988_v5 = vadd.f32 %v4948_v41, %v1263_v7  ;;  %v5063_v7 = vadd.f32 %v4942_v29, %v1298_v33 }
  0xd6   : > { %3685 = vmatprep.mubr.msk.f32.mxu1 %vm409_vm0, %v4681_v12 }
  0xd7   : > { %5942 = vst [vmem:[#allocation17_spill] sm:$0xff] %v5063_v7 }
  0xd8   : > { %3590 = vmatmul.mubr.msk.f32.gmra.mrb[62].mxu0 %vm409_vm0, %v4681_v12 }
  0xd9   : > { %3686 = vmatmul.mubr.msk.f32.gmra.mrb[62].mxu1 %vm409_vm0, %v4681_v12  ;;  %v5000_v12 = vadd.f32 %v4948_v41, %v1268_v9 }
 0x12f   : > { %v764_v39 = vpop.f32.mrb[0].mxu0 }
 0x130   : > { %v1021_v42 = vpop.f32.mrb[0].mxu1  ;;  %v1554_v43 = vadd.f32 %v1426_v57, %v764_v39  ;;  %v766_v63 = vpop.f32.mrb[1].mxu0 }
 0x131   : > { %v1556_v58 = vadd.f32 %v1428_v16, %v1021_v42  ;;  %v1023_v0 = vpop.f32.mrb[1].mxu1  ;;  %v1555_v8 = vadd.f32 %v1427_v27, %v766_v63 }
 0x132   : > { %v1557_v9 = vadd.f32 %v1429_v45, %v1023_v0  ;;  %v1682_v22 = vmin.f32 %v1554_v43, 0.0  ;;  %v5078_v45 = vadd.f32 %v4944_v30, %v1303_v13 }
 0x133   : > { %v1684_v23 = vmin.f32 %v1556_v58, 0.0  ;;  %v1683_v48 = vmin.f32 %v1555_v8, 0.0  ;;  %v770_v16 = vpop.f32.mrb[2].mxu0 }
 0x134   : > { %v1685_v57 = vmin.f32 %v1557_v9, 0.0  ;;  %v1027_v27 = vpop.f32.mrb[2].mxu1  ;;  %5947 = vst [vmem:[#allocation22_spill] sm:$0xff] %v5078_v45  ;;  %v1810_v17 = vmul.f32 1.442695, %v1682_v22  ;;  %v1558_v42 = vadd.f32 %v4955_v50, %v770_v16  ;;  %v772_v43 = vpop.f32.mrb[3].mxu0  ;;  %v5090_v22 = vadd.f32 %v4948_v41, %v1303_v13 }
 0x135   : > { %v1814_v39 = vmul.f32 1.442695, %v1684_v23  ;;  %v1560_v33 = vadd.f32 %v4958_v52, %v1027_v27  ;;  %v1029_v58 = vpop.f32.mrb[3].mxu1  ;;  %v1812_v63 = vmul.f32 1.442695, %v1683_v48  ;;  %v1559_v8 = vadd.f32 %v4961_v53, %v772_v43 }
 0x136   : > { %v1816_v0 = vmul.f32 1.442695, %v1685_v57  ;;  %v1561_v9 = vadd.f32 %v4964_v54, %v1029_v58  ;;  %3843 = vpow2.f32 %v1810_v17  ;;  %v1686_v40 = vmin.f32 %v1558_v42, 0.0  ;;  %5950 = vst [vmem:[#allocation25_spill] sm:$0xff] %v5090_v22 }
 0x137   : > { %v1688_v45 = vmin.f32 %v1560_v33, 0.0  ;;  %3845 = vpow2.f32 %v1814_v39  ;;  %v1687_v50 = vmin.f32 %v1559_v8, 0.0  ;;  %v776_v52 = vpop.f32.mrb[4].mxu0  ;;  %v5094_v48 = vadd.f32 %v4942_v29, %v5087_v24 }
 0x138   : > { %v1689_v23 = vmin.f32 %v1561_v9, 0.0  ;;  %v1033_v16 = vpop.f32.mrb[4].mxu1  ;;  %3847 = vpow2.f32 %v1812_v63  ;;  %v1818_v53 = vmul.f32 1.442695, %v1686_v40  ;;  %v1562_v57 = vadd.f32 %v4967_v55, %v776_v52  ;;  %v778_v27 = vpop.f32.mrb[5].mxu0 }
 0x139   : > { %5951 = vst [vmem:[#allocation26_spill] sm:$0xff] %v5094_v48  ;;  %v1822_v54 = vmul.f32 1.442695, %v1688_v45  ;;  %v1035_v17 = vpop.f32.mrb[5].mxu1  ;;  %3849 = vpow2.f32 %v1816_v0  ;;  %v1820_v42 = vmul.f32 1.442695, %v1687_v50  ;;  %v1564_v39 = vadd.f32 %v4970_v56, %v1033_v16 }
 0x13a   : > { %v1824_v13 = vmul.f32 1.442695, %v1689_v23  ;;  %3851 = vpow2.f32 %v1818_v53  ;;  %v1690_v33 = vmin.f32 %v1562_v57, 0.0  ;;  %v1563_v43 = vadd.f32 %v4973_v59, %v778_v27 }
 0x13b   : > { %v1565_v58 = vadd.f32 %v4976_v61, %v1035_v17  ;;  %3853 = vpow2.f32 %v1822_v54  ;;  %v1692_v8 = vmin.f32 %v1564_v39, 0.0  ;;  %v782_v63 = vpop.f32.mrb[6].mxu0  ;;  %v5102_v55 = vadd.f32 %v4944_v30, %v5087_v24 }
 0x13c   : > { %v1039_v40 = vpop.f32.mrb[6].mxu1  ;;  %v5106_v45 = vadd.f32 %v4946_v34, %v5087_v24  ;;  %3855 = vpow2.f32 %v1820_v42  ;;  %v1826_v56 = vmul.f32 1.442695, %v1690_v33  ;;  %v1691_v0 = vmin.f32 %v1563_v43, 0.0  ;;  %v784_v50 = vpop.f32.mrb[7].mxu0 }
 0x13d   : > { %5952 = vst [vmem:[#allocation27_spill] sm:$0xff] %v5102_v55  ;;  %v1693_v9 = vmin.f32 %v1565_v58, 0.0  ;;  %v1041_v59 = vpop.f32.mrb[7].mxu1  ;;  %3857 = vpow2.f32 %v1824_v13  ;;  %v1830_v61 = vmul.f32 1.442695, %v1692_v8  ;;  %v1566_v23 = vadd.f32 %v4979_v62, %v782_v63 }
 0x13e   : > { %5953 = vst [vmem:[#allocation28_spill] sm:$0xff] %v5106_v45  ;;  %v1568_v52 = vadd.f32 %v4982_v2, %v1039_v40  ;;  %3859 = vpow2.f32 %v1826_v56  ;;  %v1828_v16 = vmul.f32 1.442695, %v1691_v0  ;;  %v1567_v54 = vadd.f32 %v4985_v3, %v784_v50 }
 0x13f   : > { %v1832_v53 = vmul.f32 1.442695, %v1693_v9  ;;  %3861 = vpow2.f32 %v1830_v61  ;;  %v1694_v57 = vmin.f32 %v1566_v23, 0.0  ;;  %v5112_v17 = vadd.f32 %v4988_v5, %v1041_v59  ;;  %v788_v42 = vpop.f32.mrb[8].mxu0 }
 0x140   : > { %v1696_v27 = vmin.f32 %v1568_v52, 0.0  ;;  %v1045_v39 = vpop.f32.mrb[8].mxu1  ;;  %v3844_v13 = vpop.eup %3843  ;;  %3863 = vpow2.f32 %v1828_v16  ;;  %v1695_v33 = vmin.f32 %v1567_v54, 0.0  ;;  %v5115_v62 = vadd.f32 %v4991_v6, %v788_v42 }
 0x141   : > { %v5118_v2 = vadd.f32 %v4994_v10, %v1045_v39  ;;  %v5120_v43 = vpop.f32.mrb[9].mxu0  ;;  %v5122_v3 = vpop.f32.mrb[9].mxu1  ;;  %v2066_v8 = vmul.f32 %v3844_v13, %v3844_v13  ;;  %3865 = vpow2.f32 %v1832_v53  ;;  %v1834_v5 = vmul.f32 1.442695, %v1694_v57 }
 0x142   : > { %v3846_v58 = vpop.eup %3845  ;;  %v1838_v63 = vmul.f32 1.442695, %v1696_v27  ;;  %v5125_v0 = vmul.f32 1.442695, %v1695_v33 }
 0x143   : > { %v3848_v40 = vpop.eup %3847  ;;  %v2068_v56 = vmul.f32 %v3846_v58, %v3846_v58  ;;  %v2194_v50 = vadd.f32 %v3844_v13, %v2066_v8  ;;  %v2322_v59 = vmul.f32 %v2066_v8, %v2066_v8  ;;  %3867 = vpow2.f32 %v1834_v5  ;;  %v5129_v23 = vpop.f32.mrb[10].mxu0 }
 0x144   : > { %v3850_v10 = vpop.eup %3849  ;;  %v2067_v61 = vmul.f32 %v3848_v40, %v3848_v40  ;;  %v5131_v52 = vpop.f32.mrb[10].mxu1  ;;  %3869 = vpow2.f32 %v1838_v63 }
 0x145   : > { %v3852_v16 = vpop.eup %3851  ;;  %v2196_v53 = vadd.f32 %v3846_v58, %v2068_v56  ;;  %v2324_v54 = vmul.f32 %v2068_v56, %v2068_v56  ;;  %v2069_v57 = vmul.f32 %v3850_v10, %v3850_v10  ;;  %v5133_v27 = vpop.f32.mrb[11].mxu0  ;;  %v2450_v13 = vadd.f32 %v2322_v59, %v2194_v50 }
 0x146   : > { %v5135_v42 = vpop.f32.mrb[11].mxu1  ;;  %v3854_v39 = vpop.eup %3853  ;;  %v2578_v33 = vmul.f32 %v2322_v59, %v2322_v59  ;;  %v2195_v8 = vadd.f32 %v3848_v40, %v2067_v61  ;;  %v2323_v5 = vmul.f32 %v2067_v61, %v2067_v61  ;;  %3871 = vpow2.f32 %v5125_v0 }
 0x147   : > { %v3856_v9 = vpop.eup %3855  ;;  %v2452_v6 = vadd.f32 %v2324_v54, %v2196_v53  ;;  %v2580_v34 = vmul.f32 %v2324_v54, %v2324_v54  ;;  %v2197_v30 = vadd.f32 %v3850_v10, %v2069_v57  ;;  %v2325_v58 = vmul.f32 %v2069_v57, %v2069_v57  ;;  %v5141_v45 = vpop.f32.mrb[12].mxu0 }
 0x148   : > { %v3858_v56 = vpop.eup %3857  ;;  %v2706_v29 = vadd.f32 %v2578_v33, %v2450_v13  ;;  %v2834_v63 = vmul.f32 %v2578_v33, %v2578_v33  ;;  %v2451_v41 = vadd.f32 %v2323_v5, %v2195_v8  ;;  %v2579_v24 = vmul.f32 %v2323_v5, %v2323_v5  ;;  %v5143_v55 = vpop.f32.mrb[12].mxu1 }
 0x149   : > { %v5145_v48 = vpop.eup %3859  ;;  %v2708_v50 = vadd.f32 %v2580_v34, %v2452_v6  ;;  %v2836_v59 = vmul.f32 %v2580_v34, %v2580_v34  ;;  %v2453_v40 = vadd.f32 %v2325_v58, %v2197_v30  ;;  %v2581_v61 = vmul.f32 %v2325_v58, %v2325_v58  ;;  %v5147_v53 = vpop.f32.mrb[13].mxu0 }
 0x14a   : > { %v5149_v10 = vpop.f32.mrb[13].mxu1  ;;  %v5151_v54 = vpop.eup %3861  ;;  %v2962_v57 = vadd.f32 %v2834_v63, %v2706_v29  ;;  %v2707_v13 = vadd.f32 %v2579_v24, %v2451_v41  ;;  %v2835_v33 = vmul.f32 %v2579_v24, %v2579_v24  ;;  %v2070_v8 = vmul.f32 %v3852_v16, %v3852_v16 }
 0x14b   : > { %v5153_v5 = vpop.eup %3863  ;;  %v2964_v22 = vadd.f32 %v2836_v59, %v2708_v50  ;;  %v2709_v60 = vadd.f32 %v2581_v61, %v2453_v40  ;;  %v2837_v15 = vmul.f32 %v2581_v61, %v2581_v61  ;;  %v2072_v6 = vmul.f32 %v3854_v39, %v3854_v39  ;;  %v5161_v24 = vpop.f32.mrb[14].mxu0 }
 0x14c   : > { %v5155_v34 = vpop.eup %3865  ;;  %3090 = vst [vmem:[%s5158_s18] sm:$0xff] %v2962_v57  ;;  %v2963_v30 = vadd.f32 %v2835_v33, %v2707_v13  ;;  %v2198_v58 = vadd.f32 %v3852_v16, %v2070_v8  ;;  %v2326_v29 = vmul.f32 %v2070_v8, %v2070_v8  ;;  %v2071_v41 = vmul.f32 %v3856_v9, %v3856_v9  ;;  %v5163_v63 = vpop.f32.mrb[14].mxu1 }
 0x14d   : > { %3092 = vst [vmem:[%s5158_s18 + $0x10] sm:$0xff] %v2964_v22  ;;  %v2965_v50 = vadd.f32 %v2837_v15, %v2709_v60  ;;  %v2200_v59 = vadd.f32 %v3854_v39, %v2072_v6  ;;  %v2328_v40 = vmul.f32 %v2072_v6, %v2072_v6  ;;  %v2073_v61 = vmul.f32 %v3858_v56, %v3858_v56  ;;  %v5166_v14 = vpop.f32.mrb[15].mxu0  ;;  %v5168_v7 = vpop.f32.mrb[15].mxu1 }
 0x14e   : > { %v5170_v1 = vpop.eup %3867  ;;  %3091 = vst [vmem:[%s5158_s18 + $0x8] sm:$0xff] %v2963_v30  ;;  %v2454_v16 = vadd.f32 %v2326_v29, %v2198_v58  ;;  %v2582_v57 = vmul.f32 %v2326_v29, %v2326_v29  ;;  %v2199_v13 = vadd.f32 %v3856_v9, %v2071_v41  ;;  %v2327_v33 = vmul.f32 %v2071_v41, %v2071_v41 }
 0x14f   : > { %v5173_v8 = vpop.eup %3869  ;;  %3093 = vst [vmem:[%s5158_s18 + $0x18] sm:$0xff] %v2965_v50  ;;  %v2456_v49 = vadd.f32 %v2328_v40, %v2200_v59  ;;  %v2584_v22 = vmul.f32 %v2328_v40, %v2328_v40  ;;  %v2201_v15 = vadd.f32 %v3858_v56, %v2073_v61  ;;  %v2329_v60 = vmul.f32 %v2073_v61, %v2073_v61  ;;  %v5176_v44 = vpop.f32.mrb[16].mxu0 }
 0x150   : > { %v2710_v39 = vadd.f32 %v2582_v57, %v2454_v16  ;;  %v2838_v6 = vmul.f32 %v2582_v57, %v2582_v57  ;;  %v2455_v47 = vadd.f32 %v2327_v33, %v2199_v13  ;;  %v2583_v46 = vmul.f32 %v2327_v33, %v2327_v33  ;;  %v5178_v38 = vpop.f32.mrb[16].mxu1  ;;  %v5180_v41 = vpop.f32.mrb[17].mxu0 }
 0x151   : > { %v2712_v30 = vadd.f32 %v2584_v22, %v2456_v49  ;;  %v2840_v58 = vmul.f32 %v2584_v22, %v2584_v22  ;;  %v2457_v9 = vadd.f32 %v2329_v60, %v2201_v15  ;;  %v2585_v29 = vmul.f32 %v2329_v60, %v2329_v60  ;;  %v5182_v50 = vpop.f32.mrb[17].mxu1 }
 0x152   : > { %5954 = vst [vmem:[#allocation29_spill] sm:$0xff] %v5182_v50  ;;  %v2966_v56 = vadd.f32 %v2838_v6, %v2710_v39  ;;  %v2711_v59 = vadd.f32 %v2583_v46, %v2455_v47  ;;  %v2839_v40 = vmul.f32 %v2583_v46, %v2583_v46  ;;  %v2074_v61 = vmul.f32 %v5145_v48, %v5145_v48 }
 0x153   : > { %v2968_v16 = vadd.f32 %v2840_v58, %v2712_v30  ;;  %v2713_v57 = vadd.f32 %v2585_v29, %v2457_v9  ;;  %v2841_v13 = vmul.f32 %v2585_v29, %v2585_v29  ;;  %v2076_v49 = vmul.f32 %v5151_v54, %v5151_v54  ;;  %v5192_v46 = vpop.f32.mrb[18].mxu0 }
 0x154   : > { %3094 = vst [vmem:[%s5158_s18 + $0x20] sm:$0xff] %v2966_v56  ;;  %v2967_v33 = vadd.f32 %v2839_v40, %v2711_v59  ;;  %v2202_v22 = vadd.f32 %v5145_v48, %v2074_v61  ;;  %v2330_v15 = vmul.f32 %v2074_v61, %v2074_v61  ;;  %v2075_v47 = vmul.f32 %v5153_v5, %v5153_v5  ;;  %v5194_v60 = vpop.f32.mrb[18].mxu1  ;;  %v5200_v9 = vpop.f32.mrb[19].mxu0 }
 0x155   : > { %5955 = vst [vmem:[#allocation30_spill] sm:$0xff] %v5192_v46  ;;  %5956 = vst [vmem:[#allocation31_spill] sm:$0xff] %v5194_v60  ;;  %v2969_v39 = vadd.f32 %v2841_v13, %v2713_v57  ;;  %v2204_v6 = vadd.f32 %v5151_v54, %v2076_v49  ;;  %v2332_v30 = vmul.f32 %v2076_v49, %v2076_v49  ;;  %v5202_v48 = vpop.f32.mrb[19].mxu1  ;;  %v5959_v0 = vmin.f32 %v5115_v62, 0.0 }
 0x156   : > { %3096 = vst [vmem:[%s5158_s18 + $0x30] sm:$0xff] %v2968_v16  ;;  %v2077_v58 = vmul.f32 %v5155_v34, %v5155_v34  ;;  %5957 = vst [vmem:[#allocation32_spill] sm:$0xff] %v5202_v48  ;;  %v2458_v29 = vadd.f32 %v2330_v15, %v2202_v22  ;;  %v2586_v56 = vmul.f32 %v2330_v15, %v2330_v15 }
 0x157   : > { %3095 = vst [vmem:[%s5158_s18 + $0x28] sm:$0xff] %v2967_v33  ;;  %v2203_v59 = vadd.f32 %v5153_v5, %v2075_v47  ;;  %v2331_v40 = vmul.f32 %v2075_v47, %v2075_v47  ;;  %3097 = vst [vmem:[%s5158_s18 + $0x38] sm:$0xff] %v2969_v39  ;;  %v2460_v61 = vadd.f32 %v2332_v30, %v2204_v6  ;;  %v5208_v50 = vpop.f32.mrb[20].mxu0 }
 0x158   : > { %v2588_v16 = vmul.f32 %v2332_v30, %v2332_v30  ;;  %v2205_v57 = vadd.f32 %v5155_v34, %v2077_v58  ;;  %v2333_v54 = vmul.f32 %v2077_v58, %v2077_v58  ;;  %v2714_v13 = vadd.f32 %v2586_v56, %v2458_v29  ;;  %v5210_v48 = vpop.f32.mrb[20].mxu1  ;;  %v5212_v47 = vpop.f32.mrb[21].mxu0 }
 0x159   : > { %v2842_v49 = vmul.f32 %v2586_v56, %v2586_v56  ;;  %v2459_v60 = vadd.f32 %v2331_v40, %v2203_v59  ;;  %v2587_v46 = vmul.f32 %v2331_v40, %v2331_v40  ;;  %v5214_v39 = vpop.f32.mrb[21].mxu1  ;;  %v2078_v58 = vmul.f32 %v5170_v1, %v5170_v1 }
 0x15a   : > { %v2716_v33 = vadd.f32 %v2588_v16, %v2460_v61  ;;  %v2844_v22 = vmul.f32 %v2588_v16, %v2588_v16  ;;  %v2461_v15 = vadd.f32 %v2333_v54, %v2205_v57  ;;  %v2589_v5 = vmul.f32 %v2333_v54, %v2333_v54 }
 0x15b   : > { %v2970_v34 = vadd.f32 %v2842_v49, %v2714_v13  ;;  %v2715_v6 = vadd.f32 %v2587_v46, %v2459_v60  ;;  %v2843_v30 = vmul.f32 %v2587_v46, %v2587_v46  ;;  %v2080_v40 = vmul.f32 %v5173_v8, %v5173_v8  ;;  %v5223_v60 = vpop.f32.mrb[22].mxu0 }
 0x15c   : > { %v2972_v29 = vadd.f32 %v2844_v22, %v2716_v33  ;;  %v2717_v56 = vadd.f32 %v2589_v5, %v2461_v15  ;;  %v2845_v59 = vmul.f32 %v2589_v5, %v2589_v5  ;;  %v2206_v16 = vadd.f32 %v5170_v1, %v2078_v58  ;;  %v5225_v46 = vpop.f32.mrb[22].mxu1  ;;  %v5231_v15 = vpop.f32.mrb[23].mxu0 }
 0x15d   : > { %3098 = vst [vmem:[%s5158_s18 + $0x40] sm:$0xff] %v2970_v34  ;;  %v2971_v61 = vadd.f32 %v2843_v30, %v2715_v6  ;;  %v2334_v57 = vmul.f32 %v2078_v58, %v2078_v58  ;;  %v2208_v13 = vadd.f32 %v5173_v8, %v2080_v40  ;;  %v2336_v49 = vmul.f32 %v2080_v40, %v2080_v40  ;;  %v5233_v5 = vpop.f32.mrb[23].mxu1 }
 0x15e   : > { %3100 = vst [vmem:[%s5158_s18 + $0x50] sm:$0xff] %v2972_v29  ;;  %v2973_v54 = vadd.f32 %v2845_v59, %v2717_v56  ;;  %v5958_v33 = vmin.f32 %v5112_v17, 0.0  ;;  %v1842_v6 = vmul.f32 1.442695, %v5959_v0  ;;  %v1700_v30 = vmin.f32 %v5118_v2, 0.0 }
 0x15f   : > { %3099 = vst [vmem:[%s5158_s18 + $0x48] sm:$0xff] %v2971_v61  ;;  %v2462_v1 = vadd.f32 %v2334_v57, %v2206_v16  ;;  %v2590_v34 = vmul.f32 %v2334_v57, %v2334_v57  ;;  %v2464_v58 = vadd.f32 %v2336_v49, %v2208_v13  ;;  %v2592_v29 = vmul.f32 %v2336_v49, %v2336_v49  ;;  %v5242_v40 = vpop.f32.mrb[24].mxu0 }
 0x160   : > { %v1840_v22 = vmul.f32 1.442695, %v5958_v33  ;;  %3101 = vst [vmem:[%s5158_s18 + $0x58] sm:$0xff] %v2973_v54  ;;  %v1571_v17 = vadd.f32 %v4997_v11, %v5120_v43  ;;  %v1846_v59 = vmul.f32 1.442695, %v1700_v30  ;;  %v5244_v61 = vpop.f32.mrb[24].mxu1  ;;  %v1573_v2 = vadd.f32 %v5000_v12, %v5122_v3 }
 0x161   : > { %v2718_v8 = vadd.f32 %v2590_v34, %v2462_v1  ;;  %v2846_v56 = vmul.f32 %v2590_v34, %v2590_v34  ;;  %v2720_v62 = vadd.f32 %v2592_v29, %v2464_v58  ;;  %v2848_v16 = vmul.f32 %v2592_v29, %v2592_v29  ;;  %v5248_v54 = vpop.f32.mrb[25].mxu0  ;;  %v5250_v13 = vpop.f32.mrb[25].mxu1 }
 0x162   : > { %3873 = vpow2.f32 %v1840_v22  ;;  %v1699_v57 = vmin.f32 %v1571_v17, 0.0  ;;  %v1574_v43 = vadd.f32 %v5003_v18, %v5129_v23  ;;  %v1576_v49 = vadd.f32 %v5006_v19, %v5131_v52  ;;  %v3872_v58 = vpop.eup %3871 }
 0x163   : > { %3875 = vpow2.f32 %v1842_v6  ;;  %v2974_v11 = vadd.f32 %v2846_v56, %v2718_v8  ;;  %v2976_v33 = vadd.f32 %v2848_v16, %v2720_v62  ;;  %v1701_v1 = vmin.f32 %v1573_v2, 0.0  ;;  %v5263_v30 = vpop.f32.mrb[26].mxu0 }
 0x164   : > { %3877 = vpow2.f32 %v1846_v59  ;;  %v1844_v22 = vmul.f32 1.442695, %v1699_v57  ;;  %v1575_v34 = vadd.f32 %v5009_v20, %v5133_v27  ;;  %v1702_v12 = vmin.f32 %v1574_v43, 0.0  ;;  %v5265_v18 = vpop.f32.mrb[26].mxu1  ;;  %v5270_v52 = vpop.f32.mrb[27].mxu0 }
 0x165   : > { %3102 = vst [vmem:[%s5158_s18 + $0x60] sm:$0xff] %v2974_v11  ;;  %v1704_v3 = vmin.f32 %v1576_v49, 0.0  ;;  %v1577_v0 = vadd.f32 %v5012_v21, %v5135_v42  ;;  %v1578_v6 = vadd.f32 %v5015_v4, %v5141_v45  ;;  %3104 = vst [vmem:[%s5158_s18 + $0x70] sm:$0xff] %v2976_v33  ;;  %v1848_v19 = vmul.f32 1.442695, %v1701_v1  ;;  %v5272_v27 = vpop.f32.mrb[27].mxu1 }
 0x166   : > { %3879 = vpow2.f32 %v1844_v22  ;;  %v1703_v23 = vmin.f32 %v1575_v34, 0.0  ;;  %v1580_v20 = vadd.f32 %v5018_v25, %v5143_v55  ;;  %v1850_v21 = vmul.f32 1.442695, %v1702_v12 }
 0x167   : > { %v1854_v42 = vmul.f32 1.442695, %v1704_v3  ;;  %v1705_v29 = vmin.f32 %v1577_v0, 0.0  ;;  %v1706_v4 = vmin.f32 %v1578_v6, 0.0  ;;  %v2079_v45 = vmul.f32 %v3872_v58, %v3872_v58  ;;  %v5276_v25 = vpop.f32.mrb[28].mxu0 }
 0x168   : > { %3881 = vpow2.f32 %v1848_v19  ;;  %v1852_v17 = vmul.f32 1.442695, %v1703_v23  ;;  %v1708_v8 = vmin.f32 %v1580_v20, 0.0  ;;  %v1579_v62 = vadd.f32 %v5021_v26, %v5147_v53  ;;  %v5278_v55 = vpop.f32.mrb[28].mxu1  ;;  %v5280_v43 = vpop.f32.mrb[29].mxu0 }
 0x169   : > { %3883 = vpow2.f32 %v1850_v21  ;;  %v1856_v56 = vmul.f32 1.442695, %v1705_v29  ;;  %v1858_v59 = vmul.f32 1.442695, %v1706_v4  ;;  %v2207_v57 = vadd.f32 %v3872_v58, %v2079_v45  ;;  %v5282_v49 = vpop.f32.mrb[29].mxu1 }
 0x16a   : > { %v2335_v2 = vmul.f32 %v2079_v45, %v2079_v45  ;;  %3885 = vpow2.f32 %v1854_v42  ;;  %v1862_v11 = vmul.f32 1.442695, %v1708_v8  ;;  %v1707_v1 = vmin.f32 %v1579_v62, 0.0 }
 0x16b   : > { %3887 = vpow2.f32 %v1852_v17  ;;  %v5286_v26 = vadd.f32 %v5024_v28, %v5149_v10  ;;  %v5288_v23 = vpop.f32.mrb[30].mxu0 }
 0x16c   : > { %v3874_v16 = vpop.eup %3873  ;;  %v2463_v53 = vadd.f32 %v2335_v2, %v2207_v57  ;;  %v2591_v34 = vmul.f32 %v2335_v2, %v2335_v2  ;;  %3889 = vpow2.f32 %v1856_v56  ;;  %v1860_v19 = vmul.f32 1.442695, %v1707_v1  ;;  %5960 = vst [vmem:[#allocation33_spill] sm:$0xff] %v5288_v23  ;;  %v5290_v20 = vpop.f32.mrb[30].mxu1 }
 0x16d   : > { %v3876_v33 = vpop.eup %3875  ;;  %v2081_v22 = vmul.f32 %v3874_v16, %v3874_v16  ;;  %3891 = vpow2.f32 %v1858_v59  ;;  %5961 = vst [vmem:[#allocation34_spill] sm:$0xff] %v5290_v20  ;;  %v5292_v4 = vpop.f32.mrb[31].mxu0 }
 0x16e   : > { %v2082_v12 = vmul.f32 %v3876_v33, %v3876_v33  ;;  %v3878_v3 = vpop.eup %3877  ;;  %v2719_v58 = vadd.f32 %v2591_v34, %v2463_v53  ;;  %v2847_v21 = vmul.f32 %v2591_v34, %v2591_v34  ;;  %5962 = vst [vmem:[#allocation35_spill] sm:$0xff] %v5292_v4  ;;  %v5294_v28 = vpop.f32.mrb[31].mxu1  ;;  %3893 = vpow2.f32 %v1862_v11 }
 0x16f   : > { %v2209_v0 = vadd.f32 %v3874_v16, %v2081_v22  ;;  %v2337_v6 = vmul.f32 %v2081_v22, %v2081_v22  ;;  %5963 = vst [vmem:[#allocation36_spill] sm:$0xff] %v5294_v28  ;;  %v2084_v17 = vmul.f32 %v3878_v3, %v3878_v3  ;;  %3895 = vpow2.f32 %v1860_v19 }
 0x170   : > { %v2210_v42 = vadd.f32 %v3876_v33, %v2082_v12  ;;  %v2338_v29 = vmul.f32 %v2082_v12, %v2082_v12  ;;  %v3880_v8 = vpop.eup %3879  ;;  %v2975_v56 = vadd.f32 %v2847_v21, %v2719_v58  ;;  %v5296_v33 = vpop.f32.mrb[32].mxu0 }
 0x171   : > { %v2465_v10 = vadd.f32 %v2337_v6, %v2209_v0  ;;  %v2593_v45 = vmul.f32 %v2337_v6, %v2337_v6  ;;  %v2212_v2 = vadd.f32 %v3878_v3, %v2084_v17  ;;  %v2340_v22 = vmul.f32 %v2084_v17, %v2084_v17  ;;  %5964 = vst [vmem:[#allocation37_spill] sm:$0xff] %v5296_v33  ;;  %v5298_v1 = vpop.f32.mrb[32].mxu1  ;;  %v5302_v3 = vpop.f32.mrb[33].mxu0 }
 0x172   : > { %v2466_v59 = vadd.f32 %v2338_v29, %v2210_v42  ;;  %v2594_v62 = vmul.f32 %v2338_v29, %v2338_v29  ;;  %5965 = vst [vmem:[#allocation38_spill] sm:$0xff] %v5298_v1  ;;  %v3882_v53 = vpop.eup %3881  ;;  %3103 = vst [vmem:[%s5158_s18 + $0x68] sm:$0xff] %v2975_v56  ;;  %v2083_v0 = vmul.f32 %v3880_v8, %v3880_v8  ;;  %v5305_v11 = vpop.f32.mrb[33].mxu1 }
 0x173   : > { %v2721_v16 = vadd.f32 %v2593_v45, %v2465_v10  ;;  %v2849_v57 = vmul.f32 %v2593_v45, %v2593_v45  ;;  %v3884_v6 = vpop.eup %3883  ;;  %v2468_v21 = vadd.f32 %v2340_v22, %v2212_v2  ;;  %v2596_v19 = vmul.f32 %v2340_v22, %v2340_v22  ;;  %5966 = vst [vmem:[#allocation39_spill] sm:$0xff] %v5302_v3 }
 0x174   : > { %v2722_v34 = vadd.f32 %v2594_v62, %v2466_v59  ;;  %v2850_v12 = vmul.f32 %v2594_v62, %v2594_v62  ;;  %v2085_v42 = vmul.f32 %v3882_v53, %v3882_v53  ;;  %v3886_v29 = vpop.eup %3885  ;;  %v2211_v45 = vadd.f32 %v3880_v8, %v2083_v0  ;;  %5967 = vst [vmem:[#allocation40_spill] sm:$0xff] %v5305_v11 }
 0x175   : > { %v2977_v58 = vadd.f32 %v2849_v57, %v2721_v16  ;;  %v2339_v17 = vmul.f32 %v2083_v0, %v2083_v0  ;;  %v2086_v1 = vmul.f32 %v3884_v6, %v3884_v6  ;;  %v3888_v56 = vpop.eup %3887  ;;  %v2724_v59 = vadd.f32 %v2596_v19, %v2468_v21 }
 0x176   : > { %v2978_v10 = vadd.f32 %v2850_v12, %v2722_v34  ;;  %v2852_v62 = vmul.f32 %v2596_v19, %v2596_v19  ;;  %v2213_v33 = vadd.f32 %v3882_v53, %v2085_v42  ;;  %v2341_v28 = vmul.f32 %v2085_v42, %v2085_v42  ;;  %v3890_v16 = vpop.eup %3889 }
 0x177   : > { %3105 = vst [vmem:[%s5158_s18 + $0x78] sm:$0xff] %v2977_v58  ;;  %v2467_v57 = vadd.f32 %v2339_v17, %v2211_v45  ;;  %v2595_v2 = vmul.f32 %v2339_v17, %v2339_v17  ;;  %v2214_v22 = vadd.f32 %v3884_v6, %v2086_v1  ;;  %v2342_v3 = vmul.f32 %v2086_v1, %v2086_v1  ;;  %v3892_v4 = vpop.eup %3891 }
 0x178   : > { %3106 = vst [vmem:[%s5158_s18 + $0x80] sm:$0xff] %v2978_v10  ;;  %v2980_v34 = vadd.f32 %v2852_v62, %v2724_v59  ;;  %v2469_v8 = vadd.f32 %v2341_v28, %v2213_v33  ;;  %v2597_v12 = vmul.f32 %v2341_v28, %v2341_v28  ;;  %v2088_v0 = vmul.f32 %v3886_v29, %v3886_v29  ;;  %v3894_v53 = vpop.eup %3893 }
 0x179   : > { %v2723_v20 = vadd.f32 %v2595_v2, %v2467_v57  ;;  %v2851_v58 = vmul.f32 %v2595_v2, %v2595_v2  ;;  %v2470_v21 = vadd.f32 %v2342_v3, %v2214_v22  ;;  %v2598_v19 = vmul.f32 %v2342_v3, %v2342_v3  ;;  %v3896_v45 = vpop.eup %3895  ;;  %v5309_v2 = vpop.f32.mrb[34].mxu0 }
 0x17a   : > { %3108 = vst [vmem:[%s5158_s18 + $0x90] sm:$0xff] %v2980_v34  ;;  %v2725_v42 = vadd.f32 %v2597_v12, %v2469_v8  ;;  %v2853_v11 = vmul.f32 %v2597_v12, %v2597_v12  ;;  %v2216_v23 = vadd.f32 %v3886_v29, %v2088_v0  ;;  %v2344_v10 = vmul.f32 %v2088_v0, %v2088_v0  ;;  %v5311_v3 = vpop.f32.mrb[34].mxu1 }
 0x17b   : > { %v2979_v6 = vadd.f32 %v2851_v58, %v2723_v20  ;;  %v2726_v1 = vadd.f32 %v2598_v19, %v2470_v21  ;;  %v2854_v17 = vmul.f32 %v2598_v19, %v2598_v19  ;;  %v2087_v59 = vmul.f32 %v3888_v56, %v3888_v56  ;;  %5968 = vst [vmem:[#allocation41_spill] sm:$0xff] %v5309_v2 }
 0x17c   : > { %v2981_v33 = vadd.f32 %v2853_v11, %v2725_v42  ;;  %v2472_v28 = vadd.f32 %v2344_v10, %v2216_v23  ;;  %v2600_v62 = vmul.f32 %v2344_v10, %v2344_v10  ;;  %v2089_v57 = vmul.f32 %v3890_v16, %v3890_v16  ;;  %5969 = vst [vmem:[#allocation42_spill] sm:$0xff] %v5311_v3 }
 0x17d   : > { %3107 = vst [vmem:[%s5158_s18 + $0x88] sm:$0xff] %v2979_v6  ;;  %v2982_v22 = vadd.f32 %v2854_v17, %v2726_v1  ;;  %v2215_v34 = vadd.f32 %v3888_v56, %v2087_v59  ;;  %v2343_v29 = vmul.f32 %v2087_v59, %v2087_v59  ;;  %v2090_v8 = vmul.f32 %v3892_v4, %v3892_v4 }
 0x17e   : > { %3109 = vst [vmem:[%s5158_s18 + $0x98] sm:$0xff] %v2981_v33  ;;  %v2728_v12 = vadd.f32 %v2600_v62, %v2472_v28  ;;  %v2856_v20 = vmul.f32 %v2600_v62, %v2600_v62  ;;  %v2217_v0 = vadd.f32 %v3890_v16, %v2089_v57  ;;  %v2345_v58 = vmul.f32 %v2089_v57, %v2089_v57 }
 0x17f   : > { %3110 = vst [vmem:[%s5158_s18 + $0xa0] sm:$0xff] %v2982_v22  ;;  %v2471_v11 = vadd.f32 %v2343_v29, %v2215_v34  ;;  %v2599_v23 = vmul.f32 %v2343_v29, %v2343_v29  ;;  %v2218_v21 = vadd.f32 %v3892_v4, %v2090_v8  ;;  %v2346_v19 = vmul.f32 %v2090_v8, %v2090_v8 }
 0x180   : > { %v2984_v42 = vadd.f32 %v2856_v20, %v2728_v12  ;;  %v2473_v10 = vadd.f32 %v2345_v58, %v2217_v0  ;;  %v2601_v2 = vmul.f32 %v2345_v58, %v2345_v58  ;;  %v2092_v3 = vmul.f32 %v3894_v53, %v3894_v53  ;;  %v5319_v0 = vpop.f32.mrb[35].mxu0 }
 0x181   : > { %v2727_v6 = vadd.f32 %v2599_v23, %v2471_v11  ;;  %v2855_v1 = vmul.f32 %v2599_v23, %v2599_v23  ;;  %v2474_v56 = vadd.f32 %v2346_v19, %v2218_v21  ;;  %v2602_v17 = vmul.f32 %v2346_v19, %v2346_v19 }
 0x182   : > { %3112 = vst [vmem:[%s5158_s18 + $0xb0] sm:$0xff] %v2984_v42  ;;  %v2729_v59 = vadd.f32 %v2601_v2, %v2473_v10  ;;  %v2857_v33 = vmul.f32 %v2601_v2, %v2601_v2  ;;  %v2220_v28 = vadd.f32 %v3894_v53, %v2092_v3  ;;  %v2348_v16 = vmul.f32 %v2092_v3, %v2092_v3  ;;  %v5324_v3 = vpop.f32.mrb[35].mxu1 }
 0x183   : > { %v2983_v62 = vadd.f32 %v2855_v1, %v2727_v6  ;;  %v2730_v57 = vadd.f32 %v2602_v17, %v2474_v56  ;;  %v2858_v22 = vmul.f32 %v2602_v17, %v2602_v17  ;;  %v2091_v4 = vmul.f32 %v3896_v45, %v3896_v45 }
 0x184   : > { %v2985_v34 = vadd.f32 %v2857_v33, %v2729_v59  ;;  %v2476_v29 = vadd.f32 %v2348_v16, %v2220_v28  ;;  %v2604_v8 = vmul.f32 %v2348_v16, %v2348_v16  ;;  %v5970_v12 = vmin.f32 %v5286_v26, 0.0 }
 0x185   : > { %3111 = vst [vmem:[%s5158_s18 + $0xa8] sm:$0xff] %v2983_v62  ;;  %v2986_v58 = vadd.f32 %v2858_v22, %v2730_v57  ;;  %v2219_v11 = vadd.f32 %v3896_v45, %v2091_v4  ;;  %v2347_v2 = vmul.f32 %v2091_v4, %v2091_v4  ;;  %v1582_v53 = vadd.f32 %v5027_v51, %v5161_v24 }
 0x186   : > { %v1864_v20 = vmul.f32 1.442695, %v5970_v12  ;;  %3113 = vst [vmem:[%s5158_s18 + $0xb8] sm:$0xff] %v2985_v34  ;;  %v2732_v23 = vadd.f32 %v2604_v8, %v2476_v29  ;;  %v2860_v21 = vmul.f32 %v2604_v8, %v2604_v8  ;;  %v1584_v26 = vadd.f32 %v5030_v31, %v5163_v63  ;;  %v5336_v31 = vpop.f32.mrb[36].mxu0  ;;  %v5974_v12 = vld [vmem:[#allocation30_spill] sm:$0xff] }
 0x187   : > { %3114 = vst [vmem:[%s5158_s18 + $0xc0] sm:$0xff] %v2986_v58  ;;  %v2475_v19 = vadd.f32 %v2347_v2, %v2219_v11  ;;  %v2603_v42 = vmul.f32 %v2347_v2, %v2347_v2  ;;  %v1710_v10 = vmin.f32 %v1582_v53, 0.0  ;;  %v1583_v45 = vadd.f32 %v5033_v32, %v5166_v14  ;;  %v5341_v14 = vpop.f32.mrb[36].mxu1  ;;  %v5345_v62 = vpop.f32.mrb[37].mxu0  ;;  %v5977_v2 = vld [vmem:[#allocation14_spill] sm:$0xff] }
 0x188   : > { %3897 = vpow2.f32 %v1864_v20  ;;  %v2988_v6 = vadd.f32 %v2860_v21, %v2732_v23  ;;  %v1712_v1 = vmin.f32 %v1584_v26, 0.0  ;;  %v1585_v51 = vadd.f32 %v5036_v35, %v5168_v7  ;;  %v5347_v34 = vpop.f32.mrb[37].mxu1  ;;  %v5975_v20 = vld [vmem:[#allocation13_spill] sm:$0xff]  ;;  %v5978_v23 = vld [vmem:[#allocation15_spill] sm:$0xff] }
 0x189   : > { %v1586_v24 = vadd.f32 %v5039_v36, %v5176_v44  ;;  %v2731_v56 = vadd.f32 %v2603_v42, %v2475_v19  ;;  %v2859_v17 = vmul.f32 %v2603_v42, %v2603_v42  ;;  %v1866_v59 = vmul.f32 1.442695, %v1710_v10  ;;  %v5971_v36 = vld [vmem:[#allocation11_spill] sm:$0xff] }
 0x18a   : > { %v1711_v33 = vmin.f32 %v1583_v45, 0.0  ;;  %3116 = vst [vmem:[%s5158_s18 + $0xd0] sm:$0xff] %v2988_v6  ;;  %v1870_v63 = vmul.f32 1.442695, %v1712_v1  ;;  %v1713_v28 = vmin.f32 %v1585_v51, 0.0  ;;  %v1588_v32 = vadd.f32 %v5042_v37, %v5178_v38  ;;  %v5972_v37 = vld [vmem:[#allocation29_spill] sm:$0xff] }
 0x18b   : > { %v1714_v16 = vmin.f32 %v1586_v24, 0.0  ;;  %v2987_v35 = vadd.f32 %v2859_v17, %v2731_v56  ;;  %3899 = vpow2.f32 %v1866_v59  ;;  %v1587_v44 = vadd.f32 %v5971_v36, %v5180_v41  ;;  %v5973_v38 = vld [vmem:[#allocation12_spill] sm:$0xff]  ;;  %v5976_v41 = vld [vmem:[#allocation31_spill] sm:$0xff]  ;;  %v5360_v56 = vpop.f32.mrb[38].mxu0  ;;  %v5982_v36 = vld [vmem:[#allocation18_spill] sm:$0xff] }
 0x18c   : > { %v1868_v7 = vmul.f32 1.442695, %v1711_v33  ;;  %3901 = vpow2.f32 %v1870_v63  ;;  %v1872_v57 = vmul.f32 1.442695, %v1713_v28  ;;  %v1716_v4 = vmin.f32 %v1588_v32, 0.0  ;;  %v5979_v1 = vld [vmem:[#allocation32_spill] sm:$0xff] }
 0x18d   : > { %v1874_v22 = vmul.f32 1.442695, %v1714_v16  ;;  %3115 = vst [vmem:[%s5158_s18 + $0xc8] sm:$0xff] %v2987_v35  ;;  %v1715_v29 = vmin.f32 %v1587_v44, 0.0  ;;  %v1589_v8 = vadd.f32 %v5973_v38, %v5972_v37  ;;  %v1590_v58 = vadd.f32 %v5975_v20, %v5974_v12  ;;  %v5980_v51 = vld [vmem:[#allocation16_spill] sm:$0xff]  ;;  %v5981_v16 = vld [vmem:[#allocation17_spill] sm:$0xff] }
 0x18e   : > { %3903 = vpow2.f32 %v1868_v7  ;;  %v1878_v11 = vmul.f32 1.442695, %v1716_v4  ;;  %v1592_v53 = vadd.f32 %v5977_v2, %v5976_v41  ;;  %v1591_v21 = vadd.f32 %v5978_v23, %v5200_v9  ;;  %v5983_v4 = vld [vmem:[#allocation19_spill] sm:$0xff] }
 0x18f   : > { %3905 = vpow2.f32 %v1872_v57  ;;  %v1876_v26 = vmul.f32 1.442695, %v1715_v29  ;;  %v1717_v19 = vmin.f32 %v1589_v8, 0.0  ;;  %v1718_v42 = vmin.f32 %v1590_v58, 0.0 }
 0x190   : > { %3907 = vpow2.f32 %v1874_v22  ;;  %v1720_v45 = vmin.f32 %v1592_v53, 0.0  ;;  %v1719_v6 = vmin.f32 %v1591_v21, 0.0  ;;  %v1593_v24 = vadd.f32 %v5980_v51, %v5979_v1  ;;  %v5374_v1 = vpop.f32.mrb[38].mxu1 }
 0x191   : > { %3909 = vpow2.f32 %v1878_v11  ;;  %v1880_v59 = vmul.f32 1.442695, %v1717_v19  ;;  %v1882_v33 = vmul.f32 1.442695, %v1718_v42  ;;  %v1594_v32 = vadd.f32 %v5981_v16, %v5208_v50 }
 0x192   : > { %v3898_v10 = vpop.eup %3897  ;;  %3911 = vpow2.f32 %v1876_v26  ;;  %v1886_v63 = vmul.f32 1.442695, %v1720_v45  ;;  %v1884_v28 = vmul.f32 1.442695, %v1719_v6  ;;  %v1721_v9 = vmin.f32 %v1593_v24, 0.0 }
 0x193   : > { %v2093_v17 = vmul.f32 %v3898_v10, %v3898_v10  ;;  %3913 = vpow2.f32 %v1880_v59  ;;  %v5366_v44 = vadd.f32 %v5982_v36, %v5210_v48  ;;  %v1722_v22 = vmin.f32 %v1594_v32, 0.0 }
 0x194   : > { %3915 = vpow2.f32 %v1882_v33  ;;  %v1888_v57 = vmul.f32 1.442695, %v1721_v9  ;;  %v5370_v29 = vadd.f32 %v5983_v4, %v5212_v47 }
 0x195   : > { %v2221_v35 = vadd.f32 %v3898_v10, %v2093_v17  ;;  %v2349_v7 = vmul.f32 %v2093_v17, %v2093_v17  ;;  %v3900_v37 = vpop.eup %3899  ;;  %3917 = vpow2.f32 %v1886_v63  ;;  %v1724_v50 = vmin.f32 %v5366_v44, 0.0  ;;  %v5985_v44 = vld [vmem:[#allocation21_spill] sm:$0xff] }
 0x196   : > { %v3902_v12 = vpop.eup %3901  ;;  %v2094_v20 = vmul.f32 %v3900_v37, %v3900_v37  ;;  %3919 = vpow2.f32 %v1884_v28  ;;  %v1890_v58 = vmul.f32 1.442695, %v1722_v22  ;;  %v1723_v48 = vmin.f32 %v5370_v29, 0.0 }
 0x197   : > { %v2477_v38 = vadd.f32 %v2349_v7, %v2221_v35  ;;  %v2605_v8 = vmul.f32 %v2349_v7, %v2349_v7  ;;  %v2096_v53 = vmul.f32 %v3902_v12, %v3902_v12  ;;  %3921 = vpow2.f32 %v1888_v57 }
 0x198   : > { %v3904_v11 = vpop.eup %3903  ;;  %v2222_v47 = vadd.f32 %v3900_v37, %v2094_v20  ;;  %v2350_v21 = vmul.f32 %v2094_v20, %v2094_v20  ;;  %3923 = vpow2.f32 %v1890_v58 }
 0x199   : > { %v2733_v41 = vadd.f32 %v2605_v8, %v2477_v38  ;;  %v2861_v2 = vmul.f32 %v2605_v8, %v2605_v8  ;;  %v3906_v23 = vpop.eup %3905  ;;  %v2095_v26 = vmul.f32 %v3904_v11, %v3904_v11  ;;  %v2224_v10 = vadd.f32 %v3902_v12, %v2096_v53  ;;  %v5377_v12 = vpop.f32.mrb[39].mxu0 }
 0x19a   : > { %v3908_v19 = vpop.eup %3907  ;;  %v2352_v45 = vmul.f32 %v2096_v53, %v2096_v53  ;;  %v2097_v6 = vmul.f32 %v3906_v23, %v3906_v23  ;;  %v2478_v24 = vadd.f32 %v2350_v21, %v2222_v47  ;;  %v2606_v17 = vmul.f32 %v2350_v21, %v2350_v21  ;;  %v5379_v53 = vpop.f32.mrb[39].mxu1 }
 0x19b   : > { %v2989_v42 = vadd.f32 %v2861_v2, %v2733_v41  ;;  %v3910_v51 = vpop.eup %3909  ;;  %v2223_v59 = vadd.f32 %v3904_v11, %v2095_v26  ;;  %v2351_v33 = vmul.f32 %v2095_v26, %v2095_v26  ;;  %v2098_v2 = vmul.f32 %v3908_v19, %v3908_v19 }
 0x19c   : > { %v3912_v63 = vpop.eup %3911  ;;  %v2480_v28 = vadd.f32 %v2352_v45, %v2224_v10  ;;  %v2608_v9 = vmul.f32 %v2352_v45, %v2352_v45  ;;  %v2225_v16 = vadd.f32 %v3906_v23, %v2097_v6  ;;  %v2353_v32 = vmul.f32 %v2097_v6, %v2097_v6 }
 0x19d   : > { %3117 = vst [vmem:[%s5158_s18 + $0xd8] sm:$0xff] %v2989_v42  ;;  %v2734_v35 = vadd.f32 %v2606_v17, %v2478_v24  ;;  %v2862_v7 = vmul.f32 %v2606_v17, %v2606_v17  ;;  %v2479_v36 = vadd.f32 %v2351_v33, %v2223_v59  ;;  %v2607_v57 = vmul.f32 %v2351_v33, %v2351_v33  ;;  %v3914_v22 = vpop.eup %3913 }
 0x19e   : > { %v2736_v4 = vadd.f32 %v2608_v9, %v2480_v28  ;;  %v2864_v37 = vmul.f32 %v2608_v9, %v2608_v9  ;;  %v2481_v38 = vadd.f32 %v2353_v32, %v2225_v16  ;;  %v2609_v8 = vmul.f32 %v2353_v32, %v2353_v32  ;;  %v3916_v20 = vpop.eup %3915 }
 0x19f   : > { %v2990_v58 = vadd.f32 %v2862_v7, %v2734_v35  ;;  %v2735_v11 = vadd.f32 %v2607_v57, %v2479_v36  ;;  %v2863_v41 = vmul.f32 %v2607_v57, %v2607_v57  ;;  %v3918_v23 = vpop.eup %3917  ;;  %v2100_v42 = vmul.f32 %v3910_v51, %v3910_v51 }
 0x1a0   : > { %v2992_v47 = vadd.f32 %v2864_v37, %v2736_v4  ;;  %v2737_v21 = vadd.f32 %v2609_v8, %v2481_v38  ;;  %v2865_v26 = vmul.f32 %v2609_v8, %v2609_v8  ;;  %v3920_v10 = vpop.eup %3919  ;;  %v2226_v6 = vadd.f32 %v3908_v19, %v2098_v2 }
 0x1a1   : > { %3118 = vst [vmem:[%s5158_s18 + $0xe0] sm:$0xff] %v2990_v58  ;;  %v2991_v45 = vadd.f32 %v2863_v41, %v2735_v11  ;;  %v2354_v24 = vmul.f32 %v2098_v2, %v2098_v2  ;;  %v2099_v17 = vmul.f32 %v3912_v63, %v3912_v63  ;;  %v3922_v59 = vpop.eup %3921  ;;  %v2228_v28 = vadd.f32 %v3910_v51, %v2100_v42 }
 0x1a2   : > { %3120 = vst [vmem:[%s5158_s18 + $0xf0] sm:$0xff] %v2992_v47  ;;  %v2993_v33 = vadd.f32 %v2865_v26, %v2737_v21  ;;  %v2356_v9 = vmul.f32 %v2100_v42, %v2100_v42  ;;  %v2101_v16 = vmul.f32 %v3914_v22, %v3914_v22  ;;  %v5383_v32 = vpop.eup %3923 }
 0x1a3   : > { %3119 = vst [vmem:[%s5158_s18 + $0xe8] sm:$0xff] %v2991_v45  ;;  %v2482_v35 = vadd.f32 %v2354_v24, %v2226_v6  ;;  %v2610_v7 = vmul.f32 %v2354_v24, %v2354_v24  ;;  %v2227_v36 = vadd.f32 %v3912_v63, %v2099_v17  ;;  %v2355_v57 = vmul.f32 %v2099_v17, %v2099_v17 }
 0x1a4   : > { %3121 = vst [vmem:[%s5158_s18 + $0xf8] sm:$0xff] %v2993_v33  ;;  %v2484_v4 = vadd.f32 %v2356_v9, %v2228_v28  ;;  %v2612_v37 = vmul.f32 %v2356_v9, %v2356_v9  ;;  %v2229_v38 = vadd.f32 %v3914_v22, %v2101_v16  ;;  %v2357_v19 = vmul.f32 %v2101_v16, %v2101_v16 }
 0x1a5   : > { %v2738_v8 = vadd.f32 %v2610_v7, %v2482_v35  ;;  %v2866_v58 = vmul.f32 %v2610_v7, %v2610_v7  ;;  %v2483_v11 = vadd.f32 %v2355_v57, %v2227_v36  ;;  %v2611_v41 = vmul.f32 %v2355_v57, %v2355_v57 }
 0x1a6   : > { %v2740_v51 = vadd.f32 %v2612_v37, %v2484_v4  ;;  %v2868_v2 = vmul.f32 %v2612_v37, %v2612_v37  ;;  %v2485_v47 = vadd.f32 %v2357_v19, %v2229_v38  ;;  %v2613_v21 = vmul.f32 %v2357_v19, %v2357_v19 }
 0x1a7   : > { %v2994_v26 = vadd.f32 %v2866_v58, %v2738_v8  ;;  %v2739_v42 = vadd.f32 %v2611_v41, %v2483_v11  ;;  %v2867_v45 = vmul.f32 %v2611_v41, %v2611_v41  ;;  %v2102_v63 = vmul.f32 %v3916_v20, %v3916_v20 }
 0x1a8   : > { %v2996_v6 = vadd.f32 %v2868_v2, %v2740_v51  ;;  %v2741_v24 = vadd.f32 %v2613_v21, %v2485_v47  ;;  %v2869_v17 = vmul.f32 %v2613_v21, %v2613_v21  ;;  %v2104_v22 = vmul.f32 %v3918_v23, %v3918_v23 }
 0x1a9   : > { %3122 = vst [vmem:[%s5158_s18 + $0x100] sm:$0xff] %v2994_v26  ;;  %v2995_v33 = vadd.f32 %v2867_v45, %v2739_v42  ;;  %v2230_v28 = vadd.f32 %v3916_v20, %v2102_v63  ;;  %v2358_v9 = vmul.f32 %v2102_v63, %v2102_v63  ;;  %v2103_v16 = vmul.f32 %v3920_v10, %v3920_v10 }
 0x1aa   : > { %3124 = vst [vmem:[%s5158_s18 + $0x110] sm:$0xff] %v2996_v6  ;;  %v2997_v35 = vadd.f32 %v2869_v17, %v2741_v24  ;;  %v2232_v7 = vadd.f32 %v3918_v23, %v2104_v22  ;;  %v2360_v36 = vmul.f32 %v2104_v22, %v2104_v22  ;;  %v2105_v57 = vmul.f32 %v3922_v59, %v3922_v59 }
 0x1ab   : > { %3123 = vst [vmem:[%s5158_s18 + $0x108] sm:$0xff] %v2995_v33  ;;  %v2486_v4 = vadd.f32 %v2358_v9, %v2230_v28  ;;  %v2614_v37 = vmul.f32 %v2358_v9, %v2358_v9  ;;  %v2231_v38 = vadd.f32 %v3920_v10, %v2103_v16  ;;  %v2359_v19 = vmul.f32 %v2103_v16, %v2103_v16 }
 0x1ac   : > { %3125 = vst [vmem:[%s5158_s18 + $0x118] sm:$0xff] %v2997_v35  ;;  %v2488_v8 = vadd.f32 %v2360_v36, %v2232_v7  ;;  %v2616_v58 = vmul.f32 %v2360_v36, %v2360_v36  ;;  %v2233_v11 = vadd.f32 %v3922_v59, %v2105_v57  ;;  %v2361_v41 = vmul.f32 %v2105_v57, %v2105_v57  ;;  %v5399_v35 = vpop.f32.mrb[40].mxu0  ;;  %v5984_v36 = vld [vmem:[#allocation20_spill] sm:$0xff] }
 0x1ad   : > { %v2742_v51 = vadd.f32 %v2614_v37, %v2486_v4  ;;  %v2870_v20 = vmul.f32 %v2614_v37, %v2614_v37  ;;  %v2487_v2 = vadd.f32 %v2359_v19, %v2231_v38  ;;  %v2615_v47 = vmul.f32 %v2359_v19, %v2359_v19  ;;  %v5987_v19 = vld [vmem:[#allocation23_spill] sm:$0xff] }
 0x1ae   : > { %v2744_v21 = vadd.f32 %v2616_v58, %v2488_v8  ;;  %v2872_v26 = vmul.f32 %v2616_v58, %v2616_v58  ;;  %v2489_v23 = vadd.f32 %v2361_v41, %v2233_v11  ;;  %v2617_v42 = vmul.f32 %v2361_v41, %v2361_v41  ;;  %v5988_v58 = vld [vmem:[#allocation25_spill] sm:$0xff] }
 0x1af   : > { %v2998_v45 = vadd.f32 %v2870_v20, %v2742_v51  ;;  %v2743_v63 = vadd.f32 %v2615_v47, %v2487_v2  ;;  %v2871_v6 = vmul.f32 %v2615_v47, %v2615_v47  ;;  %v2106_v10 = vmul.f32 %v5383_v32, %v5383_v32  ;;  %v5989_v20 = vld [vmem:[#allocation26_spill] sm:$0xff] }
 0x1b0   : > { %v3000_v24 = vadd.f32 %v2872_v26, %v2744_v21  ;;  %v2745_v59 = vadd.f32 %v2617_v42, %v2489_v23  ;;  %v2873_v17 = vmul.f32 %v2617_v42, %v2617_v42  ;;  %v1894_v22 = vmul.f32 1.442695, %v1724_v50 }
 0x1b1   : > { %3126 = vst [vmem:[%s5158_s18 + $0x120] sm:$0xff] %v2998_v45  ;;  %v2999_v33 = vadd.f32 %v2871_v6, %v2743_v63  ;;  %v2234_v28 = vadd.f32 %v5383_v32, %v2106_v10  ;;  %v2362_v9 = vmul.f32 %v2106_v10, %v2106_v10  ;;  %v1892_v16 = vmul.f32 1.442695, %v1723_v48  ;;  %v5986_v32 = vld [vmem:[#allocation22_spill] sm:$0xff] }
 0x1b2   : > { %3128 = vst [vmem:[%s5158_s18 + $0x130] sm:$0xff] %v3000_v24  ;;  %v3001_v7 = vadd.f32 %v2873_v17, %v2745_v59  ;;  %3925 = vpow2.f32 %v1894_v22  ;;  %v1597_v57 = vadd.f32 %v5984_v36, %v5214_v39  ;;  %v1598_v50 = vadd.f32 %v5985_v44, %v5223_v60  ;;  %v5414_v39 = vpop.f32.mrb[40].mxu1  ;;  %v1313_v17 = vpop.permute.xlu1 %1312 }
 0x1b3   : > { %3127 = vst [vmem:[%s5158_s18 + $0x128] sm:$0xff] %v2999_v33  ;;  %v2490_v4 = vadd.f32 %v2362_v9, %v2234_v28  ;;  %v2618_v37 = vmul.f32 %v2362_v9, %v2362_v9  ;;  %3927 = vpow2.f32 %v1892_v16  ;;  %v1600_v38 = vadd.f32 %v5986_v32, %v5225_v46  ;;  %v5422_v6 = vpop.f32.mrb[41].mxu1  ;;  %v5992_v28 = vld [vmem:[#allocation24_spill] sm:$0xff]  ;;  %v5993_v9 = vld [vmem:[#allocation10_spill] sm:$0xff] }
 0x1b4   : > { %3129 = vst [vmem:[%s5158_s18 + $0x138] sm:$0xff] %v3001_v7  ;;  %v1725_v29 = vmin.f32 %v1597_v57, 0.0  ;;  %v1726_v48 = vmin.f32 %v1598_v50, 0.0  ;;  %v1599_v8 = vadd.f32 %v5987_v19, %v5231_v15  ;;  %v1601_v11 = vadd.f32 %v5988_v58, %v5233_v5  ;;  %v5990_v15 = vld [vmem:[#allocation27_spill] sm:$0xff]  ;;  %v5420_v5 = vpop.f32.mrb[41].mxu0  ;;  %v5995_v57 = vld [vmem:[#allocation8_spill] sm:$0xff] }
 0x1b5   : > { %v2746_v41 = vadd.f32 %v2618_v37, %v2490_v4  ;;  %v2874_v60 = vmul.f32 %v2618_v37, %v2618_v37  ;;  %v1728_v51 = vmin.f32 %v1600_v38, 0.0  ;;  %v1602_v2 = vadd.f32 %v5989_v20, %v5242_v40  ;;  %v5991_v40 = vld [vmem:[#allocation28_spill] sm:$0xff]  ;;  %v5994_v7 = vld [vmem:[#allocation7_spill] sm:$0xff]  ;;  %v5431_v50 = vpop.f32.mrb[42].mxu0  ;;  %v5996_v37 = vld [vmem:[#allocation9_spill] sm:$0xff]  ;;  %v5435_v38 = vpop.f32.mrb[42].mxu1 }
 0x1b6   : > { %v1896_v47 = vmul.f32 1.442695, %v1725_v29  ;;  %v1898_v46 = vmul.f32 1.442695, %v1726_v48  ;;  %v1727_v21 = vmin.f32 %v1599_v8, 0.0  ;;  %v1729_v26 = vmin.f32 %v1601_v11, 0.0 }
 0x1b7   : > { %v3002_v23 = vadd.f32 %v2874_v60, %v2746_v41  ;;  %v1902_v42 = vmul.f32 1.442695, %v1728_v51  ;;  %v1730_v45 = vmin.f32 %v1602_v2, 0.0  ;;  %v1604_v63 = vadd.f32 %v5990_v15, %v5244_v61  ;;  %v5439_v58 = vpop.f32.mrb[43].mxu0 }
 0x1b8   : > { %3929 = vpow2.f32 %v1896_v47  ;;  %v1900_v10 = vmul.f32 1.442695, %v1727_v21  ;;  %v1904_v24 = vmul.f32 1.442695, %v1729_v26  ;;  %v1603_v59 = vadd.f32 %v5991_v40, %v5248_v54 }
 0x1b9   : > { %3130 = vst [vmem:[%s5158_s18 + $0x140] sm:$0xff] %v3002_v23  ;;  %3931 = vpow2.f32 %v1898_v46  ;;  %v1906_v22 = vmul.f32 1.442695, %v1730_v45  ;;  %v1732_v33 = vmin.f32 %v1604_v63, 0.0  ;;  %v1477_v16 = vadd.f32 %v5993_v9, %v5992_v28 }
 0x1ba   : > { %3933 = vpow2.f32 %v1902_v42  ;;  %v1731_v61 = vmin.f32 %v1603_v59, 0.0  ;;  %v1478_v36 = vadd.f32 %v5994_v7, %v1313_v17  ;;  %v1480_v44 = vadd.f32 %v5995_v57, %v1313_v17 }
 0x1bb   : > { %3935 = vpow2.f32 %v1900_v10  ;;  %v1910_v4 = vmul.f32 1.442695, %v1732_v33  ;;  %v1605_v54 = vadd.f32 %v1477_v16, %v5250_v13  ;;  %v1479_v32 = vadd.f32 %v5996_v37, %v1313_v17  ;;  %v5442_v13 = vpop.f32.mrb[43].mxu1 }
 0x1bc   : > { %v3926_v29 = vpop.eup %3925  ;;  %3937 = vpow2.f32 %v1904_v24  ;;  %v1908_v48 = vmul.f32 1.442695, %v1731_v61  ;;  %v1606_v19 = vadd.f32 %v1478_v36, %v5263_v30  ;;  %v1608_v8 = vadd.f32 %v1480_v44, %v5265_v18 }
 0x1bd   : > { %v3928_v11 = vpop.eup %3927  ;;  %v2108_v41 = vmul.f32 %v3926_v29, %v3926_v29  ;;  %3939 = vpow2.f32 %v1906_v22  ;;  %v1733_v60 = vmin.f32 %v1605_v54, 0.0  ;;  %v1607_v51 = vadd.f32 %v1479_v32, %v5270_v52 }
 0x1be   : > { %v2107_v20 = vmul.f32 %v3928_v11, %v3928_v11  ;;  %3941 = vpow2.f32 %v1910_v4  ;;  %v1734_v2 = vmin.f32 %v1606_v19, 0.0  ;;  %v1736_v47 = vmin.f32 %v1608_v8, 0.0 }
 0x1bf   : > { %v2236_v46 = vadd.f32 %v3926_v29, %v2108_v41  ;;  %v2364_v21 = vmul.f32 %v2108_v41, %v2108_v41  ;;  %3943 = vpow2.f32 %v1908_v48  ;;  %v1912_v30 = vmul.f32 1.442695, %v1733_v60 }
 0x1c0   : > { %v2235_v26 = vadd.f32 %v3928_v11, %v2107_v20  ;;  %v2363_v18 = vmul.f32 %v2107_v20, %v2107_v20  ;;  %v1914_v23 = vmul.f32 1.442695, %v1734_v2  ;;  %v1918_v42 = vmul.f32 1.442695, %v1736_v47 }
 0x1c1   : > { %v2492_v45 = vadd.f32 %v2364_v21, %v2236_v46  ;;  %v2620_v15 = vmul.f32 %v2364_v21, %v2364_v21  ;;  %3945 = vpow2.f32 %v1912_v30  ;;  %v1735_v63 = vmin.f32 %v1607_v51, 0.0  ;;  %v5449_v51 = vpop.f32.mrb[44].mxu0 }
 0x1c2   : > { %v3930_v10 = vpop.eup %3929  ;;  %v2491_v52 = vadd.f32 %v2363_v18, %v2235_v26  ;;  %v2619_v24 = vmul.f32 %v2363_v18, %v2363_v18  ;;  %3947 = vpow2.f32 %v1914_v23  ;;  %v5445_v40 = vadd.f32 %v5993_v9, %v1313_v17 }
 0x1c3   : > { %v3932_v59 = vpop.eup %3931  ;;  %v2748_v22 = vadd.f32 %v2620_v15, %v2492_v45  ;;  %v2876_v33 = vmul.f32 %v2620_v15, %v2620_v15  ;;  %v2109_v28 = vmul.f32 %v3930_v10, %v3930_v10  ;;  %3949 = vpow2.f32 %v1918_v42 }
 0x1c4   : > { %v3934_v16 = vpop.eup %3933  ;;  %v2747_v61 = vadd.f32 %v2619_v24, %v2491_v52  ;;  %v2875_v36 = vmul.f32 %v2619_v24, %v2619_v24  ;;  %v2110_v44 = vmul.f32 %v3932_v59, %v3932_v59  ;;  %v5447_v4 = vmul.f32 1.442695, %v1735_v63 }
 0x1c5   : > { %v3936_v54 = vpop.eup %3935  ;;  %v3004_v32 = vadd.f32 %v2876_v33, %v2748_v22  ;;  %v2237_v29 = vadd.f32 %v3930_v10, %v2109_v28  ;;  %v2365_v48 = vmul.f32 %v2109_v28, %v2109_v28  ;;  %v2112_v19 = vmul.f32 %v3934_v16, %v3934_v16 }
 0x1c6   : > { %v3938_v17 = vpop.eup %3937  ;;  %v3003_v8 = vadd.f32 %v2875_v36, %v2747_v61  ;;  %v2238_v11 = vadd.f32 %v3932_v59, %v2110_v44  ;;  %v2366_v41 = vmul.f32 %v2110_v44, %v2110_v44  ;;  %v2111_v60 = vmul.f32 %v3936_v54, %v3936_v54 }
 0x1c7   : > { %v3940_v20 = vpop.eup %3939  ;;  %3132 = vst [vmem:[%s5158_s18 + $0x150] sm:$0xff] %v3004_v32  ;;  %v2493_v2 = vadd.f32 %v2365_v48, %v2237_v29  ;;  %v2621_v47 = vmul.f32 %v2365_v48, %v2365_v48  ;;  %v2240_v46 = vadd.f32 %v3934_v16, %v2112_v19  ;;  %v2368_v21 = vmul.f32 %v2112_v19, %v2112_v19  ;;  %v5453_v32 = vpop.f32.mrb[44].mxu1 }
 0x1c8   : > { %v3942_v30 = vpop.eup %3941  ;;  %3131 = vst [vmem:[%s5158_s18 + $0x148] sm:$0xff] %v3003_v8  ;;  %v2494_v26 = vadd.f32 %v2366_v41, %v2238_v11  ;;  %v2622_v18 = vmul.f32 %v2366_v41, %v2366_v41  ;;  %v2239_v23 = vadd.f32 %v3936_v54, %v2111_v60  ;;  %v2367_v42 = vmul.f32 %v2111_v60, %v2111_v60  ;;  %v5455_v11 = vpop.f32.mrb[45].mxu0 }
 0x1c9   : > { %v3944_v45 = vpop.eup %3943  ;;  %v2749_v15 = vadd.f32 %v2621_v47, %v2493_v2  ;;  %v2877_v63 = vmul.f32 %v2621_v47, %v2621_v47  ;;  %v2496_v10 = vadd.f32 %v2368_v21, %v2240_v46  ;;  %v2624_v52 = vmul.f32 %v2368_v21, %v2368_v21 }
 0x1ca   : > { %v2750_v24 = vadd.f32 %v2622_v18, %v2494_v26  ;;  %v2878_v59 = vmul.f32 %v2622_v18, %v2622_v18  ;;  %v2495_v22 = vadd.f32 %v2367_v42, %v2239_v23  ;;  %v2623_v33 = vmul.f32 %v2367_v42, %v2367_v42 }
 0x1cb   : > { %v3946_v28 = vpop.eup %3945  ;;  %v3005_v61 = vadd.f32 %v2877_v63, %v2749_v15  ;;  %v2752_v16 = vadd.f32 %v2624_v52, %v2496_v10  ;;  %v2880_v36 = vmul.f32 %v2624_v52, %v2624_v52  ;;  %v2113_v44 = vmul.f32 %v3938_v17, %v3938_v17 }
 0x1cc   : > { %v3948_v54 = vpop.eup %3947  ;;  %v3006_v29 = vadd.f32 %v2878_v59, %v2750_v24  ;;  %v2751_v48 = vadd.f32 %v2623_v33, %v2495_v22  ;;  %v2879_v19 = vmul.f32 %v2623_v33, %v2623_v33  ;;  %v2114_v8 = vmul.f32 %v3940_v20, %v3940_v20 }
 0x1cd   : > { %v3950_v41 = vpop.eup %3949  ;;  %3133 = vst [vmem:[%s5158_s18 + $0x158] sm:$0xff] %v3005_v61  ;;  %v3008_v60 = vadd.f32 %v2880_v36, %v2752_v16  ;;  %v2241_v2 = vadd.f32 %v3938_v17, %v2113_v44  ;;  %v2369_v47 = vmul.f32 %v2113_v44, %v2113_v44  ;;  %v2116_v46 = vmul.f32 %v3942_v30, %v3942_v30 }
 0x1ce   : > { %3134 = vst [vmem:[%s5158_s18 + $0x160] sm:$0xff] %v3006_v29  ;;  %v3007_v21 = vadd.f32 %v2879_v19, %v2751_v48  ;;  %v2242_v26 = vadd.f32 %v3940_v20, %v2114_v8  ;;  %v2370_v18 = vmul.f32 %v2114_v8, %v2114_v8  ;;  %v2115_v23 = vmul.f32 %v3944_v45, %v3944_v45 }
 0x1cf   : > { %3136 = vst [vmem:[%s5158_s18 + $0x170] sm:$0xff] %v3008_v60  ;;  %v2497_v42 = vadd.f32 %v2369_v47, %v2241_v2  ;;  %v2625_v15 = vmul.f32 %v2369_v47, %v2369_v47  ;;  %v2244_v63 = vadd.f32 %v3942_v30, %v2116_v46  ;;  %v2372_v10 = vmul.f32 %v2116_v46, %v2116_v46 }
 0x1d0   : > { %3135 = vst [vmem:[%s5158_s18 + $0x168] sm:$0xff] %v3007_v21  ;;  %v2498_v52 = vadd.f32 %v2370_v18, %v2242_v26  ;;  %v2626_v24 = vmul.f32 %v2370_v18, %v2370_v18  ;;  %v2243_v59 = vadd.f32 %v3944_v45, %v2115_v23  ;;  %v2371_v22 = vmul.f32 %v2115_v23, %v2115_v23 }
 0x1d1   : > { %v2753_v33 = vadd.f32 %v2625_v15, %v2497_v42  ;;  %v2881_v17 = vmul.f32 %v2625_v15, %v2625_v15  ;;  %v2500_v61 = vadd.f32 %v2372_v10, %v2244_v63  ;;  %v2628_v16 = vmul.f32 %v2372_v10, %v2372_v10  ;;  %v1318_v63 = vpop.permute.xlu0 %1317 }
 0x1d2   : > { %v2754_v36 = vadd.f32 %v2626_v24, %v2498_v52  ;;  %v2882_v44 = vmul.f32 %v2626_v24, %v2626_v24  ;;  %v2499_v20 = vadd.f32 %v2371_v22, %v2243_v59  ;;  %v2627_v29 = vmul.f32 %v2371_v22, %v2371_v22 }
 0x1d3   : > { %v3009_v48 = vadd.f32 %v2881_v17, %v2753_v33  ;;  %v2756_v19 = vadd.f32 %v2628_v16, %v2500_v61  ;;  %v2884_v8 = vmul.f32 %v2628_v16, %v2628_v16  ;;  %v2117_v30 = vmul.f32 %v3946_v28, %v3946_v28 }
 0x1d4   : > { %v3010_v60 = vadd.f32 %v2882_v44, %v2754_v36  ;;  %v2755_v2 = vadd.f32 %v2627_v29, %v2499_v20  ;;  %v2883_v47 = vmul.f32 %v2627_v29, %v2627_v29  ;;  %v2118_v45 = vmul.f32 %v3948_v54, %v3948_v54 }
 0x1d5   : > { %3137 = vst [vmem:[%s5158_s18 + $0x178] sm:$0xff] %v3009_v48  ;;  %v3012_v46 = vadd.f32 %v2884_v8, %v2756_v19  ;;  %v2245_v21 = vadd.f32 %v3946_v28, %v2117_v30  ;;  %v2373_v26 = vmul.f32 %v2117_v30, %v2117_v30  ;;  %v2120_v18 = vmul.f32 %v3950_v41, %v3950_v41 }
 0x1d6   : > { %3138 = vst [vmem:[%s5158_s18 + $0x180] sm:$0xff] %v3010_v60  ;;  %v3011_v23 = vadd.f32 %v2883_v47, %v2755_v2  ;;  %v2246_v42 = vadd.f32 %v3948_v54, %v2118_v45  ;;  %v2374_v15 = vmul.f32 %v2118_v45, %v2118_v45  ;;  %3951 = vpow2.f32 %v5447_v4 }
 0x1d7   : > { %3140 = vst [vmem:[%s5158_s18 + $0x190] sm:$0xff] %v3012_v46  ;;  %v2501_v10 = vadd.f32 %v2373_v26, %v2245_v21  ;;  %v2629_v52 = vmul.f32 %v2373_v26, %v2373_v26  ;;  %v2248_v24 = vadd.f32 %v3950_v41, %v2120_v18  ;;  %v2376_v59 = vmul.f32 %v2120_v18, %v2120_v18 }
 0x1d8   : > { %3139 = vst [vmem:[%s5158_s18 + $0x188] sm:$0xff] %v3011_v23  ;;  %v2502_v22 = vadd.f32 %v2374_v15, %v2246_v42  ;;  %v2630_v33 = vmul.f32 %v2374_v15, %v2374_v15  ;;  %v1609_v28 = vadd.f32 %v5445_v40, %v5272_v27  ;;  %v1482_v17 = vadd.f32 %v5994_v7, %v1318_v63  ;;  %v1323_v27 = vpop.permute.xlu1 %1322  ;;  %v5997_v15 = vld [vmem:[#allocation33_spill] sm:$0xff] }
 0x1d9   : > { %v2757_v61 = vadd.f32 %v2629_v52, %v2501_v10  ;;  %v2885_v16 = vmul.f32 %v2629_v52, %v2629_v52  ;;  %v2504_v54 = vadd.f32 %v2376_v59, %v2248_v24  ;;  %v2632_v36 = vmul.f32 %v2376_v59, %v2376_v59  ;;  %v5998_v24 = vld [vmem:[#allocation34_spill] sm:$0xff] }
 0x1da   : > { %v2758_v4 = vadd.f32 %v2630_v33, %v2502_v22  ;;  %v2886_v44 = vmul.f32 %v2630_v33, %v2630_v33  ;;  %v1737_v20 = vmin.f32 %v1609_v28, 0.0  ;;  %v1610_v41 = vadd.f32 %v1482_v17, %v5276_v25 }
 0x1db   : > { %v3013_v29 = vadd.f32 %v2885_v16, %v2757_v61  ;;  %v2760_v48 = vadd.f32 %v2632_v36, %v2504_v54  ;;  %v2888_v19 = vmul.f32 %v2632_v36, %v2632_v36  ;;  %v1484_v8 = vadd.f32 %v5995_v57, %v1318_v63  ;;  %v5999_v54 = vld [vmem:[#allocation35_spill] sm:$0xff] }
 0x1dc   : > { %v3014_v40 = vadd.f32 %v2886_v44, %v2758_v4  ;;  %v1920_v30 = vmul.f32 1.442695, %v1737_v20  ;;  %v1738_v60 = vmin.f32 %v1610_v41, 0.0  ;;  %v1483_v2 = vadd.f32 %v5996_v37, %v1318_v63  ;;  %v5487_v44 = vpop.f32.mrb[45].mxu1 }
 0x1dd   : > { %3141 = vst [vmem:[%s5158_s18 + $0x198] sm:$0xff] %v3013_v29  ;;  %v3016_v47 = vadd.f32 %v2888_v19, %v2760_v48  ;;  %v1612_v45 = vadd.f32 %v1484_v8, %v5278_v55  ;;  %v1485_v46 = vadd.f32 %v5993_v9, %v1318_v63  ;;  %v1486_v25 = vadd.f32 %v5994_v7, %v1323_v27  ;;  %v1328_v48 = vpop.permute.xlu0 %1327 }
 0x1de   : > { %3142 = vst [vmem:[%s5158_s18 + $0x1a0] sm:$0xff] %v3014_v40  ;;  %3953 = vpow2.f32 %v1920_v30  ;;  %v1922_v21 = vmul.f32 1.442695, %v1738_v60  ;;  %v1611_v26 = vadd.f32 %v1483_v2, %v5280_v43  ;;  %v1488_v18 = vadd.f32 %v5995_v57, %v1323_v27  ;;  %v5489_v2 = vpop.f32.mrb[46].mxu0 }
 0x1df   : > { %3144 = vst [vmem:[%s5158_s18 + $0x1b0] sm:$0xff] %v3016_v47  ;;  %v1740_v23 = vmin.f32 %v1612_v45, 0.0  ;;  %v1613_v42 = vadd.f32 %v1485_v46, %v5282_v49  ;;  %v1614_v10 = vadd.f32 %v1486_v25, %v5997_v15  ;;  %v1487_v52 = vadd.f32 %v5996_v37, %v1323_v27  ;;  %v6000_v49 = vld [vmem:[#allocation36_spill] sm:$0xff]  ;;  %v5491_v47 = vpop.f32.mrb[46].mxu1  ;;  %v6001_v15 = vld [vmem:[#allocation37_spill] sm:$0xff] }
 0x1e0   : > { %v3952_v55 = vpop.eup %3951  ;;  %3955 = vpow2.f32 %v1922_v21  ;;  %v1739_v63 = vmin.f32 %v1611_v26, 0.0  ;;  %v1616_v59 = vadd.f32 %v1488_v18, %v5998_v24  ;;  %v1489_v22 = vadd.f32 %v5993_v9, %v1323_v27  ;;  %v5500_v24 = vpop.f32.mrb[47].mxu1 }
 0x1e1   : > { %v2119_v33 = vmul.f32 %v3952_v55, %v3952_v55  ;;  %v1926_v28 = vmul.f32 1.442695, %v1740_v23  ;;  %v1741_v43 = vmin.f32 %v1613_v42, 0.0  ;;  %v1742_v17 = vmin.f32 %v1614_v10, 0.0  ;;  %v5495_v23 = vpop.f32.mrb[47].mxu0  ;;  %6003 = vst [vmem:[#allocation11_spill] sm:$0xff] %v5500_v24 }
 0x1e2   : > { %v1924_v61 = vmul.f32 1.442695, %v1739_v63  ;;  %v1744_v16 = vmin.f32 %v1616_v59, 0.0  ;;  %v1615_v36 = vadd.f32 %v1487_v52, %v5999_v54  ;;  %v1617_v4 = vadd.f32 %v1489_v22, %v6000_v49  ;;  %v6002_v52 = vld [vmem:[#allocation38_spill] sm:$0xff]  ;;  %v5502_v59 = vpop.permute.xlu1 %1332 }
 0x1e3   : > { %v2247_v20 = vadd.f32 %v3952_v55, %v2119_v33  ;;  %v2375_v41 = vmul.f32 %v2119_v33, %v2119_v33  ;;  %3957 = vpow2.f32 %v1926_v28  ;;  %v1928_v29 = vmul.f32 1.442695, %v1741_v43 }
 0x1e4   : > { %3959 = vpow2.f32 %v1924_v61  ;;  %v1930_v19 = vmul.f32 1.442695, %v1742_v17  ;;  %v1934_v8 = vmul.f32 1.442695, %v1744_v16  ;;  %v1743_v27 = vmin.f32 %v1615_v36, 0.0  ;;  %v6004_v16 = vld [vmem:[#allocation39_spill] sm:$0xff] }
 0x1e5   : > { %v2503_v40 = vadd.f32 %v2375_v41, %v2247_v20  ;;  %v2631_v30 = vmul.f32 %v2375_v41, %v2375_v41  ;;  %3961 = vpow2.f32 %v1928_v29  ;;  %v1745_v60 = vmin.f32 %v1617_v4, 0.0  ;;  %v6005_v41 = vld [vmem:[#allocation40_spill] sm:$0xff] }
 0x1e6   : > { %3963 = vpow2.f32 %v1930_v19  ;;  %v1932_v45 = vmul.f32 1.442695, %v1743_v27  ;;  %v1490_v46 = vadd.f32 %v5994_v7, %v1328_v48  ;;  %v1492_v25 = vadd.f32 %v5995_v57, %v1328_v48 }
 0x1e7   : > { %v2759_v21 = vadd.f32 %v2631_v30, %v2503_v40  ;;  %v2887_v26 = vmul.f32 %v2631_v30, %v2631_v30  ;;  %3965 = vpow2.f32 %v1934_v8  ;;  %v1936_v18 = vmul.f32 1.442695, %v1745_v60  ;;  %v5517_v30 = vpop.f32.mrb[48].mxu0 }
 0x1e8   : > { %v3954_v42 = vpop.eup %3953  ;;  %3967 = vpow2.f32 %v1932_v45  ;;  %v1618_v10 = vadd.f32 %v1490_v46, %v6001_v15  ;;  %v1620_v55 = vadd.f32 %v1492_v25, %v6002_v52  ;;  %v1491_v63 = vadd.f32 %v5996_v37, %v1328_v48  ;;  %6007 = vst [vmem:[#allocation29_spill] sm:$0xff] %v5517_v30 }
 0x1e9   : > { %v3015_v22 = vadd.f32 %v2887_v26, %v2759_v21  ;;  %v2121_v33 = vmul.f32 %v3954_v42, %v3954_v42  ;;  %3969 = vpow2.f32 %v1936_v18  ;;  %v1493_v28 = vadd.f32 %v5993_v9, %v1328_v48  ;;  %v6006_v48 = vld [vmem:[#allocation41_spill] sm:$0xff] }
 0x1ea   : > { %v3956_v43 = vpop.eup %3955  ;;  %v1746_v17 = vmin.f32 %v1618_v10, 0.0  ;;  %v1748_v61 = vmin.f32 %v1620_v55, 0.0  ;;  %v1619_v54 = vadd.f32 %v1491_v63, %v6004_v16  ;;  %v1494_v36 = vadd.f32 %v5994_v7, %v5502_v59  ;;  %v5522_v10 = vpop.f32.mrb[48].mxu1 }
 0x1eb   : > { %3143 = vst [vmem:[%s5158_s18 + $0x1a8] sm:$0xff] %v3015_v22  ;;  %v2249_v49 = vadd.f32 %v3954_v42, %v2121_v33  ;;  %v2377_v4 = vmul.f32 %v2121_v33, %v2121_v33  ;;  %v2122_v20 = vmul.f32 %v3956_v43, %v3956_v43  ;;  %v5510_v29 = vadd.f32 %v1493_v28, %v6005_v41 }
 0x1ec   : > { %v1938_v19 = vmul.f32 1.442695, %v1746_v17  ;;  %v5512_v8 = vmul.f32 1.442695, %v1748_v61  ;;  %v1747_v27 = vmin.f32 %v1619_v54, 0.0  ;;  %v5515_v40 = vadd.f32 %v1494_v36, %v6006_v48  ;;  %6008 = vst [vmem:[#allocation12_spill] sm:$0xff] %v5522_v10 }
 0x1ed   : > { %v3958_v60 = vpop.eup %3957  ;;  %v2505_v45 = vadd.f32 %v2377_v4, %v2249_v49  ;;  %v2633_v46 = vmul.f32 %v2377_v4, %v2377_v4  ;;  %v2250_v25 = vadd.f32 %v3956_v43, %v2122_v20  ;;  %v2378_v21 = vmul.f32 %v2122_v20, %v2122_v20  ;;  %v5524_v54 = vpop.f32.mrb[49].mxu0 }
 0x1ee   : > { %v3960_v26 = vpop.eup %3959  ;;  %v2124_v18 = vmul.f32 %v3958_v60, %v3958_v60  ;;  %3971 = vpow2.f32 %v1938_v19  ;;  %v5519_v42 = vmul.f32 1.442695, %v1747_v27  ;;  %6009 = vst [vmem:[#allocation30_spill] sm:$0xff] %v5524_v54 }
 0x1ef   : > { %v3962_v52 = vpop.eup %3961  ;;  %v2761_v55 = vadd.f32 %v2633_v46, %v2505_v45  ;;  %v2889_v63 = vmul.f32 %v2633_v46, %v2633_v46  ;;  %v2506_v22 = vadd.f32 %v2378_v21, %v2250_v25  ;;  %v2634_v33 = vmul.f32 %v2378_v21, %v2378_v21  ;;  %v5526_v25 = vpop.f32.mrb[49].mxu1 }
 0x1f0   : > { %v3964_v28 = vpop.eup %3963  ;;  %v2252_v17 = vadd.f32 %v3958_v60, %v2124_v18  ;;  %v2380_v61 = vmul.f32 %v2124_v18, %v2124_v18  ;;  %v2123_v43 = vmul.f32 %v3960_v26, %v3960_v26  ;;  %v2125_v16 = vmul.f32 %v3962_v52, %v3962_v52  ;;  %6010 = vst [vmem:[#allocation13_spill] sm:$0xff] %v5526_v25 }
 0x1f1   : > { %v3966_v36 = vpop.eup %3965  ;;  %v3017_v49 = vadd.f32 %v2889_v63, %v2761_v55  ;;  %v2762_v4 = vadd.f32 %v2634_v33, %v2506_v22  ;;  %v2890_v20 = vmul.f32 %v2634_v33, %v2634_v33  ;;  %v2126_v41 = vmul.f32 %v3964_v28, %v3964_v28 }
 0x1f2   : > { %v3968_v19 = vpop.eup %3967  ;;  %v2508_v27 = vadd.f32 %v2380_v61, %v2252_v17  ;;  %v2636_v48 = vmul.f32 %v2380_v61, %v2380_v61  ;;  %v2251_v45 = vadd.f32 %v3960_v26, %v2123_v43  ;;  %v2379_v46 = vmul.f32 %v2123_v43, %v2123_v43  ;;  %v5530_v26 = vpop.f32.mrb[50].mxu0 }
 0x1f3   : > { %v3970_v60 = vpop.eup %3969  ;;  %3145 = vst [vmem:[%s5158_s18 + $0x1b8] sm:$0xff] %v3017_v49  ;;  %v3018_v21 = vadd.f32 %v2890_v20, %v2762_v4  ;;  %v2253_v18 = vadd.f32 %v3962_v52, %v2125_v16  ;;  %v2381_v15 = vmul.f32 %v2125_v16, %v2125_v16  ;;  %v2254_v10 = vadd.f32 %v3964_v28, %v2126_v41 }
 0x1f4   : > { %v2764_v54 = vadd.f32 %v2636_v48, %v2508_v27  ;;  %v2892_v30 = vmul.f32 %v2636_v48, %v2636_v48  ;;  %v2507_v55 = vadd.f32 %v2379_v46, %v2251_v45  ;;  %v2635_v63 = vmul.f32 %v2379_v46, %v2379_v46 }
 0x1f5   : > { %3146 = vst [vmem:[%s5158_s18 + $0x1c0] sm:$0xff] %v3018_v21  ;;  %v2509_v22 = vadd.f32 %v2381_v15, %v2253_v18  ;;  %v2637_v33 = vmul.f32 %v2381_v15, %v2381_v15  ;;  %v2382_v17 = vmul.f32 %v2126_v41, %v2126_v41  ;;  %v2128_v61 = vmul.f32 %v3966_v36, %v3966_v36 }
 0x1f6   : > { %v3020_v43 = vadd.f32 %v2892_v30, %v2764_v54  ;;  %v2763_v25 = vadd.f32 %v2635_v63, %v2507_v55  ;;  %v2891_v24 = vmul.f32 %v2635_v63, %v2635_v63  ;;  %v2127_v49 = vmul.f32 %v3968_v19, %v3968_v19 }
 0x1f7   : > { %v2765_v52 = vadd.f32 %v2637_v33, %v2509_v22  ;;  %v2893_v16 = vmul.f32 %v2637_v33, %v2637_v33  ;;  %v2510_v28 = vadd.f32 %v2382_v17, %v2254_v10  ;;  %v2638_v4 = vmul.f32 %v2382_v17, %v2382_v17 }
 0x1f8   : > { %v3972_v20 = vpop.eup %3971  ;;  %3148 = vst [vmem:[%s5158_s18 + $0x1d0] sm:$0xff] %v3020_v43  ;;  %v3019_v27 = vadd.f32 %v2891_v24, %v2763_v25  ;;  %v2256_v48 = vadd.f32 %v3966_v36, %v2128_v61  ;;  %v2384_v45 = vmul.f32 %v2128_v61, %v2128_v61  ;;  %v2255_v15 = vadd.f32 %v3968_v19, %v2127_v49  ;;  %v5536_v24 = vpop.f32.mrb[50].mxu1 }
 0x1f9   : > { %v3021_v41 = vadd.f32 %v2893_v16, %v2765_v52  ;;  %v2766_v46 = vadd.f32 %v2638_v4, %v2510_v28  ;;  %v2894_v21 = vmul.f32 %v2638_v4, %v2638_v4  ;;  %v2383_v18 = vmul.f32 %v2127_v49, %v2127_v49  ;;  %v5538_v61 = vpop.f32.mrb[51].mxu0 }
 0x1fa   : > { %3147 = vst [vmem:[%s5158_s18 + $0x1c8] sm:$0xff] %v3019_v27  ;;  %v2512_v30 = vadd.f32 %v2384_v45, %v2256_v48  ;;  %v2640_v54 = vmul.f32 %v2384_v45, %v2384_v45  ;;  %v2129_v55 = vmul.f32 %v3970_v60, %v3970_v60  ;;  %v2130_v63 = vmul.f32 %v3972_v20, %v3972_v20 }
 0x1fb   : > { %3149 = vst [vmem:[%s5158_s18 + $0x1d8] sm:$0xff] %v3021_v41  ;;  %v3022_v10 = vadd.f32 %v2894_v21, %v2766_v46  ;;  %v2511_v22 = vadd.f32 %v2383_v18, %v2255_v15  ;;  %v2639_v33 = vmul.f32 %v2383_v18, %v2383_v18  ;;  %3973 = vpow2.f32 %v5512_v8  ;;  %v5544_v41 = vpop.f32.mrb[51].mxu1 }
 0x1fc   : > { %v2768_v36 = vadd.f32 %v2640_v54, %v2512_v30  ;;  %v2896_v19 = vmul.f32 %v2640_v54, %v2640_v54  ;;  %v2257_v25 = vadd.f32 %v3970_v60, %v2129_v55  ;;  %v2385_v17 = vmul.f32 %v2129_v55, %v2129_v55 }
 0x1fd   : > { %3150 = vst [vmem:[%s5158_s18 + $0x1e0] sm:$0xff] %v3022_v10  ;;  %v2767_v43 = vadd.f32 %v2639_v33, %v2511_v22  ;;  %v2895_v49 = vmul.f32 %v2639_v33, %v2639_v33  ;;  %v2258_v52 = vadd.f32 %v3972_v20, %v2130_v63  ;;  %v2386_v16 = vmul.f32 %v2130_v63, %v2130_v63  ;;  %v6012_v10 = vld [vmem:[#allocation42_spill] sm:$0xff]  ;;  %v5556_v33 = vpop.f32.mrb[52].mxu0 }
 0x1fe   : > { %v3024_v28 = vadd.f32 %v2896_v19, %v2768_v36  ;;  %v2513_v4 = vadd.f32 %v2385_v17, %v2257_v25  ;;  %v2641_v27 = vmul.f32 %v2385_v17, %v2385_v17  ;;  %3975 = vpow2.f32 %v5519_v42 }
 0x1ff   : > { %v3023_v8 = vadd.f32 %v2895_v49, %v2767_v43  ;;  %v2514_v48 = vadd.f32 %v2386_v16, %v2258_v52  ;;  %v2642_v45 = vmul.f32 %v2386_v16, %v2386_v16  ;;  %v6011_v60 = vmin.f32 %v5510_v29, 0.0  ;;  %v1338_v29 = vpop.permute.xlu0 %1337  ;;  %v5564_v16 = vpop.f32.mrb[52].mxu1 }
 0x200   : > { %3152 = vst [vmem:[%s5158_s18 + $0x1f0] sm:$0xff] %v3024_v28  ;;  %v2769_v46 = vadd.f32 %v2641_v27, %v2513_v4  ;;  %v2897_v21 = vmul.f32 %v2641_v27, %v2641_v27  ;;  %v1750_v20 = vmin.f32 %v5515_v40, 0.0  ;;  %v1496_v18 = vadd.f32 %v5995_v57, %v5502_v59 }
 0x201   : > { %v1944_v15 = vmul.f32 1.442695, %v6011_v60  ;;  %3151 = vst [vmem:[%s5158_s18 + $0x1e8] sm:$0xff] %v3023_v8  ;;  %v2770_v30 = vadd.f32 %v2642_v45, %v2514_v48  ;;  %v2898_v42 = vmul.f32 %v2642_v45, %v2642_v45  ;;  %v1495_v54 = vadd.f32 %v5996_v37, %v5502_v59 }
 0x202   : > { %v3025_v55 = vadd.f32 %v2897_v21, %v2769_v46  ;;  %v1946_v63 = vmul.f32 1.442695, %v1750_v20  ;;  %v1624_v22 = vadd.f32 %v1496_v18, %v6012_v10  ;;  %v1497_v40 = vadd.f32 %v5993_v9, %v5502_v59 }
 0x203   : > { %3977 = vpow2.f32 %v1944_v15  ;;  %v3026_v36 = vadd.f32 %v2898_v42, %v2770_v30  ;;  %v1623_v19 = vadd.f32 %v1495_v54, %v5319_v0  ;;  %v1498_v25 = vadd.f32 %v5994_v7, %v1338_v29 }
 0x204   : > { %v1500_v17 = vadd.f32 %v5995_v57, %v1338_v29  ;;  %3153 = vst [vmem:[%s5158_s18 + $0x1f8] sm:$0xff] %v3025_v55  ;;  %3979 = vpow2.f32 %v1946_v63  ;;  %v1752_v43 = vmin.f32 %v1624_v22, 0.0  ;;  %v1625_v49 = vadd.f32 %v1497_v40, %v5324_v3 }
 0x205   : > { %v1499_v52 = vadd.f32 %v5996_v37, %v1338_v29  ;;  %v3974_v28 = vpop.eup %3973  ;;  %3154 = vst [vmem:[%s5158_s18 + $0x200] sm:$0xff] %v3026_v36  ;;  %v1751_v59 = vmin.f32 %v1623_v19, 0.0  ;;  %v1626_v4 = vadd.f32 %v1498_v25, %v5336_v31  ;;  %v1501_v27 = vadd.f32 %v5993_v9, %v1338_v29  ;;  %v5572_v25 = vpop.permute.xlu1 %1342 }
 0x206   : > { %v1628_v0 = vadd.f32 %v1500_v17, %v5341_v14  ;;  %v2132_v8 = vmul.f32 %v3974_v28, %v3974_v28  ;;  %v1950_v48 = vmul.f32 1.442695, %v1752_v43  ;;  %v1753_v45 = vmin.f32 %v1625_v49, 0.0 }
 0x207   : > { %v1627_v60 = vadd.f32 %v1499_v52, %v5345_v62  ;;  %v1948_v15 = vmul.f32 1.442695, %v1751_v59  ;;  %v1754_v3 = vmin.f32 %v1626_v4, 0.0  ;;  %v1629_v21 = vadd.f32 %v1501_v27, %v5347_v34 }
 0x208   : > { %v1756_v46 = vmin.f32 %v1628_v0, 0.0  ;;  %v3976_v20 = vpop.eup %3975  ;;  %v2260_v18 = vadd.f32 %v3974_v28, %v2132_v8  ;;  %v2388_v30 = vmul.f32 %v2132_v8, %v2132_v8  ;;  %3981 = vpow2.f32 %v1950_v48 }
 0x209   : > { %v1952_v42 = vmul.f32 1.442695, %v1753_v45  ;;  %v2131_v31 = vmul.f32 %v3976_v20, %v3976_v20  ;;  %3983 = vpow2.f32 %v1948_v15  ;;  %v1954_v14 = vmul.f32 1.442695, %v1754_v3 }
 0x20a   : > { %v1958_v54 = vmul.f32 1.442695, %v1756_v46  ;;  %v2516_v29 = vadd.f32 %v2388_v30, %v2260_v18  ;;  %v2644_v55 = vmul.f32 %v2388_v30, %v2388_v30  ;;  %v1755_v63 = vmin.f32 %v1627_v60, 0.0  ;;  %v5580_v30 = vpop.f32.mrb[53].mxu0 }
 0x20b   : > { %3985 = vpow2.f32 %v1952_v42  ;;  %v2259_v62 = vadd.f32 %v3976_v20, %v2131_v31  ;;  %v2387_v22 = vmul.f32 %v2131_v31, %v2131_v31  ;;  %v1757_v40 = vmin.f32 %v1629_v21, 0.0 }
 0x20c   : > { %3987 = vpow2.f32 %v1954_v14  ;;  %v2772_v36 = vadd.f32 %v2644_v55, %v2516_v29  ;;  %v2900_v34 = vmul.f32 %v2644_v55, %v2644_v55  ;;  %v1956_v49 = vmul.f32 1.442695, %v1755_v63  ;;  %v5584_v55 = vpop.f32.mrb[53].mxu1 }
 0x20d   : > { %v3978_v10 = vpop.eup %3977  ;;  %3989 = vpow2.f32 %v1958_v54  ;;  %v2515_v17 = vadd.f32 %v2387_v22, %v2259_v62  ;;  %v2643_v43 = vmul.f32 %v2387_v22, %v2387_v22  ;;  %v1960_v52 = vmul.f32 1.442695, %v1757_v40 }
 0x20e   : > { %v2133_v19 = vmul.f32 %v3978_v10, %v3978_v10  ;;  %v3980_v28 = vpop.eup %3979  ;;  %v3028_v59 = vadd.f32 %v2900_v34, %v2772_v36  ;;  %v1502_v27 = vadd.f32 %v5994_v7, %v5572_v25  ;;  %3991 = vpow2.f32 %v1956_v49 }
 0x20f   : > { %v2771_v8 = vadd.f32 %v2643_v43, %v2515_v17  ;;  %v2899_v48 = vmul.f32 %v2643_v43, %v2643_v43  ;;  %v2134_v45 = vmul.f32 %v3980_v28, %v3980_v28  ;;  %3993 = vpow2.f32 %v1960_v52  ;;  %v5593_v43 = vpop.f32.mrb[54].mxu0 }
 0x210   : > { %v2261_v4 = vadd.f32 %v3978_v10, %v2133_v19  ;;  %v2389_v0 = vmul.f32 %v2133_v19, %v2133_v19  ;;  %3156 = vst [vmem:[%s5158_s18 + $0x210] sm:$0xff] %v3028_v59  ;;  %v1630_v3 = vadd.f32 %v1502_v27, %v5360_v56  ;;  %v1504_v18 = vadd.f32 %v5995_v57, %v5572_v25 }
 0x211   : > { %v3027_v46 = vadd.f32 %v2899_v48, %v2771_v8  ;;  %v2262_v21 = vadd.f32 %v3980_v28, %v2134_v45  ;;  %v2390_v20 = vmul.f32 %v2134_v45, %v2134_v45  ;;  %v1503_v29 = vadd.f32 %v5996_v37, %v5572_v25 }
 0x212   : > { %v2517_v60 = vadd.f32 %v2389_v0, %v2261_v4  ;;  %v2645_v15 = vmul.f32 %v2389_v0, %v2389_v0  ;;  %v3982_v42 = vpop.eup %3981  ;;  %v1758_v54 = vmin.f32 %v1630_v3, 0.0  ;;  %v5588_v22 = vadd.f32 %v1504_v18, %v5374_v1  ;;  %v5595_v0 = vpop.f32.mrb[54].mxu1 }
 0x213   : > { %v3984_v63 = vpop.eup %3983  ;;  %3155 = vst [vmem:[%s5158_s18 + $0x208] sm:$0xff] %v3027_v46  ;;  %v2518_v56 = vadd.f32 %v2390_v20, %v2262_v21  ;;  %v2646_v10 = vmul.f32 %v2390_v20, %v2390_v20  ;;  %v2136_v62 = vmul.f32 %v3982_v42, %v3982_v42  ;;  %v5591_v17 = vadd.f32 %v1503_v29, %v5377_v12 }
 0x214   : > { %v2773_v31 = vadd.f32 %v2645_v15, %v2517_v60  ;;  %v2901_v14 = vmul.f32 %v2645_v15, %v2645_v15  ;;  %v2135_v34 = vmul.f32 %v3984_v63, %v3984_v63  ;;  %v1962_v19 = vmul.f32 1.442695, %v1758_v54 }
 0x215   : > { %v3986_v40 = vpop.eup %3985  ;;  %v2774_v52 = vadd.f32 %v2646_v10, %v2518_v56  ;;  %v2902_v28 = vmul.f32 %v2646_v10, %v2646_v10  ;;  %v2264_v59 = vadd.f32 %v3982_v42, %v2136_v62  ;;  %v2392_v4 = vmul.f32 %v2136_v62, %v2136_v62  ;;  %v5599_v56 = vpop.f32.mrb[55].mxu0 }
 0x216   : > { %v3029_v36 = vadd.f32 %v2901_v14, %v2773_v31  ;;  %v3988_v49 = vpop.eup %3987  ;;  %v2263_v1 = vadd.f32 %v3984_v63, %v2135_v34  ;;  %v2391_v8 = vmul.f32 %v2135_v34, %v2135_v34  ;;  %v2137_v48 = vmul.f32 %v3986_v40, %v3986_v40 }
 0x217   : > { %v3990_v27 = vpop.eup %3989  ;;  %v2138_v45 = vmul.f32 %v3988_v49, %v3988_v49  ;;  %v3030_v60 = vadd.f32 %v2902_v28, %v2774_v52  ;;  %v2520_v15 = vadd.f32 %v2392_v4, %v2264_v59  ;;  %v2648_v12 = vmul.f32 %v2392_v4, %v2392_v4  ;;  %v5601_v52 = vpop.f32.mrb[55].mxu1 }
 0x218   : > { %3157 = vst [vmem:[%s5158_s18 + $0x218] sm:$0xff] %v3029_v36  ;;  %v2140_v3 = vmul.f32 %v3990_v27, %v3990_v27  ;;  %v2519_v46 = vadd.f32 %v2391_v8, %v2263_v1  ;;  %v2647_v21 = vmul.f32 %v2391_v8, %v2391_v8  ;;  %v2265_v20 = vadd.f32 %v3986_v40, %v2137_v48  ;;  %v3992_v31 = vpop.eup %3991 }
 0x219   : > { %v2393_v18 = vmul.f32 %v2137_v48, %v2137_v48  ;;  %3158 = vst [vmem:[%s5158_s18 + $0x220] sm:$0xff] %v3030_v60  ;;  %v2776_v42 = vadd.f32 %v2648_v12, %v2520_v15  ;;  %v2904_v14 = vmul.f32 %v2648_v12, %v2648_v12  ;;  %v2266_v54 = vadd.f32 %v3988_v49, %v2138_v45  ;;  %v3994_v63 = vpop.eup %3993 }
 0x21a   : > { %v2394_v29 = vmul.f32 %v2138_v45, %v2138_v45  ;;  %v2775_v10 = vadd.f32 %v2647_v21, %v2519_v46  ;;  %v2903_v62 = vmul.f32 %v2647_v21, %v2647_v21  ;;  %v2268_v4 = vadd.f32 %v3990_v27, %v2140_v3  ;;  %v5603_v45 = vpop.f32.mrb[56].mxu0 }
 0x21b   : > { %v2521_v36 = vadd.f32 %v2393_v18, %v2265_v20  ;;  %v2649_v34 = vmul.f32 %v2393_v18, %v2393_v18  ;;  %v3032_v28 = vadd.f32 %v2904_v14, %v2776_v42  ;;  %v2396_v49 = vmul.f32 %v2140_v3, %v2140_v3 }
 0x21c   : > { %v2522_v40 = vadd.f32 %v2394_v29, %v2266_v54  ;;  %v2650_v59 = vmul.f32 %v2394_v29, %v2394_v29  ;;  %v3031_v1 = vadd.f32 %v2903_v62, %v2775_v10  ;;  %v2139_v12 = vmul.f32 %v3992_v31, %v3992_v31 }
 0x21d   : > { %v2777_v8 = vadd.f32 %v2649_v34, %v2521_v36  ;;  %v2905_v48 = vmul.f32 %v2649_v34, %v2649_v34  ;;  %3160 = vst [vmem:[%s5158_s18 + $0x230] sm:$0xff] %v3032_v28  ;;  %v2141_v46 = vmul.f32 %v3994_v63, %v3994_v63  ;;  %v2524_v20 = vadd.f32 %v2396_v49, %v2268_v4 }
 0x21e   : > { %v2778_v60 = vadd.f32 %v2650_v59, %v2522_v40  ;;  %v2906_v15 = vmul.f32 %v2650_v59, %v2650_v59  ;;  %3159 = vst [vmem:[%s5158_s18 + $0x228] sm:$0xff] %v3031_v1  ;;  %v2652_v18 = vmul.f32 %v2396_v49, %v2396_v49  ;;  %3995 = vpow2.f32 %v1962_v19 }
 0x21f   : > { %v3033_v21 = vadd.f32 %v2905_v48, %v2777_v8  ;;  %v2267_v27 = vadd.f32 %v3992_v31, %v2139_v12  ;;  %v2395_v14 = vmul.f32 %v2139_v12, %v2139_v12  ;;  %v2269_v54 = vadd.f32 %v3994_v63, %v2141_v46  ;;  %v1348_v63 = vpop.permute.xlu0 %1347 }
 0x220   : > { %v3034_v42 = vadd.f32 %v2906_v15, %v2778_v60  ;;  %v2780_v3 = vadd.f32 %v2652_v18, %v2524_v20  ;;  %v2908_v29 = vmul.f32 %v2652_v18, %v2652_v18  ;;  %v2397_v10 = vmul.f32 %v2141_v46, %v2141_v46  ;;  %v1353_v46 = vpop.permute.xlu1 %1352 }
 0x221   : > { %3161 = vst [vmem:[%s5158_s18 + $0x238] sm:$0xff] %v3033_v21  ;;  %v1760_v62 = vmin.f32 %v5588_v22, 0.0  ;;  %v2523_v36 = vadd.f32 %v2395_v14, %v2267_v27  ;;  %v2651_v34 = vmul.f32 %v2395_v14, %v2395_v14  ;;  %v1759_v28 = vmin.f32 %v5591_v17, 0.0 }
 0x222   : > { %3162 = vst [vmem:[%s5158_s18 + $0x240] sm:$0xff] %v3034_v42  ;;  %v1505_v40 = vadd.f32 %v5993_v9, %v5572_v25  ;;  %v3036_v19 = vadd.f32 %v2908_v29, %v2780_v3  ;;  %v2525_v59 = vadd.f32 %v2397_v10, %v2269_v54  ;;  %v2653_v31 = vmul.f32 %v2397_v10, %v2397_v10 }
 0x223   : > { %v1966_v4 = vmul.f32 1.442695, %v1760_v62  ;;  %v2779_v1 = vadd.f32 %v2651_v34, %v2523_v36  ;;  %v2907_v8 = vmul.f32 %v2651_v34, %v2651_v34  ;;  %v1964_v48 = vmul.f32 1.442695, %v1759_v28  ;;  %v5628_v36 = vpop.f32.mrb[56].mxu1 }
 0x224   : > { %v1633_v49 = vadd.f32 %v1505_v40, %v5379_v53  ;;  %3164 = vst [vmem:[%s5158_s18 + $0x250] sm:$0xff] %v3036_v19  ;;  %v2781_v22 = vadd.f32 %v2653_v31, %v2525_v59  ;;  %v2909_v60 = vmul.f32 %v2653_v31, %v2653_v31  ;;  %v1506_v17 = vadd.f32 %v5994_v7, %v1348_v63 }
 0x225   : > { %3997 = vpow2.f32 %v1966_v4  ;;  %v3035_v15 = vadd.f32 %v2907_v8, %v2779_v1  ;;  %v1508_v12 = vadd.f32 %v5995_v57, %v1348_v63  ;;  %v1507_v18 = vadd.f32 %v5996_v37, %v1348_v63 }
 0x226   : > { %3999 = vpow2.f32 %v1964_v48  ;;  %v1761_v25 = vmin.f32 %v1633_v49, 0.0  ;;  %v3037_v21 = vadd.f32 %v2909_v60, %v2781_v22  ;;  %v1634_v20 = vadd.f32 %v1506_v17, %v5399_v35 }
 0x227   : > { %v1509_v53 = vadd.f32 %v5993_v9, %v1348_v63  ;;  %3163 = vst [vmem:[%s5158_s18 + $0x248] sm:$0xff] %v3035_v15  ;;  %v1636_v27 = vadd.f32 %v1508_v12, %v5414_v39  ;;  %v1510_v14 = vadd.f32 %v5994_v7, %v1353_v46  ;;  %v1512_v54 = vadd.f32 %v5995_v57, %v1353_v46 }
 0x228   : > { %v1968_v42 = vmul.f32 1.442695, %v1761_v25  ;;  %v3996_v3 = vpop.eup %3995  ;;  %3165 = vst [vmem:[%s5158_s18 + $0x258] sm:$0xff] %v3037_v21  ;;  %v1762_v29 = vmin.f32 %v1634_v20, 0.0  ;;  %v1635_v10 = vadd.f32 %v1507_v18, %v5420_v5  ;;  %v1511_v35 = vadd.f32 %v5996_v37, %v1353_v46 }
 0x229   : > { %v1637_v62 = vadd.f32 %v1509_v53, %v5422_v6  ;;  %v2142_v34 = vmul.f32 %v3996_v3, %v3996_v3  ;;  %v1764_v28 = vmin.f32 %v1636_v27, 0.0  ;;  %v1638_v39 = vadd.f32 %v1510_v14, %v5431_v50  ;;  %v5635_v27 = vpop.f32.mrb[57].mxu0 }
 0x22a   : > { %4001 = vpow2.f32 %v1968_v42  ;;  %v1970_v40 = vmul.f32 1.442695, %v1762_v29  ;;  %v1763_v19 = vmin.f32 %v1635_v10, 0.0  ;;  %v1640_v31 = vadd.f32 %v1512_v54, %v5435_v38 }
 0x22b   : > { %v1765_v59 = vmin.f32 %v1637_v62, 0.0  ;;  %v2270_v4 = vadd.f32 %v3996_v3, %v2142_v34  ;;  %v2398_v63 = vmul.f32 %v2142_v34, %v2142_v34  ;;  %v1974_v1 = vmul.f32 1.442695, %v1764_v28 }
 0x22c   : > { %v1766_v5 = vmin.f32 %v1638_v39, 0.0  ;;  %4003 = vpow2.f32 %v1970_v40  ;;  %v1972_v6 = vmul.f32 1.442695, %v1763_v19  ;;  %v1768_v48 = vmin.f32 %v1640_v31, 0.0 }
 0x22d   : > { %v1976_v8 = vmul.f32 1.442695, %v1765_v59  ;;  %v2526_v49 = vadd.f32 %v2398_v63, %v2270_v4  ;;  %v2654_v22 = vmul.f32 %v2398_v63, %v2398_v63  ;;  %4005 = vpow2.f32 %v1974_v1 }
 0x22e   : > { %v1978_v60 = vmul.f32 1.442695, %v1766_v5  ;;  %4007 = vpow2.f32 %v1972_v6  ;;  %v1982_v50 = vmul.f32 1.442695, %v1768_v48  ;;  %v1639_v15 = vadd.f32 %v1511_v35, %v5439_v58  ;;  %v5637_v58 = vpop.permute.xlu0 %1357  ;;  %v5639_v35 = vpop.f32.mrb[57].mxu1 }
 0x22f   : > { %v3998_v17 = vpop.eup %3997  ;;  %v1513_v25 = vadd.f32 %v5993_v9, %v1353_v46  ;;  %v2782_v12 = vadd.f32 %v2654_v22, %v2526_v49  ;;  %v2910_v21 = vmul.f32 %v2654_v22, %v2654_v22  ;;  %4009 = vpow2.f32 %v1976_v8  ;;  %v5649_v6 = vpop.f32.mrb[58].mxu0 }
 0x230   : > { %v4000_v38 = vpop.eup %3999  ;;  %v2144_v20 = vmul.f32 %v3998_v17, %v3998_v17  ;;  %4011 = vpow2.f32 %v1978_v60  ;;  %v1767_v53 = vmin.f32 %v1639_v15, 0.0  ;;  %v5646_v40 = vadd.f32 %v5995_v57, %v5637_v58  ;;  %v5651_v8 = vpop.f32.mrb[58].mxu1 }
 0x231   : > { %v2143_v18 = vmul.f32 %v4000_v38, %v4000_v38  ;;  %v1641_v42 = vadd.f32 %v1513_v25, %v5442_v13  ;;  %v3038_v14 = vadd.f32 %v2910_v21, %v2782_v12  ;;  %4013 = vpow2.f32 %v1982_v50 }
 0x232   : > { %v2272_v54 = vadd.f32 %v3998_v17, %v2144_v20  ;;  %v2400_v3 = vmul.f32 %v2144_v20, %v2144_v20  ;;  %v1980_v10 = vmul.f32 1.442695, %v1767_v53  ;;  %v1514_v13 = vadd.f32 %v5994_v7, %v5637_v58  ;;  %v5653_v53 = vpop.f32.mrb[59].mxu0 }
 0x233   : > { %v2271_v46 = vadd.f32 %v4000_v38, %v2143_v18  ;;  %v2399_v29 = vmul.f32 %v2143_v18, %v2143_v18  ;;  %v1769_v62 = vmin.f32 %v1641_v42, 0.0  ;;  %3166 = vst [vmem:[%s5158_s18 + $0x260] sm:$0xff] %v3038_v14 }
 0x234   : > { %v4002_v34 = vpop.eup %4001  ;;  %v2528_v28 = vadd.f32 %v2400_v3, %v2272_v54  ;;  %v2656_v39 = vmul.f32 %v2400_v3, %v2400_v3  ;;  %4015 = vpow2.f32 %v1980_v10  ;;  %v1642_v5 = vadd.f32 %v1514_v13, %v5449_v51 }
 0x235   : > { %v2527_v19 = vadd.f32 %v2399_v29, %v2271_v46  ;;  %v2655_v59 = vmul.f32 %v2399_v29, %v2399_v29  ;;  %v2145_v31 = vmul.f32 %v4002_v34, %v4002_v34  ;;  %v1984_v1 = vmul.f32 1.442695, %v1769_v62 }
 0x236   : > { %v2784_v4 = vadd.f32 %v2656_v39, %v2528_v28  ;;  %v2912_v63 = vmul.f32 %v2656_v39, %v2656_v39  ;;  %v4004_v48 = vpop.eup %4003  ;;  %v1770_v38 = vmin.f32 %v1642_v5, 0.0  ;;  %v5659_v39 = vpop.f32.mrb[59].mxu1 }
 0x237   : > { %v2783_v49 = vadd.f32 %v2655_v59, %v2527_v19  ;;  %v2911_v22 = vmul.f32 %v2655_v59, %v2655_v59  ;;  %v2273_v60 = vadd.f32 %v4002_v34, %v2145_v31  ;;  %v2401_v17 = vmul.f32 %v2145_v31, %v2145_v31  ;;  %v4006_v50 = vpop.eup %4005 }
 0x238   : > { %v3040_v15 = vadd.f32 %v2912_v63, %v2784_v4  ;;  %v2146_v25 = vmul.f32 %v4004_v48, %v4004_v48  ;;  %4017 = vpow2.f32 %v1984_v1  ;;  %v4008_v12 = vpop.eup %4007  ;;  %v2148_v18 = vmul.f32 %v4006_v50, %v4006_v50 }
 0x239   : > { %v3039_v21 = vadd.f32 %v2911_v22, %v2783_v49  ;;  %v2529_v20 = vadd.f32 %v2401_v17, %v2273_v60  ;;  %v2657_v51 = vmul.f32 %v2401_v17, %v2401_v17  ;;  %v4010_v42 = vpop.eup %4009  ;;  %v2147_v3 = vmul.f32 %v4008_v12, %v4008_v12 }
 0x23a   : > { %3168 = vst [vmem:[%s5158_s18 + $0x270] sm:$0xff] %v3040_v15  ;;  %v2274_v14 = vadd.f32 %v4004_v48, %v2146_v25  ;;  %v2402_v54 = vmul.f32 %v2146_v25, %v2146_v25  ;;  %v5656_v46 = vmul.f32 1.442695, %v1770_v38  ;;  %v4012_v29 = vpop.eup %4011  ;;  %v2276_v34 = vadd.f32 %v4006_v50, %v2148_v18  ;;  %v5661_v15 = vpop.f32.mrb[60].mxu0 }
 0x23b   : > { %3167 = vst [vmem:[%s5158_s18 + $0x268] sm:$0xff] %v3039_v21  ;;  %v2785_v10 = vadd.f32 %v2657_v51, %v2529_v20  ;;  %v2913_v62 = vmul.f32 %v2657_v51, %v2657_v51  ;;  %v2404_v28 = vmul.f32 %v2148_v18, %v2148_v18  ;;  %v4014_v13 = vpop.eup %4013  ;;  %v2275_v31 = vadd.f32 %v4008_v12, %v2147_v3  ;;  %v5663_v50 = vpop.f32.mrb[60].mxu1 }
 0x23c   : > { %v2530_v19 = vadd.f32 %v2402_v54, %v2274_v14  ;;  %v2658_v59 = vmul.f32 %v2402_v54, %v2402_v54  ;;  %v2403_v4 = vmul.f32 %v2147_v3, %v2147_v3  ;;  %v2149_v48 = vmul.f32 %v4010_v42, %v4010_v42 }
 0x23d   : > { %v3041_v63 = vadd.f32 %v2913_v62, %v2785_v10  ;;  %v2532_v1 = vadd.f32 %v2404_v28, %v2276_v34  ;;  %v2660_v5 = vmul.f32 %v2404_v28, %v2404_v28  ;;  %v2150_v54 = vmul.f32 %v4012_v29, %v4012_v29  ;;  %v5666_v28 = vpop.f32.mrb[61].mxu0 }
 0x23e   : > { %v2786_v49 = vadd.f32 %v2658_v59, %v2530_v19  ;;  %v2914_v22 = vmul.f32 %v2658_v59, %v2658_v59  ;;  %v2531_v60 = vadd.f32 %v2403_v4, %v2275_v31  ;;  %v2659_v17 = vmul.f32 %v2403_v4, %v2403_v4  ;;  %v4016_v25 = vpop.eup %4015 }
 0x23f   : > { %3169 = vst [vmem:[%s5158_s18 + $0x278] sm:$0xff] %v3041_v63  ;;  %v2788_v38 = vadd.f32 %v2660_v5, %v2532_v1  ;;  %v2916_v21 = vmul.f32 %v2660_v5, %v2660_v5  ;;  %v2277_v20 = vadd.f32 %v4010_v42, %v2149_v48  ;;  %v2405_v12 = vmul.f32 %v2149_v48, %v2149_v48 }
 0x240   : > { %v3042_v51 = vadd.f32 %v2914_v22, %v2786_v49  ;;  %v2787_v18 = vadd.f32 %v2659_v17, %v2531_v60  ;;  %v2915_v14 = vmul.f32 %v2659_v17, %v2659_v17  ;;  %v2152_v34 = vmul.f32 %v4014_v13, %v4014_v13  ;;  %v5670_v49 = vpop.f32.mrb[61].mxu1 }
 0x241   : > { %v3044_v3 = vadd.f32 %v2916_v21, %v2788_v38  ;;  %v2533_v10 = vadd.f32 %v2405_v12, %v2277_v20  ;;  %v2661_v62 = vmul.f32 %v2405_v12, %v2405_v12  ;;  %v2278_v31 = vadd.f32 %v4012_v29, %v2150_v54 }
 0x242   : > { %v4018_v19 = vpop.eup %4017  ;;  %3170 = vst [vmem:[%s5158_s18 + $0x280] sm:$0xff] %v3042_v51  ;;  %v3043_v59 = vadd.f32 %v2915_v14, %v2787_v18  ;;  %v2406_v4 = vmul.f32 %v2150_v54, %v2150_v54  ;;  %v2151_v63 = vmul.f32 %v4016_v25, %v4016_v25  ;;  %v2280_v5 = vadd.f32 %v4014_v13, %v2152_v34 }
 0x243   : > { %3172 = vst [vmem:[%s5158_s18 + $0x290] sm:$0xff] %v3044_v3  ;;  %v2789_v42 = vadd.f32 %v2661_v62, %v2533_v10  ;;  %v2917_v1 = vmul.f32 %v2661_v62, %v2661_v62  ;;  %v2408_v48 = vmul.f32 %v2152_v34, %v2152_v34  ;;  %v2153_v51 = vmul.f32 %v4018_v19, %v4018_v19 }
 0x244   : > { %3171 = vst [vmem:[%s5158_s18 + $0x288] sm:$0xff] %v3043_v59  ;;  %v2534_v22 = vadd.f32 %v2406_v4, %v2278_v31  ;;  %v2662_v60 = vmul.f32 %v2406_v4, %v2406_v4  ;;  %v2279_v17 = vadd.f32 %v4016_v25, %v2151_v63  ;;  %v2407_v38 = vmul.f32 %v2151_v63, %v2151_v63  ;;  %v1363_v25 = vpop.permute.xlu1 %1362 }
 0x245   : > { %v3045_v21 = vadd.f32 %v2917_v1, %v2789_v42  ;;  %v2536_v20 = vadd.f32 %v2408_v48, %v2280_v5  ;;  %v2664_v12 = vmul.f32 %v2408_v48, %v2408_v48  ;;  %v2281_v10 = vadd.f32 %v4018_v19, %v2153_v51 }
 0x246   : > { %v2790_v29 = vadd.f32 %v2662_v60, %v2534_v22  ;;  %v2918_v18 = vmul.f32 %v2662_v60, %v2662_v60  ;;  %v2535_v14 = vadd.f32 %v2407_v38, %v2279_v17  ;;  %v2663_v54 = vmul.f32 %v2407_v38, %v2407_v38 }
 0x247   : > { %3173 = vst [vmem:[%s5158_s18 + $0x298] sm:$0xff] %v3045_v21  ;;  %v2792_v13 = vadd.f32 %v2664_v12, %v2536_v20  ;;  %v2920_v3 = vmul.f32 %v2664_v12, %v2664_v12  ;;  %v2409_v62 = vmul.f32 %v2153_v51, %v2153_v51  ;;  %4019 = vpow2.f32 %v5656_v46 }
 0x248   : > { %v3046_v34 = vadd.f32 %v2918_v18, %v2790_v29  ;;  %v2791_v59 = vadd.f32 %v2663_v54, %v2535_v14  ;;  %v2919_v31 = vmul.f32 %v2663_v54, %v2663_v54  ;;  %v1644_v1 = vadd.f32 %v5646_v40, %v5453_v32  ;;  %v1368_v18 = vpop.permute.xlu0 %1367 }
 0x249   : > { %v3048_v4 = vadd.f32 %v2920_v3, %v2792_v13  ;;  %v2537_v63 = vadd.f32 %v2409_v62, %v2281_v10  ;;  %v2665_v42 = vmul.f32 %v2409_v62, %v2409_v62  ;;  %v1515_v19 = vadd.f32 %v5996_v37, %v5637_v58 }
 0x24a   : > { %3174 = vst [vmem:[%s5158_s18 + $0x2a0] sm:$0xff] %v3046_v34  ;;  %v3047_v5 = vadd.f32 %v2919_v31, %v2791_v59  ;;  %v1517_v48 = vadd.f32 %v5993_v9, %v5637_v58  ;;  %v1518_v22 = vadd.f32 %v5994_v7, %v1363_v25  ;;  %v1772_v17 = vmin.f32 %v1644_v1, 0.0  ;;  %v5698_v1 = vpop.f32.mrb[62].mxu0 }
 0x24b   : > { %3176 = vst [vmem:[%s5158_s18 + $0x2b0] sm:$0xff] %v3048_v4  ;;  %v2793_v46 = vadd.f32 %v2665_v42, %v2537_v63  ;;  %v2921_v60 = vmul.f32 %v2665_v42, %v2665_v42  ;;  %v1520_v38 = vadd.f32 %v5995_v57, %v1363_v25  ;;  %v1643_v32 = vadd.f32 %v1515_v19, %v5455_v11  ;;  %v6014_v63 = vld [vmem:[#allocation29_spill] sm:$0xff] }
 0x24c   : > { %3175 = vst [vmem:[%s5158_s18 + $0x2a8] sm:$0xff] %v3047_v5  ;;  %v1645_v40 = vadd.f32 %v1517_v48, %v5487_v44  ;;  %v1646_v21 = vadd.f32 %v1518_v22, %v5489_v2  ;;  %v1519_v20 = vadd.f32 %v5996_v37, %v1363_v25  ;;  %v1990_v58 = vmul.f32 1.442695, %v1772_v17  ;;  %v6013_v44 = vld [vmem:[#allocation11_spill] sm:$0xff]  ;;  %v6015_v5 = vld [vmem:[#allocation12_spill] sm:$0xff] }
 0x24d   : > { %v3049_v12 = vadd.f32 %v2921_v60, %v2793_v46  ;;  %v1648_v51 = vadd.f32 %v1520_v38, %v5491_v47  ;;  %v1521_v29 = vadd.f32 %v5993_v9, %v1363_v25  ;;  %v1771_v14 = vmin.f32 %v1643_v32, 0.0  ;;  %v5703_v38 = vpop.f32.mrb[62].mxu1 }
 0x24e   : > { %v1773_v54 = vmin.f32 %v1645_v40, 0.0  ;;  %v1774_v13 = vmin.f32 %v1646_v21, 0.0  ;;  %v1647_v3 = vadd.f32 %v1519_v20, %v5495_v23  ;;  %4021 = vpow2.f32 %v1990_v58  ;;  %v6016_v21 = vld [vmem:[#allocation30_spill] sm:$0xff] }
 0x24f   : > { %3177 = vst [vmem:[%s5158_s18 + $0x2b8] sm:$0xff] %v3049_v12  ;;  %v1776_v11 = vmin.f32 %v1648_v51, 0.0  ;;  %v1649_v10 = vadd.f32 %v1521_v29, %v6013_v44  ;;  %v1522_v2 = vadd.f32 %v5994_v7, %v1368_v18  ;;  %v1988_v62 = vmul.f32 1.442695, %v1771_v14  ;;  %v5706_v12 = vpop.f32.mrb[63].mxu0  ;;  %v6017_v29 = vld [vmem:[#allocation13_spill] sm:$0xff] }
 0x250   : > { %v1992_v34 = vmul.f32 1.442695, %v1773_v54  ;;  %v1994_v59 = vmul.f32 1.442695, %v1774_v13  ;;  %v1524_v47 = vadd.f32 %v5995_v57, %v1368_v18  ;;  %v1775_v25 = vmin.f32 %v1647_v3, 0.0  ;;  %v5709_v3 = vpop.f32.mrb[63].mxu1 }
 0x251   : > { %v1998_v31 = vmul.f32 1.442695, %v1776_v11  ;;  %v1777_v4 = vmin.f32 %v1649_v10, 0.0  ;;  %v1650_v42 = vadd.f32 %v1522_v2, %v6014_v63  ;;  %v4020_v23 = vpop.eup %4019  ;;  %4023 = vpow2.f32 %v1988_v62  ;;  %v1373_v11 = vpop.permute.xlu1 %1372 }
 0x252   : > { %v1652_v19 = vadd.f32 %v1524_v47, %v6015_v5  ;;  %v1523_v48 = vadd.f32 %v5996_v37, %v1368_v18  ;;  %v1525_v22 = vadd.f32 %v5993_v9, %v1368_v18  ;;  %v2154_v46 = vmul.f32 %v4020_v23, %v4020_v23 }
 0x253   : > { %4025 = vpow2.f32 %v1992_v34  ;;  %v1996_v60 = vmul.f32 1.442695, %v1775_v25  ;;  %v2000_v17 = vmul.f32 1.442695, %v1777_v4  ;;  %v1778_v32 = vmin.f32 %v1650_v42, 0.0 }
 0x254   : > { %4027 = vpow2.f32 %v1994_v59  ;;  %v1780_v40 = vmin.f32 %v1652_v19, 0.0  ;;  %v1651_v20 = vadd.f32 %v1523_v48, %v6016_v21  ;;  %v2282_v58 = vadd.f32 %v4020_v23, %v2154_v46 }
 0x255   : > { %v2410_v51 = vmul.f32 %v2154_v46, %v2154_v46  ;;  %4029 = vpow2.f32 %v1998_v31  ;;  %v1653_v14 = vadd.f32 %v1525_v22, %v6017_v29  ;;  %v2002_v18 = vmul.f32 1.442695, %v1778_v32  ;;  %v5717_v46 = vpop.permute.xlu0 %1377 }
 0x256   : > { %4031 = vpow2.f32 %v1996_v60  ;;  %v2006_v54 = vmul.f32 1.442695, %v1780_v40  ;;  %v1779_v13 = vmin.f32 %v1651_v20, 0.0  ;;  %v1526_v34 = vadd.f32 %v5994_v7, %v1373_v11 }
 0x257   : > { %v2538_v44 = vadd.f32 %v2410_v51, %v2282_v58  ;;  %v2666_v10 = vmul.f32 %v2410_v51, %v2410_v51  ;;  %4033 = vpow2.f32 %v2000_v17  ;;  %v1781_v2 = vmin.f32 %v1653_v14, 0.0 }
 0x258   : > { %4035 = vpow2.f32 %v2002_v18  ;;  %v2004_v62 = vmul.f32 1.442695, %v1779_v13  ;;  %v1528_v59 = vadd.f32 %v5995_v57, %v1373_v11  ;;  %v4022_v47 = vpop.eup %4021  ;;  %v1654_v42 = vadd.f32 %v1526_v34, %v5530_v26 }
 0x259   : > { %v2794_v31 = vadd.f32 %v2666_v10, %v2538_v44  ;;  %v2922_v25 = vmul.f32 %v2666_v10, %v2666_v10  ;;  %4037 = vpow2.f32 %v2006_v54  ;;  %v2008_v4 = vmul.f32 1.442695, %v1781_v2 }
 0x25a   : > { %v2156_v63 = vmul.f32 %v4022_v47, %v4022_v47  ;;  %4039 = vpow2.f32 %v2004_v62  ;;  %v1656_v23 = vadd.f32 %v1528_v59, %v5536_v24  ;;  %v1527_v19 = vadd.f32 %v5996_v37, %v1373_v11 }
 0x25b   : > { %v3050_v5 = vadd.f32 %v2922_v25, %v2794_v31  ;;  %4041 = vpow2.f32 %v2008_v4  ;;  %v1529_v48 = vadd.f32 %v5993_v9, %v1373_v11  ;;  %v4024_v22 = vpop.eup %4023  ;;  %v1782_v32 = vmin.f32 %v1654_v42, 0.0 }
 0x25c   : > { %v2284_v60 = vadd.f32 %v4022_v47, %v2156_v63  ;;  %v2412_v17 = vmul.f32 %v2156_v63, %v2156_v63  ;;  %v1784_v40 = vmin.f32 %v1656_v23, 0.0  ;;  %v2155_v20 = vmul.f32 %v4024_v22, %v4024_v22 }
 0x25d   : > { %v4026_v21 = vpop.eup %4025  ;;  %3178 = vst [vmem:[%s5158_s18 + $0x2c0] sm:$0xff] %v3050_v5  ;;  %v5721_v26 = vadd.f32 %v1527_v19, %v5538_v61  ;;  %v5724_v24 = vadd.f32 %v1529_v48, %v5544_v41  ;;  %v5728_v58 = vadd.f32 %v5994_v7, %v5717_v46  ;;  %v5730_v54 = vmul.f32 1.442695, %v1782_v32 }
 0x25e   : > { %v4028_v51 = vpop.eup %4027  ;;  %v2540_v29 = vadd.f32 %v2412_v17, %v2284_v60  ;;  %v2668_v14 = vmul.f32 %v2412_v17, %v2412_v17  ;;  %v2157_v18 = vmul.f32 %v4026_v21, %v4026_v21  ;;  %v2283_v11 = vadd.f32 %v4024_v22, %v2155_v20 }
 0x25f   : > { %v4030_v13 = vpop.eup %4029  ;;  %v2411_v44 = vmul.f32 %v2155_v20, %v2155_v20  ;;  %v2158_v10 = vmul.f32 %v4028_v51, %v4028_v51  ;;  %v5732_v2 = vmul.f32 1.442695, %v1784_v40  ;;  %4043 = vpow2.f32 %v5730_v54 }
 0x260   : > { %v4032_v61 = vpop.eup %4031  ;;  %v2796_v62 = vadd.f32 %v2668_v14, %v2540_v29  ;;  %v2924_v41 = vmul.f32 %v2668_v14, %v2668_v14  ;;  %v2285_v34 = vadd.f32 %v4026_v21, %v2157_v18  ;;  %v2413_v59 = vmul.f32 %v2157_v18, %v2157_v18 }
 0x261   : > { %v4034_v47 = vpop.eup %4033  ;;  %v2539_v31 = vadd.f32 %v2411_v44, %v2283_v11  ;;  %v2667_v25 = vmul.f32 %v2411_v44, %v2411_v44  ;;  %v2286_v4 = vadd.f32 %v4028_v51, %v2158_v10  ;;  %v2414_v63 = vmul.f32 %v2158_v10, %v2158_v10 }
 0x262   : > { %v4036_v42 = vpop.eup %4035  ;;  %v3052_v23 = vadd.f32 %v2924_v41, %v2796_v62  ;;  %v2541_v5 = vadd.f32 %v2413_v59, %v2285_v34  ;;  %v2669_v19 = vmul.f32 %v2413_v59, %v2413_v59  ;;  %v2160_v48 = vmul.f32 %v4030_v13, %v4030_v13 }
 0x263   : > { %v4038_v22 = vpop.eup %4037  ;;  %v2795_v60 = vadd.f32 %v2667_v25, %v2539_v31  ;;  %v2923_v17 = vmul.f32 %v2667_v25, %v2667_v25  ;;  %v2542_v32 = vadd.f32 %v2414_v63, %v2286_v4  ;;  %v2670_v40 = vmul.f32 %v2414_v63, %v2414_v63 }
 0x264   : > { %v4040_v20 = vpop.eup %4039  ;;  %3180 = vst [vmem:[%s5158_s18 + $0x2d0] sm:$0xff] %v3052_v23  ;;  %v2797_v21 = vadd.f32 %v2669_v19, %v2541_v5  ;;  %v2925_v29 = vmul.f32 %v2669_v19, %v2669_v19  ;;  %v2288_v14 = vadd.f32 %v4030_v13, %v2160_v48  ;;  %v2416_v18 = vmul.f32 %v2160_v48, %v2160_v48 }
 0x265   : > { %v4042_v51 = vpop.eup %4041  ;;  %v3051_v11 = vadd.f32 %v2923_v17, %v2795_v60  ;;  %v2798_v44 = vadd.f32 %v2670_v40, %v2542_v32  ;;  %v2926_v10 = vmul.f32 %v2670_v40, %v2670_v40  ;;  %v2159_v62 = vmul.f32 %v4032_v61, %v4032_v61 }
 0x266   : > { %v3053_v41 = vadd.f32 %v2925_v29, %v2797_v21  ;;  %v2544_v34 = vadd.f32 %v2416_v18, %v2288_v14  ;;  %v2672_v59 = vmul.f32 %v2416_v18, %v2416_v18  ;;  %v2161_v31 = vmul.f32 %v4034_v47, %v4034_v47 }
 0x267   : > { %3179 = vst [vmem:[%s5158_s18 + $0x2c8] sm:$0xff] %v3051_v11  ;;  %v3054_v25 = vadd.f32 %v2926_v10, %v2798_v44  ;;  %v2287_v4 = vadd.f32 %v4032_v61, %v2159_v62  ;;  %v2415_v63 = vmul.f32 %v2159_v62, %v2159_v62  ;;  %v2162_v23 = vmul.f32 %v4036_v42, %v4036_v42 }
 0x268   : > { %3181 = vst [vmem:[%s5158_s18 + $0x2d8] sm:$0xff] %v3053_v41  ;;  %v2800_v5 = vadd.f32 %v2672_v59, %v2544_v34  ;;  %v2928_v13 = vmul.f32 %v2672_v59, %v2672_v59  ;;  %v2289_v19 = vadd.f32 %v4034_v47, %v2161_v31  ;;  %v2417_v48 = vmul.f32 %v2161_v31, %v2161_v31 }
 0x269   : > { %3182 = vst [vmem:[%s5158_s18 + $0x2e0] sm:$0xff] %v3054_v25  ;;  %v2543_v60 = vadd.f32 %v2415_v63, %v2287_v4  ;;  %v2671_v17 = vmul.f32 %v2415_v63, %v2415_v63  ;;  %v2290_v32 = vadd.f32 %v4036_v42, %v2162_v23  ;;  %v2418_v40 = vmul.f32 %v2162_v23, %v2162_v23 }
 0x26a   : > { %v3056_v21 = vadd.f32 %v2928_v13, %v2800_v5  ;;  %v2545_v29 = vadd.f32 %v2417_v48, %v2289_v19  ;;  %v2673_v14 = vmul.f32 %v2417_v48, %v2417_v48  ;;  %v2164_v18 = vmul.f32 %v4038_v22, %v4038_v22 }
 0x26b   : > { %v2799_v11 = vadd.f32 %v2671_v17, %v2543_v60  ;;  %v2927_v44 = vmul.f32 %v2671_v17, %v2671_v17  ;;  %v2546_v61 = vadd.f32 %v2418_v40, %v2290_v32  ;;  %v2674_v10 = vmul.f32 %v2418_v40, %v2418_v40 }
 0x26c   : > { %3184 = vst [vmem:[%s5158_s18 + $0x2f0] sm:$0xff] %v3056_v21  ;;  %v2801_v62 = vadd.f32 %v2673_v14, %v2545_v29  ;;  %v2929_v41 = vmul.f32 %v2673_v14, %v2673_v14  ;;  %v2292_v47 = vadd.f32 %v4038_v22, %v2164_v18  ;;  %v2420_v34 = vmul.f32 %v2164_v18, %v2164_v18 }
 0x26d   : > { %v3055_v59 = vadd.f32 %v2927_v44, %v2799_v11  ;;  %v2802_v31 = vadd.f32 %v2674_v10, %v2546_v61  ;;  %v2930_v25 = vmul.f32 %v2674_v10, %v2674_v10  ;;  %v2163_v42 = vmul.f32 %v4040_v20, %v4040_v20 }
 0x26e   : > { %v3057_v4 = vadd.f32 %v2929_v41, %v2801_v62  ;;  %v2548_v63 = vadd.f32 %v2420_v34, %v2292_v47  ;;  %v2676_v23 = vmul.f32 %v2420_v34, %v2420_v34  ;;  %v2165_v5 = vmul.f32 %v4042_v51, %v4042_v51  ;;  %v1383_v34 = vpop.permute.xlu1 %1382 }
 0x26f   : > { %3183 = vst [vmem:[%s5158_s18 + $0x2e8] sm:$0xff] %v3055_v59  ;;  %v3058_v13 = vadd.f32 %v2930_v25, %v2802_v31  ;;  %v2291_v19 = vadd.f32 %v4040_v20, %v2163_v42  ;;  %v2419_v48 = vmul.f32 %v2163_v42, %v2163_v42  ;;  %4045 = vpow2.f32 %v5732_v2 }
 0x270   : > { %3185 = vst [vmem:[%s5158_s18 + $0x2f8] sm:$0xff] %v3057_v4  ;;  %v2804_v60 = vadd.f32 %v2676_v23, %v2548_v63  ;;  %v2932_v17 = vmul.f32 %v2676_v23, %v2676_v23  ;;  %v2293_v22 = vadd.f32 %v4042_v51, %v2165_v5  ;;  %v2421_v32 = vmul.f32 %v2165_v5, %v2165_v5 }
 0x271   : > { %3186 = vst [vmem:[%s5158_s18 + $0x300] sm:$0xff] %v3058_v13  ;;  %v2547_v40 = vadd.f32 %v2419_v48, %v2291_v19  ;;  %v2675_v21 = vmul.f32 %v2419_v48, %v2419_v48  ;;  %v1783_v29 = vmin.f32 %v5721_v26, 0.0  ;;  %v1785_v20 = vmin.f32 %v5724_v24, 0.0 }
 0x272   : > { %v3060_v14 = vadd.f32 %v2932_v17, %v2804_v60  ;;  %v2549_v18 = vadd.f32 %v2421_v32, %v2293_v22  ;;  %v2677_v11 = vmul.f32 %v2421_v32, %v2421_v32  ;;  %v1658_v51 = vadd.f32 %v5728_v58, %v5556_v33 }
 0x273   : > { %v2803_v44 = vadd.f32 %v2675_v21, %v2547_v40  ;;  %v2931_v54 = vmul.f32 %v2675_v21, %v2675_v21  ;;  %v2012_v61 = vmul.f32 1.442695, %v1783_v29  ;;  %v2016_v41 = vmul.f32 1.442695, %v1785_v20 }
 0x274   : > { %3188 = vst [vmem:[%s5158_s18 + $0x310] sm:$0xff] %v3060_v14  ;;  %v2805_v10 = vadd.f32 %v2677_v11, %v2549_v18  ;;  %v2933_v62 = vmul.f32 %v2677_v11, %v2677_v11  ;;  %v1532_v26 = vadd.f32 %v5995_v57, %v5717_v46  ;;  %v1786_v47 = vmin.f32 %v1658_v51, 0.0 }
 0x275   : > { %v3059_v2 = vadd.f32 %v2931_v54, %v2803_v44  ;;  %4047 = vpow2.f32 %v2012_v61  ;;  %v1531_v24 = vadd.f32 %v5996_v37, %v5717_v46  ;;  %v1533_v33 = vadd.f32 %v5993_v9, %v5717_v46 }
 0x276   : > { %v3061_v59 = vadd.f32 %v2933_v62, %v2805_v10  ;;  %4049 = vpow2.f32 %v2016_v41  ;;  %v1660_v31 = vadd.f32 %v1532_v26, %v5564_v16  ;;  %v2018_v58 = vmul.f32 1.442695, %v1786_v47  ;;  %v4044_v16 = vpop.eup %4043 }
 0x277   : > { %3187 = vst [vmem:[%s5158_s18 + $0x308] sm:$0xff] %v3059_v2  ;;  %v1659_v25 = vadd.f32 %v1531_v24, %v5580_v30  ;;  %v1534_v42 = vadd.f32 %v5994_v7, %v1383_v34  ;;  %v1536_v4 = vadd.f32 %v5995_v57, %v1383_v34  ;;  %v1661_v23 = vadd.f32 %v1533_v33, %v5584_v55 }
 0x278   : > { %3189 = vst [vmem:[%s5158_s18 + $0x318] sm:$0xff] %v3061_v59  ;;  %v1788_v63 = vmin.f32 %v1660_v31, 0.0  ;;  %v1535_v5 = vadd.f32 %v5996_v37, %v1383_v34  ;;  %v1537_v13 = vadd.f32 %v5993_v9, %v1383_v34  ;;  %4051 = vpow2.f32 %v2018_v58 }
 0x279   : > { %v1787_v19 = vmin.f32 %v1659_v25, 0.0  ;;  %v1662_v46 = vadd.f32 %v1534_v42, %v5593_v43  ;;  %v1664_v48 = vadd.f32 %v1536_v4, %v5595_v0  ;;  %v2166_v30 = vmul.f32 %v4044_v16, %v4044_v16  ;;  %v4046_v32 = vpop.eup %4045  ;;  %v5768_v0 = vpop.permute.xlu0 %1387 }
 0x27a   : > { %v2022_v60 = vmul.f32 1.442695, %v1788_v63  ;;  %v1789_v17 = vmin.f32 %v1661_v23, 0.0  ;;  %v1663_v22 = vadd.f32 %v1535_v5, %v5599_v56  ;;  %v1665_v29 = vadd.f32 %v1537_v13, %v5601_v52 }
 0x27b   : > { %v2020_v40 = vmul.f32 1.442695, %v1787_v19  ;;  %v1790_v21 = vmin.f32 %v1662_v46, 0.0  ;;  %v1792_v55 = vmin.f32 %v1664_v48, 0.0  ;;  %v2294_v14 = vadd.f32 %v4044_v16, %v2166_v30 }
 0x27c   : > { %v2422_v18 = vmul.f32 %v2166_v30, %v2166_v30  ;;  %v2168_v11 = vmul.f32 %v4046_v32, %v4046_v32  ;;  %4053 = vpow2.f32 %v2022_v60  ;;  %v2024_v20 = vmul.f32 1.442695, %v1789_v17 }
 0x27d   : > { %4055 = vpow2.f32 %v2020_v40  ;;  %v2026_v43 = vmul.f32 1.442695, %v1790_v21  ;;  %v2030_v44 = vmul.f32 1.442695, %v1792_v55  ;;  %v1791_v62 = vmin.f32 %v1663_v22, 0.0 }
 0x27e   : > { %v2550_v54 = vadd.f32 %v2422_v18, %v2294_v14  ;;  %v2678_v61 = vmul.f32 %v2422_v18, %v2422_v18  ;;  %v2296_v51 = vadd.f32 %v4046_v32, %v2168_v11  ;;  %v2424_v56 = vmul.f32 %v2168_v11, %v2168_v11 }
 0x27f   : > { %v4048_v10 = vpop.eup %4047  ;;  %4057 = vpow2.f32 %v2024_v20  ;;  %v1793_v41 = vmin.f32 %v1665_v29, 0.0  ;;  %v1538_v52 = vadd.f32 %v5994_v7, %v5768_v0  ;;  %v2028_v33 = vmul.f32 1.442695, %v1791_v62 }
 0x280   : > { %v4050_v26 = vpop.eup %4049  ;;  %v2806_v2 = vadd.f32 %v2678_v61, %v2550_v54  ;;  %v2934_v47 = vmul.f32 %v2678_v61, %v2678_v61  ;;  %v2552_v24 = vadd.f32 %v2424_v56, %v2296_v51  ;;  %v2680_v34 = vmul.f32 %v2424_v56, %v2424_v56 }
 0x281   : > { %v2167_v59 = vmul.f32 %v4048_v10, %v4048_v10  ;;  %v2169_v31 = vmul.f32 %v4050_v26, %v4050_v26  ;;  %4059 = vpow2.f32 %v2026_v43  ;;  %v2032_v46 = vmul.f32 1.442695, %v1793_v41 }
 0x282   : > { %v3062_v58 = vadd.f32 %v2934_v47, %v2806_v2  ;;  %v2808_v25 = vadd.f32 %v2680_v34, %v2552_v24  ;;  %v2936_v42 = vmul.f32 %v2680_v34, %v2680_v34  ;;  %4061 = vpow2.f32 %v2030_v44  ;;  %v4052_v4 = vpop.eup %4051 }
 0x283   : > { %v2295_v63 = vadd.f32 %v4048_v10, %v2167_v59  ;;  %v2423_v23 = vmul.f32 %v2167_v59, %v2167_v59  ;;  %v2297_v5 = vadd.f32 %v4050_v26, %v2169_v31  ;;  %v2425_v13 = vmul.f32 %v2169_v31, %v2169_v31 }
 0x284   : > { %3190 = vst [vmem:[%s5158_s18 + $0x320] sm:$0xff] %v3062_v58  ;;  %v3064_v16 = vadd.f32 %v2936_v42, %v2808_v25  ;;  %v2170_v19 = vmul.f32 %v4052_v4, %v4052_v4  ;;  %4063 = vpow2.f32 %v2028_v33  ;;  %v1666_v21 = vadd.f32 %v1538_v52, %v5603_v45 }
 0x285   : > { %v2551_v48 = vadd.f32 %v2423_v23, %v2295_v63  ;;  %v2679_v30 = vmul.f32 %v2423_v23, %v2423_v23  ;;  %v2553_v60 = vadd.f32 %v2425_v13, %v2297_v5  ;;  %v2681_v17 = vmul.f32 %v2425_v13, %v2425_v13 }
 0x286   : > { %v4054_v22 = vpop.eup %4053  ;;  %3192 = vst [vmem:[%s5158_s18 + $0x330] sm:$0xff] %v3064_v16  ;;  %v2298_v32 = vadd.f32 %v4052_v4, %v2170_v19  ;;  %v2426_v40 = vmul.f32 %v2170_v19, %v2170_v19  ;;  %4065 = vpow2.f32 %v2032_v46  ;;  %v1794_v10 = vmin.f32 %v1666_v21, 0.0 }
 0x287   : > { %v4056_v55 = vpop.eup %4055  ;;  %v2807_v29 = vadd.f32 %v2679_v30, %v2551_v48  ;;  %v2935_v14 = vmul.f32 %v2679_v30, %v2679_v30  ;;  %v2809_v18 = vadd.f32 %v2681_v17, %v2553_v60  ;;  %v2937_v11 = vmul.f32 %v2681_v17, %v2681_v17 }
 0x288   : > { %v2554_v20 = vadd.f32 %v2426_v40, %v2298_v32  ;;  %v2682_v43 = vmul.f32 %v2426_v40, %v2426_v40  ;;  %v2172_v44 = vmul.f32 %v4054_v22, %v4054_v22  ;;  %v2171_v54 = vmul.f32 %v4056_v55, %v4056_v55 }
 0x289   : > { %v4058_v61 = vpop.eup %4057  ;;  %v3063_v51 = vadd.f32 %v2935_v14, %v2807_v29  ;;  %v3065_v56 = vadd.f32 %v2937_v11, %v2809_v18  ;;  %v1540_v62 = vadd.f32 %v5995_v57, %v5768_v0  ;;  %v2034_v59 = vmul.f32 1.442695, %v1794_v10 }
 0x28a   : > { %v2810_v41 = vadd.f32 %v2682_v43, %v2554_v20  ;;  %v2938_v45 = vmul.f32 %v2682_v43, %v2682_v43  ;;  %v2300_v52 = vadd.f32 %v4054_v22, %v2172_v44  ;;  %v2428_v26 = vmul.f32 %v2172_v44, %v2172_v44 }
 0x28b   : > { %v4060_v2 = vpop.eup %4059  ;;  %3191 = vst [vmem:[%s5158_s18 + $0x328] sm:$0xff] %v3063_v51  ;;  %3193 = vst [vmem:[%s5158_s18 + $0x338] sm:$0xff] %v3065_v56  ;;  %v2299_v47 = vadd.f32 %v4056_v55, %v2171_v54  ;;  %v2427_v24 = vmul.f32 %v2171_v54, %v2171_v54  ;;  %v2173_v34 = vmul.f32 %v4058_v61, %v4058_v61  ;;  %4067 = vpow2.f32 %v2034_v59  ;;  %v1393_v59 = vpop.permute.xlu1 %1392 }
 0x28c   : > { %v4062_v31 = vpop.eup %4061  ;;  %v3066_v33 = vadd.f32 %v2938_v45, %v2810_v41  ;;  %v2556_v58 = vadd.f32 %v2428_v26, %v2300_v52  ;;  %v2684_v25 = vmul.f32 %v2428_v26, %v2428_v26  ;;  %v2174_v42 = vmul.f32 %v4060_v2, %v4060_v2 }
 0x28d   : > { %v2555_v4 = vadd.f32 %v2427_v24, %v2299_v47  ;;  %v2683_v63 = vmul.f32 %v2427_v24, %v2427_v24  ;;  %v2301_v23 = vadd.f32 %v4058_v61, %v2173_v34  ;;  %v2429_v5 = vmul.f32 %v2173_v34, %v2173_v34 }
 0x28e   : > { %v4064_v13 = vpop.eup %4063  ;;  %3194 = vst [vmem:[%s5158_s18 + $0x340] sm:$0xff] %v3066_v33  ;;  %v2812_v16 = vadd.f32 %v2684_v25, %v2556_v58  ;;  %v2940_v19 = vmul.f32 %v2684_v25, %v2684_v25  ;;  %v2302_v46 = vadd.f32 %v4060_v2, %v2174_v42  ;;  %v2430_v48 = vmul.f32 %v2174_v42, %v2174_v42 }
 0x28f   : > { %v2811_v30 = vadd.f32 %v2683_v63, %v2555_v4  ;;  %v2939_v60 = vmul.f32 %v2683_v63, %v2683_v63  ;;  %v2557_v17 = vadd.f32 %v2429_v5, %v2301_v23  ;;  %v2685_v22 = vmul.f32 %v2429_v5, %v2429_v5 }
 0x290   : > { %v4066_v32 = vpop.eup %4065  ;;  %v3068_v40 = vadd.f32 %v2940_v19, %v2812_v16  ;;  %v2558_v21 = vadd.f32 %v2430_v48, %v2302_v46  ;;  %v2686_v55 = vmul.f32 %v2430_v48, %v2430_v48  ;;  %v2176_v29 = vmul.f32 %v4062_v31, %v4062_v31 }
 0x291   : > { %v3067_v14 = vadd.f32 %v2939_v60, %v2811_v30  ;;  %v2813_v18 = vadd.f32 %v2685_v22, %v2557_v17  ;;  %v2941_v11 = vmul.f32 %v2685_v22, %v2685_v22  ;;  %v2175_v20 = vmul.f32 %v4064_v13, %v4064_v13  ;;  %v1398_v30 = vpop.permute.xlu0 %1397 }
 0x292   : > { %3196 = vst [vmem:[%s5158_s18 + $0x350] sm:$0xff] %v3068_v40  ;;  %v2814_v43 = vadd.f32 %v2686_v55, %v2558_v21  ;;  %v2942_v44 = vmul.f32 %v2686_v55, %v2686_v55  ;;  %v2304_v54 = vadd.f32 %v4062_v31, %v2176_v29  ;;  %v2432_v61 = vmul.f32 %v2176_v29, %v2176_v29 }
 0x293   : > { %3195 = vst [vmem:[%s5158_s18 + $0x348] sm:$0xff] %v3067_v14  ;;  %v3069_v51 = vadd.f32 %v2941_v11, %v2813_v18  ;;  %v2303_v56 = vadd.f32 %v4064_v13, %v2175_v20  ;;  %v2431_v10 = vmul.f32 %v2175_v20, %v2175_v20  ;;  %v2177_v41 = vmul.f32 %v4066_v32, %v4066_v32 }
 0x294   : > { %v3070_v45 = vadd.f32 %v2942_v44, %v2814_v43  ;;  %v2560_v52 = vadd.f32 %v2432_v61, %v2304_v54  ;;  %v2688_v26 = vmul.f32 %v2432_v61, %v2432_v61  ;;  %v1668_v31 = vadd.f32 %v1540_v62, %v5628_v36 }
 0x295   : > { %3197 = vst [vmem:[%s5158_s18 + $0x358] sm:$0xff] %v3069_v51  ;;  %v2559_v2 = vadd.f32 %v2431_v10, %v2303_v56  ;;  %v2687_v47 = vmul.f32 %v2431_v10, %v2431_v10  ;;  %v2305_v24 = vadd.f32 %v4066_v32, %v2177_v41  ;;  %v2433_v34 = vmul.f32 %v2177_v41, %v2177_v41  ;;  %v4068_v43 = vpop.eup %4067 }
 0x296   : > { %3198 = vst [vmem:[%s5158_s18 + $0x360] sm:$0xff] %v3070_v45  ;;  %v2816_v33 = vadd.f32 %v2688_v26, %v2560_v52  ;;  %v2944_v58 = vmul.f32 %v2688_v26, %v2688_v26  ;;  %v1539_v25 = vadd.f32 %v5996_v37, %v5768_v0  ;;  %v1796_v13 = vmin.f32 %v1668_v31, 0.0  ;;  %v5806_v26 = vpop.permute.xlu1 %1402 }
 0x297   : > { %v2815_v42 = vadd.f32 %v2687_v47, %v2559_v2  ;;  %v2943_v4 = vmul.f32 %v2687_v47, %v2687_v47  ;;  %v2561_v63 = vadd.f32 %v2433_v34, %v2305_v24  ;;  %v2689_v23 = vmul.f32 %v2433_v34, %v2433_v34 }
 0x298   : > { %v3072_v5 = vadd.f32 %v2944_v58, %v2816_v33  ;;  %v1667_v16 = vadd.f32 %v1539_v25, %v5635_v27  ;;  %v1541_v19 = vadd.f32 %v5993_v9, %v5768_v0  ;;  %v1542_v62 = vadd.f32 %v5994_v7, %v1393_v59 }
 0x299   : > { %v3071_v46 = vadd.f32 %v2943_v4, %v2815_v42  ;;  %v2817_v48 = vadd.f32 %v2689_v23, %v2561_v63  ;;  %v2945_v36 = vmul.f32 %v2689_v23, %v2689_v23  ;;  %v2038_v60 = vmul.f32 1.442695, %v1796_v13 }
 0x29a   : > { %3200 = vst [vmem:[%s5158_s18 + $0x370] sm:$0xff] %v3072_v5  ;;  %v1795_v17 = vmin.f32 %v1667_v16, 0.0  ;;  %v1669_v22 = vadd.f32 %v1541_v19, %v5639_v35  ;;  %v1544_v32 = vadd.f32 %v5995_v57, %v1393_v59  ;;  %v1670_v27 = vadd.f32 %v1542_v62, %v5649_v6 }
 0x29b   : > { %3199 = vst [vmem:[%s5158_s18 + $0x368] sm:$0xff] %v3071_v46  ;;  %v3073_v40 = vadd.f32 %v2945_v36, %v2817_v48  ;;  %v1543_v0 = vadd.f32 %v5996_v37, %v1393_v59  ;;  %v1545_v21 = vadd.f32 %v5993_v9, %v1393_v59  ;;  %4069 = vpow2.f32 %v2038_v60 }
 0x29c   : > { %v2036_v55 = vmul.f32 1.442695, %v1795_v17  ;;  %v1797_v29 = vmin.f32 %v1669_v22, 0.0  ;;  %v1672_v14 = vadd.f32 %v1544_v32, %v5651_v8  ;;  %v1798_v18 = vmin.f32 %v1670_v27, 0.0 }
 0x29d   : > { %3201 = vst [vmem:[%s5158_s18 + $0x378] sm:$0xff] %v3073_v40  ;;  %v1671_v11 = vadd.f32 %v1543_v0, %v5653_v53  ;;  %v1673_v35 = vadd.f32 %v1545_v21, %v5659_v39  ;;  %v1546_v20 = vadd.f32 %v5994_v7, %v1398_v30  ;;  %v1548_v54 = vadd.f32 %v5995_v57, %v1398_v30 }
 0x29e   : > { %4071 = vpow2.f32 %v2036_v55  ;;  %v2040_v6 = vmul.f32 1.442695, %v1797_v29  ;;  %v1800_v44 = vmin.f32 %v1672_v14, 0.0  ;;  %v2178_v61 = vmul.f32 %v4068_v43, %v4068_v43 }
 0x29f   : > { %v2042_v51 = vmul.f32 1.442695, %v1798_v18  ;;  %v1799_v56 = vmin.f32 %v1671_v11, 0.0  ;;  %v1801_v10 = vmin.f32 %v1673_v35, 0.0  ;;  %v1674_v41 = vadd.f32 %v1546_v20, %v5661_v15 }
 0x2a0   : > { %4073 = vpow2.f32 %v2040_v6  ;;  %v2046_v8 = vmul.f32 1.442695, %v1800_v44  ;;  %v1676_v53 = vadd.f32 %v1548_v54, %v5663_v50  ;;  %v2306_v45 = vadd.f32 %v4068_v43, %v2178_v61 }
 0x2a1   : > { %v2434_v39 = vmul.f32 %v2178_v61, %v2178_v61  ;;  %4075 = vpow2.f32 %v2042_v51  ;;  %v2044_v52 = vmul.f32 1.442695, %v1799_v56  ;;  %v2048_v2 = vmul.f32 1.442695, %v1801_v10 }
 0x2a2   : > { %4077 = vpow2.f32 %v2046_v8  ;;  %v1802_v47 = vmin.f32 %v1674_v41, 0.0  ;;  %v1804_v24 = vmin.f32 %v1676_v53, 0.0  ;;  %v1547_v58 = vadd.f32 %v5996_v37, %v1398_v30 }
 0x2a3   : > { %v2562_v34 = vadd.f32 %v2434_v39, %v2306_v45  ;;  %v2690_v33 = vmul.f32 %v2434_v39, %v2434_v39  ;;  %4079 = vpow2.f32 %v2044_v52  ;;  %v1549_v50 = vadd.f32 %v5993_v9, %v1398_v30 }
 0x2a4   : > { %4081 = vpow2.f32 %v2048_v2  ;;  %v2050_v31 = vmul.f32 1.442695, %v1802_v47  ;;  %v2054_v15 = vmul.f32 1.442695, %v1804_v24  ;;  %v1675_v4 = vadd.f32 %v1547_v58, %v5666_v28 }
 0x2a5   : > { %v2818_v25 = vadd.f32 %v2690_v33, %v2562_v34  ;;  %v2946_v42 = vmul.f32 %v2690_v33, %v2690_v33  ;;  %v1550_v63 = vadd.f32 %v5994_v7, %v5806_v26  ;;  %v4070_v23 = vpop.eup %4069  ;;  %v1677_v59 = vadd.f32 %v1549_v50, %v5670_v49 }
 0x2a6   : > { %4083 = vpow2.f32 %v2050_v31  ;;  %v1552_v5 = vadd.f32 %v5995_v57, %v5806_v26  ;;  %v1551_v13 = vadd.f32 %v5996_v37, %v5806_v26  ;;  %v2180_v19 = vmul.f32 %v4070_v23, %v4070_v23 }
 0x2a7   : > { %v3074_v16 = vadd.f32 %v2946_v42, %v2818_v25  ;;  %4085 = vpow2.f32 %v2054_v15  ;;  %v1803_v46 = vmin.f32 %v1675_v4, 0.0  ;;  %v1805_v28 = vmin.f32 %v1677_v59, 0.0 }
 0x2a8   : > { %v4072_v48 = vpop.eup %4071  ;;  %v1678_v36 = vadd.f32 %v1550_v63, %v5698_v1  ;;  %v5820_v7 = vadd.f32 %v1552_v5, %v5703_v38  ;;  %v5823_v62 = vadd.f32 %v1551_v13, %v5706_v12  ;;  %v2308_v49 = vadd.f32 %v4070_v23, %v2180_v19 }
 0x2a9   : > { %3202 = vst [vmem:[%s5158_s18 + $0x380] sm:$0xff] %v3074_v16  ;;  %v2436_v57 = vmul.f32 %v2180_v19, %v2180_v19  ;;  %v2179_v30 = vmul.f32 %v4072_v48, %v4072_v48  ;;  %v2052_v60 = vmul.f32 1.442695, %v1803_v46  ;;  %v5826_v17 = vmul.f32 1.442695, %v1805_v28 }
 0x2aa   : > { %v4074_v37 = vpop.eup %4073  ;;  %v1806_v22 = vmin.f32 %v1678_v36, 0.0  ;;  %v1808_v32 = vmin.f32 %v5820_v7, 0.0  ;;  %v1807_v40 = vmin.f32 %v5823_v62, 0.0 }
 0x2ab   : > { %v4076_v1 = vpop.eup %4075  ;;  %v2564_v27 = vadd.f32 %v2436_v57, %v2308_v49  ;;  %v2692_v38 = vmul.f32 %v2436_v57, %v2436_v57  ;;  %v2307_v0 = vadd.f32 %v4072_v48, %v2179_v30  ;;  %v2435_v21 = vmul.f32 %v2179_v30, %v2179_v30 }
 0x2ac   : > { %v4078_v12 = vpop.eup %4077  ;;  %v2181_v55 = vmul.f32 %v4074_v37, %v4074_v37  ;;  %v2182_v29 = vmul.f32 %v4076_v1, %v4076_v1  ;;  %4087 = vpow2.f32 %v2052_v60  ;;  %v5830_v14 = vmul.f32 1.442695, %v1806_v22 }
 0x2ad   : > { %v4080_v18 = vpop.eup %4079  ;;  %v2820_v11 = vadd.f32 %v2692_v38, %v2564_v27  ;;  %v2948_v35 = vmul.f32 %v2692_v38, %v2692_v38  ;;  %v2563_v20 = vadd.f32 %v2435_v21, %v2307_v0  ;;  %v2691_v43 = vmul.f32 %v2435_v21, %v2435_v21 }
 0x2ae   : > { %v4082_v6 = vpop.eup %4081  ;;  %v2309_v44 = vadd.f32 %v4074_v37, %v2181_v55  ;;  %v2437_v54 = vmul.f32 %v2181_v55, %v2181_v55  ;;  %v2310_v61 = vadd.f32 %v4076_v1, %v2182_v29  ;;  %v2438_v51 = vmul.f32 %v2182_v29, %v2182_v29 }
 0x2af   : > { %v3076_v56 = vadd.f32 %v2948_v35, %v2820_v11  ;;  %v2819_v10 = vadd.f32 %v2691_v43, %v2563_v20  ;;  %v2947_v8 = vmul.f32 %v2691_v43, %v2691_v43  ;;  %v2184_v41 = vmul.f32 %v4078_v12, %v4078_v12 }
 0x2b0   : > { %v4084_v53 = vpop.eup %4083  ;;  %v2565_v45 = vadd.f32 %v2437_v54, %v2309_v44  ;;  %v2693_v39 = vmul.f32 %v2437_v54, %v2437_v54  ;;  %v2566_v52 = vadd.f32 %v2438_v51, %v2310_v61  ;;  %v2694_v2 = vmul.f32 %v2438_v51, %v2438_v51 }
 0x2b1   : > { %v4086_v47 = vpop.eup %4085  ;;  %3204 = vst [vmem:[%s5158_s18 + $0x390] sm:$0xff] %v3076_v56  ;;  %v3075_v24 = vadd.f32 %v2947_v8, %v2819_v10  ;;  %v2312_v34 = vadd.f32 %v4078_v12, %v2184_v41  ;;  %v2440_v33 = vmul.f32 %v2184_v41, %v2184_v41  ;;  %v2183_v58 = vmul.f32 %v4080_v18, %v4080_v18 }
 0x2b2   : > { %v2821_v31 = vadd.f32 %v2693_v39, %v2565_v45  ;;  %v2949_v15 = vmul.f32 %v2693_v39, %v2693_v39  ;;  %v2822_v50 = vadd.f32 %v2694_v2, %v2566_v52  ;;  %v2950_v25 = vmul.f32 %v2694_v2, %v2694_v2 }
 0x2b3   : > { %3203 = vst [vmem:[%s5158_s18 + $0x388] sm:$0xff] %v3075_v24  ;;  %v2568_v42 = vadd.f32 %v2440_v33, %v2312_v34  ;;  %v2696_v4 = vmul.f32 %v2440_v33, %v2440_v33  ;;  %v2311_v63 = vadd.f32 %v4080_v18, %v2183_v58  ;;  %v2439_v23 = vmul.f32 %v2183_v58, %v2183_v58 }
 0x2b4   : > { %v3077_v59 = vadd.f32 %v2949_v15, %v2821_v31  ;;  %v3078_v5 = vadd.f32 %v2950_v25, %v2822_v50  ;;  %v2185_v13 = vmul.f32 %v4082_v6, %v4082_v6  ;;  %v2186_v16 = vmul.f32 %v4084_v53, %v4084_v53 }
 0x2b5   : > { %v2824_v19 = vadd.f32 %v2696_v4, %v2568_v42  ;;  %v2952_v46 = vmul.f32 %v2696_v4, %v2696_v4  ;;  %v2567_v48 = vadd.f32 %v2439_v23, %v2311_v63  ;;  %v2695_v28 = vmul.f32 %v2439_v23, %v2439_v23 }
 0x2b6   : > { %v4088_v36 = vpop.eup %4087  ;;  %3205 = vst [vmem:[%s5158_s18 + $0x398] sm:$0xff] %v3077_v59  ;;  %3206 = vst [vmem:[%s5158_s18 + $0x3a0] sm:$0xff] %v3078_v5  ;;  %v2313_v49 = vadd.f32 %v4082_v6, %v2185_v13  ;;  %v2441_v57 = vmul.f32 %v2185_v13, %v2185_v13  ;;  %v2314_v30 = vadd.f32 %v4084_v53, %v2186_v16  ;;  %4089 = vpow2.f32 %v5826_v17 }
 0x2b7   : > { %v2442_v60 = vmul.f32 %v2186_v16, %v2186_v16  ;;  %v3080_v37 = vadd.f32 %v2952_v46, %v2824_v19  ;;  %v2823_v22 = vadd.f32 %v2695_v28, %v2567_v48  ;;  %v2951_v1 = vmul.f32 %v2695_v28, %v2695_v28 }
 0x2b8   : > { %v2188_v27 = vmul.f32 %v4086_v47, %v4086_v47  ;;  %v2569_v38 = vadd.f32 %v2441_v57, %v2313_v49  ;;  %v2697_v0 = vmul.f32 %v2441_v57, %v2441_v57  ;;  %v2187_v11 = vmul.f32 %v4088_v36, %v4088_v36 }
 0x2b9   : > { %v2570_v21 = vadd.f32 %v2442_v60, %v2314_v30  ;;  %v2698_v12 = vmul.f32 %v2442_v60, %v2442_v60  ;;  %3208 = vst [vmem:[%s5158_s18 + $0x3b0] sm:$0xff] %v3080_v37  ;;  %v3079_v55 = vadd.f32 %v2951_v1, %v2823_v22  ;;  %v2062_v8 = vmul.f32 1.442695, %v1808_v32 }
 0x2ba   : > { %v2316_v29 = vadd.f32 %v4086_v47, %v2188_v27  ;;  %v2444_v18 = vmul.f32 %v2188_v27, %v2188_v27  ;;  %v2825_v35 = vadd.f32 %v2697_v0, %v2569_v38  ;;  %v2953_v20 = vmul.f32 %v2697_v0, %v2697_v0 }
 0x2bb   : > { %v2826_v43 = vadd.f32 %v2698_v12, %v2570_v21  ;;  %v2954_v6 = vmul.f32 %v2698_v12, %v2698_v12  ;;  %3207 = vst [vmem:[%s5158_s18 + $0x3a8] sm:$0xff] %v3079_v55  ;;  %v2315_v61 = vadd.f32 %v4088_v36, %v2187_v11  ;;  %v2443_v51 = vmul.f32 %v2187_v11, %v2187_v11 }
 0x2bc   : > { %v2572_v44 = vadd.f32 %v2444_v18, %v2316_v29  ;;  %v2700_v54 = vmul.f32 %v2444_v18, %v2444_v18  ;;  %v3081_v56 = vadd.f32 %v2953_v20, %v2825_v35  ;;  %4091 = vpow2.f32 %v5830_v14 }
 0x2bd   : > { %v3082_v10 = vadd.f32 %v2954_v6, %v2826_v43  ;;  %v2571_v45 = vadd.f32 %v2443_v51, %v2315_v61  ;;  %v2699_v39 = vmul.f32 %v2443_v51, %v2443_v51  ;;  %v2060_v52 = vmul.f32 1.442695, %v1807_v40 }
 0x2be   : > { %v2828_v41 = vadd.f32 %v2700_v54, %v2572_v44  ;;  %v2956_v53 = vmul.f32 %v2700_v54, %v2700_v54  ;;  %3209 = vst [vmem:[%s5158_s18 + $0x3b8] sm:$0xff] %v3081_v56  ;;  %v1553_v2 = vadd.f32 %v5993_v9, %v5806_v26  ;;  %4093 = vpow2.f32 %v2062_v8 }
 0x2bf   : > { %3210 = vst [vmem:[%s5158_s18 + $0x3c0] sm:$0xff] %v3082_v10  ;;  %v2827_v47 = vadd.f32 %v2699_v39, %v2571_v45  ;;  %v2955_v7 = vmul.f32 %v2699_v39, %v2699_v39  ;;  %4095 = vpow2.f32 %v2060_v52 }
 0x2c0   : > { %v3084_v17 = vadd.f32 %v2956_v53, %v2828_v41  ;;  %v1681_v32 = vadd.f32 %v1553_v2, %v5709_v3  ;;  %v4090_v58 = vpop.eup %4089 }
 0x2c1   : > { %v3083_v24 = vadd.f32 %v2955_v7, %v2827_v47  ;;  %v2189_v14 = vmul.f32 %v4090_v58, %v4090_v58 }
 0x2c2   : > { %3212 = vst [vmem:[%s5158_s18 + $0x3d0] sm:$0xff] %v3084_v17  ;;  %v1809_v34 = vmin.f32 %v1681_v32, 0.0 }
 0x2c3   : > { %3211 = vst [vmem:[%s5158_s18 + $0x3c8] sm:$0xff] %v3083_v24  ;;  %v2317_v31 = vadd.f32 %v4090_v58, %v2189_v14  ;;  %v2445_v15 = vmul.f32 %v2189_v14, %v2189_v14 }
 0x2c4   : > { %v2064_v33 = vmul.f32 1.442695, %v1809_v34 }
 0x2c5   : > { %v2573_v25 = vadd.f32 %v2445_v15, %v2317_v31  ;;  %v2701_v42 = vmul.f32 %v2445_v15, %v2445_v15 }
 0x2c6   : > { %4097 = vpow2.f32 %v2064_v33  ;;  %v4092_v62 = vpop.eup %4091 }
 0x2c7   : > { %v2190_v9 = vmul.f32 %v4092_v62, %v4092_v62  ;;  %v2829_v5 = vadd.f32 %v2701_v42, %v2573_v25  ;;  %v2957_v13 = vmul.f32 %v2701_v42, %v2701_v42 }
 0x2c8   : > { %v4094_v40 = vpop.eup %4093 }
 0x2c9   : > { %v4096_v26 = vpop.eup %4095  ;;  %v2192_v50 = vmul.f32 %v4094_v40, %v4094_v40  ;;  %v2318_v4 = vadd.f32 %v4092_v62, %v2190_v9  ;;  %v2446_v63 = vmul.f32 %v2190_v9, %v2190_v9  ;;  %v3085_v49 = vadd.f32 %v2957_v13, %v2829_v5 }
 0x2ca   : > { %v2191_v59 = vmul.f32 %v4096_v26, %v4096_v26 }
 0x2cb   : > { %v2320_v3 = vadd.f32 %v4094_v40, %v2192_v50  ;;  %v2448_v23 = vmul.f32 %v2192_v50, %v2192_v50  ;;  %v2574_v16 = vadd.f32 %v2446_v63, %v2318_v4  ;;  %v2702_v19 = vmul.f32 %v2446_v63, %v2446_v63  ;;  %3213 = vst [vmem:[%s5158_s18 + $0x3d8] sm:$0xff] %v3085_v49 }
 0x2cc   : > { %v2319_v28 = vadd.f32 %v4096_v26, %v2191_v59  ;;  %v2447_v36 = vmul.f32 %v2191_v59, %v2191_v59 }
 0x2cd   : > { %v2576_v46 = vadd.f32 %v2448_v23, %v2320_v3  ;;  %v2704_v48 = vmul.f32 %v2448_v23, %v2448_v23  ;;  %v2830_v57 = vadd.f32 %v2702_v19, %v2574_v16  ;;  %v2958_v30 = vmul.f32 %v2702_v19, %v2702_v19 }
 0x2ce   : > { %v2575_v1 = vadd.f32 %v2447_v36, %v2319_v28  ;;  %v2703_v27 = vmul.f32 %v2447_v36, %v2447_v36 }
 0x2cf   : > { %v2832_v37 = vadd.f32 %v2704_v48, %v2576_v46  ;;  %v2960_v22 = vmul.f32 %v2704_v48, %v2704_v48  ;;  %v3086_v38 = vadd.f32 %v2958_v30, %v2830_v57 }
 0x2d0   : > { %v4098_v60 = vpop.eup %4097  ;;  %v2831_v12 = vadd.f32 %v2703_v27, %v2575_v1  ;;  %v2959_v55 = vmul.f32 %v2703_v27, %v2703_v27 }
 0x2d1   : > { %v2193_v0 = vmul.f32 %v4098_v60, %v4098_v60  ;;  %v3088_v21 = vadd.f32 %v2960_v22, %v2832_v37  ;;  %3214 = vst [vmem:[%s5158_s18 + $0x3e0] sm:$0xff] %v3086_v38 }
 0x2d2   : > { %v3087_v11 = vadd.f32 %v2959_v55, %v2831_v12 }
 0x2d3   : > { %v2321_v29 = vadd.f32 %v4098_v60, %v2193_v0  ;;  %v2449_v18 = vmul.f32 %v2193_v0, %v2193_v0  ;;  %3216 = vst [vmem:[%s5158_s18 + $0x3f0] sm:$0xff] %v3088_v21 }
 0x2d4   : > { %3215 = vst [vmem:[%s5158_s18 + $0x3e8] sm:$0xff] %v3087_v11 }
 0x2d5   : > { %v2577_v35 = vadd.f32 %v2449_v18, %v2321_v29  ;;  %v2705_v20 = vmul.f32 %v2449_v18, %v2449_v18 }
 0x2d7   : > { %v2833_v43 = vadd.f32 %v2705_v20, %v2577_v35  ;;  %v2961_v6 = vmul.f32 %v2705_v20, %v2705_v20 }
 0x2d9   : > { %v3089_v44 = vadd.f32 %v2961_v6, %v2833_v43 }
 0x2db   : > { %3217 = vst [vmem:[%s5158_s18 + $0x3f8] sm:$0xff] %v3089_v44 }
 0x2dc   : > { %4112 = shalt.err (!%p4109_p5)
}
 0x2dd   : > { %s4113_s12 = scalar_lea.hbm %s5860_s28, 16384  ;;  %s4117_s14 = scalar_lea.hbm %s5918_s5, 32768 }
 0x2de   : > { %p4114_p6 = scmp.ne.s32.totalorder %s5860_s28, %s4113_s12  ;;  %p4118_p10 = scmp.lt.u32.totalorder %s5860_s28, %s5918_s5 }
 0x2df   : > { %p4119_p11 = scmp.lt.u32.totalorder %s4117_s14, %s4113_s12  ;;  %p4121_p13 = scmp.lt.u32.totalorder %s4113_s12, %s5860_s28 }
 0x2e0   : > { %p4115_p7 = pnand %p4114_p6, %p4256_p4 }
 0x2e1   : > { %p4120_p12 = por %p4119_p11, %p4118_p10 }
 0x2e2   : > { %p4116_p9 = pneg %p4115_p7 }
 0x2e3   : > { %p4122_p0 = por %p4121_p13, %p4120_p12 }
 0x2e5   : > { %p4123_p1 = pnand %p4122_p0, %p4116_p9 }
 0x2e7   : > { %4126 = shalt.err (!%p4123_p1)
}
 0x2e8   : > { %s4181_s18 = smov 512   ;;  %s4182_s15 = smov 32  }
 0x2e9   : > { %3783 = dma.vmem_to_hbm [thread:$0]  (%p4256_p4), %s5862_s17, 16384, %s5860_s28, %s5867_s30, %s4181_s18, %s4181_s18, %s4182_s15  }
 0x2ea PF: > { %p3789_p2 = scmp.ge.s32.totalorder %s4177_s25, 2  ;;  %s3250_s19 = sand.u32 1, %s4157_s20  }
 0x2eb   : > { %s3251_s0 = scalar_lea.sflag [#allocation5], %s3250_s19 }
 0x2ec   : > { %p3786_p3 = pnand %p3789_p2, %p4263_p8 }
 0x2ee   : > { %4152 = dma.done.wait (!%p3786_p3), %s3251_s0, 16384  }
 0x2ef   : > { %4154 = vsyncadd (!%p3786_p3), %s3251_s0, 4294950912  ;;  %s19_s25 = sadd.s32 1, %s4177_s25   ;;  %s6018_s20 = smov %s4161_s21 }
 0x2f0   : > { %p16_p5 = scmp.ge.s32.totalorder %s19_s25, 4   ;;  %s6019_s21 = smov %s4165_s22 }
 0x2f1   : > { %s6020_s22 = smov %s4269_s7  ;;  %s6021_s23 = smov %s4173_s24 }
 0x2f2   : > { %s6022_s24 = smov %s6024_s27  ;;  %18 = sbr.rel (!%p16_p5) target bundleno = 6 (0x6), region = 80 }
 0x2f9   :  { %3256 = vsyncpa [#allocation5], 1 }
 0x2fa   :  { %3258 = vsyncpa [#allocation5 + $0x1], 1 }

</bundles_post_ra>
